<compile_context>
chip_gen: v7x
topology: tpu7x:2x2x1
jax: 0.10.0
libtpu: 0.0.40
codegen_flags: <defaults>
</compile_context>

<pallas_src>
import functools

import jax
import jax.numpy as jnp
from jax.experimental import pallas as pl
from jax.experimental.pallas import tpu as pltpu

KERNEL_SIZE = 5
PAD = KERNEL_SIZE - 1          # causal left pad (F.pad(x, [4, 0]))
BN_EPS = 1e-5
NUM_LAYERS = 5
LANE = 128


def _round_up(x, m):
    return (x + m - 1) // m * m


# ----------------------------------------------------------------------------
# Fused kernel: 5 x (causal conv1d + folded BN (+ tanh)) on one (b, T-tile).
# ----------------------------------------------------------------------------
def _postnet_fused_kernel(x_ref,
                          w0_ref, w1_ref, w2_ref, w3_ref, w4_ref,
                          a0_ref, a1_ref, a2_ref, a3_ref, a4_ref,
                          o_ref,
                          t0_ref, t1_ref, t2_ref, t3_ref, t4_ref):
    w_refs = (w0_ref, w1_ref, w2_ref, w3_ref, w4_ref)
    a_refs = (a0_ref, a1_ref, a2_ref, a3_ref, a4_ref)
    tail_refs = (t0_ref, t1_ref, t2_ref, t3_ref, t4_ref)

    tile = o_ref.shape[1]

    # First T-tile of a batch element: the carried tails are the causal left
    # zero-padding of every layer (replaces the wrapper-side jnp.pad).
    @pl.when(pl.program_id(1) == 0)
    def _zero_tails():
        for t_ref in tail_refs:
            t_ref[...] = jnp.zeros_like(t_ref)

    h = x_ref[0]  # (tile, Cin_pad) bf16 — layer input, kept resident in VMEM

    for layer in range(NUM_LAYERS):
        w_ref = w_refs[layer]          # (K, Cin, Cout) bf16
        a_ref = a_refs[layer]          # (2, Cout) f32: [scale; shift(+bias)]
        tail_ref = tail_refs[layer]    # (PAD, Cin) bf16 — prev tile's last rows

        prev_tail = tail_ref[...]
        tail_ref[...] = h[tile - PAD:, :]        # carry halo to next T-tile
        xf = jnp.concatenate([prev_tail, h], axis=0)   # (tile+PAD, Cin)

        cout = w_ref.shape[2]
        acc = jnp.zeros((tile, cout), jnp.float32)
        for k in range(KERNEL_SIZE):
            # causal conv = 5 shifted matmuls on the MXU, f32 accumulation
            acc = acc + jnp.dot(xf[k:k + tile, :], w_ref[k],
                                preferred_element_type=jnp.float32)

        scale = a_ref[0:1, :]          # f32 epilogue (conv bias folded in shift)
        shift = a_ref[1:2, :]
        y = acc * scale + shift

        if layer < NUM_LAYERS - 1:
            h = jnp.tanh(y).astype(jnp.bfloat16)   # bf16 input to next layer
        else:
            o_ref[0] = y.astype(o_ref.dtype)       # lane-dense (128-wide) store


# ----------------------------------------------------------------------------
# Wrapper
# ----------------------------------------------------------------------------
def postnet_forward(x, kparams, mel_channels):
    """x: [B, T, mel_channels] -> [B, T, mel_channels] (inference semantics)."""
    B, T, C = x.shape
    assert C == mel_channels

    cin_pad = kparams[0]["w"].shape[1]      # mel padded up to 128
    cout_pad = kparams[-1]["w"].shape[2]    # mel padded up to 128

    # T tiling: <=256 rows per tile, multiple of 8; pad T (causality => padding
    # on the right with zeros never affects the first T outputs).
    tile = min(256, _round_up(T, 8))
    t_pad = _round_up(T, tile)
    n_t = t_pad // tile

    xp = jnp.pad(x, ((0, 0), (0, t_pad - T), (0, cin_pad - C))
                 ).astype(jnp.bfloat16)      # [B, t_pad, cin_pad] bf16

    in_specs = [pl.BlockSpec((1, tile, cin_pad), lambda b, t: (b, t, 0))]
    for p in kparams:
        kk, ci, co = p["w"].shape
        in_specs.append(pl.BlockSpec((kk, ci, co), lambda b, t: (0, 0, 0)))
    for p in kparams:
        co = p["affine"].shape[1]
        in_specs.append(pl.BlockSpec((2, co), lambda b, t: (0, 0)))

    out_specs = pl.BlockSpec((1, tile, cout_pad), lambda b, t: (b, t, 0))

    scratch_shapes = [pltpu.VMEM((PAD, p["w"].shape[1]), jnp.bfloat16)
                      for p in kparams]

    flops = sum(2 * KERNEL_SIZE * p["w"].shape[1] * p["w"].shape[2]
                for p in kparams) * B * t_pad
    transcendentals = (NUM_LAYERS - 1) * B * t_pad * 256      # tanh
    bytes_accessed = (xp.size * 2
                      + B * t_pad * cout_pad * jnp.dtype(x.dtype).itemsize
                      + sum(p["w"].size * 2 + p["affine"].size * 4
                            for p in kparams))

    out = pl.pallas_call(
        _postnet_fused_kernel,
        out_shape=jax.ShapeDtypeStruct((B, t_pad, cout_pad), x.dtype),
        grid=(B, n_t),
        in_specs=in_specs,
        out_specs=out_specs,
        scratch_shapes=scratch_shapes,
        compiler_params=pltpu.CompilerParams(
            dimension_semantics=("parallel", "arbitrary")),
        cost_estimate=pl.CostEstimate(flops=flops,
                                      transcendentals=transcendentals,
                                      bytes_accessed=bytes_accessed),
    )(xp, *[p["w"] for p in kparams], *[p["affine"] for p in kparams])

    return out[:, :T, :C]


# ----------------------------------------------------------------------------
# Parameters
# ----------------------------------------------------------------------------
def init_postnet_params(key, mel_channels):
    """Deterministic synthetic raw parameters matching PostNet.__init__ shapes."""
    mapping = [mel_channels, 256, 256, 256, 256, mel_channels]
    raw = []
    for idx in range(len(mapping) - 1):
        cin, cout = mapping[idx], mapping[idx + 1]
        key, kw, kb, kg, kbe, km, kv = jax.random.split(key, 7)
        # PyTorch Conv1d weight is (Cout, Cin, K); stored here as (K, Cin, Cout).
        w = jax.random.normal(kw, (KERNEL_SIZE, cin, cout), jnp.float32) * 0.05
        b = jax.random.normal(kb, (cout,), jnp.float32) * 0.05
        gamma = 1.0 + 0.1 * jax.random.normal(kg, (cout,), jnp.float32)
        beta = 0.1 * jax.random.normal(kbe, (cout,), jnp.float32)
        rmean = 0.1 * jax.random.normal(km, (cout,), jnp.float32)
        rvar = 1.0 + 0.1 * jax.random.uniform(kv, (cout,), jnp.float32)
        raw.append(dict(w=w, b=b, gamma=gamma, beta=beta, rmean=rmean, rvar=rvar))
    return raw


def fold_and_pad_params(raw_params):
    """Fold eval-BN + conv bias into a per-channel affine; pad channels to 128;
    cast weights to bf16 (zero-padded lanes cannot contaminate real channels)."""
    kparams = []
    for p in raw_params:
        _, cin, cout = p["w"].shape
        cin_p, cout_p = _round_up(cin, LANE), _round_up(cout, LANE)
        scale = p["gamma"] / jnp.sqrt(p["rvar"] + BN_EPS)
        shift = p["beta"] - p["rmean"] * scale + p["b"] * scale   # bias folded
        w = jnp.pad(p["w"], ((0, 0), (0, cin_p - cin), (0, cout_p - cout)))
        affine = jnp.zeros((2, cout_p), jnp.float32)
        affine = affine.at[0, :cout].set(scale)
        affine = affine.at[1, :cout].set(shift)
        kparams.append(dict(w=w.astype(jnp.bfloat16), affine=affine))
    return kparams


# ----------------------------------------------------------------------------
# Pure-JAX reference (f32), mirrors the PyTorch module in eval mode.
# ----------------------------------------------------------------------------
def postnet_reference(x, raw_params):
    # TODO(synk): F.dropout(p=0.1) / training-mode BN statistics are identity
    # in eval mode and are intentionally not modeled.
    h = x
    n = len(raw_params)
    for i, p in enumerate(raw_params):
        T = h.shape[1]
        hp = jnp.pad(h, ((0, 0), (PAD, 0), (0, 0)))
        acc = jnp.zeros((h.shape[0], T, p["w"].shape[2]), jnp.float32)
        for k in range(KERNEL_SIZE):
            acc = acc + jnp.einsum("btc,cd->btd", hp[:, k:k + T, :], p["w"][k])
        y = acc + p["b"]
        y = (y - p["rmean"]) / jnp.sqrt(p["rvar"] + BN_EPS) * p["gamma"] + p["beta"]
        if i < n - 1:
            y = jnp.tanh(y)
        h = y
    return h


if __name__ == "__main__":
    key = jax.random.PRNGKey(0)
    kx, kp = jax.random.split(key)
    B, T, MEL = 2, 8, 4
    x = jax.random.normal(kx, (B, T, MEL), jnp.float32)

    raw_params = init_postnet_params(kp, MEL)
    kparams = fold_and_pad_params(raw_params)

    out = postnet_forward(x, kparams, MEL)
    out = jax.block_until_ready(out)

    assert out.shape == (B, T, MEL), out.shape
    assert bool(jnp.all(jnp.isfinite(out)))

    ref = postnet_reference(x, raw_params)
    err = float(jnp.max(jnp.abs(out - ref)))
    assert err < 1e-1, f"max abs error vs reference: {err}"

    print("KERNEL_OK")
</pallas_src>

<mosaic_0001>
module attributes {stable_mosaic.version = 11 : i64} {
  func.func @_postnet_fused_kernel(%arg0: i32, %arg1: i32, %arg2: memref<1x8x128xbf16, #tpu.memory_space<vmem>>, %arg3: memref<5x128x256xbf16, #tpu.memory_space<vmem>>, %arg4: memref<5x256x256xbf16, #tpu.memory_space<vmem>>, %arg5: memref<5x256x256xbf16, #tpu.memory_space<vmem>>, %arg6: memref<5x256x256xbf16, #tpu.memory_space<vmem>>, %arg7: memref<5x256x128xbf16, #tpu.memory_space<vmem>>, %arg8: memref<2x256xf32, #tpu.memory_space<vmem>>, %arg9: memref<2x256xf32, #tpu.memory_space<vmem>>, %arg10: memref<2x256xf32, #tpu.memory_space<vmem>>, %arg11: memref<2x256xf32, #tpu.memory_space<vmem>>, %arg12: memref<2x128xf32, #tpu.memory_space<vmem>>, %arg13: memref<1x8x128xf32, #tpu.memory_space<vmem>>, %arg14: memref<4x128xbf16, #tpu.memory_space<vmem>>, %arg15: memref<4x256xbf16, #tpu.memory_space<vmem>>, %arg16: memref<4x256xbf16, #tpu.memory_space<vmem>>, %arg17: memref<4x256xbf16, #tpu.memory_space<vmem>>, %arg18: memref<4x256xbf16, #tpu.memory_space<vmem>>) attributes {dimension_semantics = [#tpu.dimension_semantics<parallel>, #tpu.dimension_semantics<arbitrary>], iteration_bounds = array<i64: 2, 1>, scalar_prefetch = 0 : i64, scratch_operands = 5 : i64, tpu.core_type = #tpu.core_type<tc>, window_params = [{transform_indices = @transform_0, window_bounds = array<i64: 1, 8, 128>}, {pipeline_mode = #tpu.pipeline_mode<synchronous>, transform_indices = @transform_1, window_bounds = array<i64: 5, 128, 256>}, {pipeline_mode = #tpu.pipeline_mode<synchronous>, transform_indices = @transform_2, window_bounds = array<i64: 5, 256, 256>}, {pipeline_mode = #tpu.pipeline_mode<synchronous>, transform_indices = @transform_3, window_bounds = array<i64: 5, 256, 256>}, {pipeline_mode = #tpu.pipeline_mode<synchronous>, transform_indices = @transform_4, window_bounds = array<i64: 5, 256, 256>}, {pipeline_mode = #tpu.pipeline_mode<synchronous>, transform_indices = @transform_5, window_bounds = array<i64: 5, 256, 128>}, {pipeline_mode = #tpu.pipeline_mode<synchronous>, transform_indices = @transform_6, window_bounds = array<i64: 2, 256>}, {pipeline_mode = #tpu.pipeline_mode<synchronous>, transform_indices = @transform_7, window_bounds = array<i64: 2, 256>}, {pipeline_mode = #tpu.pipeline_mode<synchronous>, transform_indices = @transform_8, window_bounds = array<i64: 2, 256>}, {pipeline_mode = #tpu.pipeline_mode<synchronous>, transform_indices = @transform_9, window_bounds = array<i64: 2, 256>}, {pipeline_mode = #tpu.pipeline_mode<synchronous>, transform_indices = @transform_10, window_bounds = array<i64: 2, 128>}, {transform_indices = @transform_11, window_bounds = array<i64: 1, 8, 128>}]} {
    %c0_i32 = arith.constant 0 : i32
    %0 = arith.cmpi eq, %arg1, %c0_i32 : i32
    %1 = arith.extui %0 : i1 to i32
    %c0_i32_0 = arith.constant 0 : i32
    %2 = arith.cmpi ne, %1, %c0_i32_0 : i32
    scf.if %2 {
      %cst_146 = arith.constant 0.000000e+00 : bf16
      %196 = vector.broadcast %cst_146 : bf16 to vector<4x128xbf16>
      %c0_147 = arith.constant 0 : index
      %c0_148 = arith.constant 0 : index
      %197 = vector.load %arg14[%c0_147, %c0_148] : memref<4x128xbf16, #tpu.memory_space<vmem>>, vector<4x128xbf16>
      tpu.vector_store %arg14[%c0_147, %c0_148], %196 {strides = array<i32>} : memref<4x128xbf16, #tpu.memory_space<vmem>>, vector<4x128xbf16>,
      %cst_149 = arith.constant 0.000000e+00 : bf16
      %198 = vector.broadcast %cst_149 : bf16 to vector<4x256xbf16>
      %c0_150 = arith.constant 0 : index
      %c0_151 = arith.constant 0 : index
      %199 = vector.load %arg15[%c0_150, %c0_151] : memref<4x256xbf16, #tpu.memory_space<vmem>>, vector<4x256xbf16>
      tpu.vector_store %arg15[%c0_150, %c0_151], %198 {strides = array<i32>} : memref<4x256xbf16, #tpu.memory_space<vmem>>, vector<4x256xbf16>,
      %cst_152 = arith.constant 0.000000e+00 : bf16
      %200 = vector.broadcast %cst_152 : bf16 to vector<4x256xbf16>
      %c0_153 = arith.constant 0 : index
      %c0_154 = arith.constant 0 : index
      %201 = vector.load %arg16[%c0_153, %c0_154] : memref<4x256xbf16, #tpu.memory_space<vmem>>, vector<4x256xbf16>
      tpu.vector_store %arg16[%c0_153, %c0_154], %200 {strides = array<i32>} : memref<4x256xbf16, #tpu.memory_space<vmem>>, vector<4x256xbf16>,
      %cst_155 = arith.constant 0.000000e+00 : bf16
      %202 = vector.broadcast %cst_155 : bf16 to vector<4x256xbf16>
      %c0_156 = arith.constant 0 : index
      %c0_157 = arith.constant 0 : index
      %203 = vector.load %arg17[%c0_156, %c0_157] : memref<4x256xbf16, #tpu.memory_space<vmem>>, vector<4x256xbf16>
      tpu.vector_store %arg17[%c0_156, %c0_157], %202 {strides = array<i32>} : memref<4x256xbf16, #tpu.memory_space<vmem>>, vector<4x256xbf16>,
      %cst_158 = arith.constant 0.000000e+00 : bf16
      %204 = vector.broadcast %cst_158 : bf16 to vector<4x256xbf16>
      %c0_159 = arith.constant 0 : index
      %c0_160 = arith.constant 0 : index
      %205 = vector.load %arg18[%c0_159, %c0_160] : memref<4x256xbf16, #tpu.memory_space<vmem>>, vector<4x256xbf16>
      tpu.vector_store %arg18[%c0_159, %c0_160], %204 {strides = array<i32>} : memref<4x256xbf16, #tpu.memory_space<vmem>>, vector<4x256xbf16>,
    } else {
    }
    %c0 = arith.constant 0 : index
    %c0_1 = arith.constant 0 : index
    %c0_2 = arith.constant 0 : index
    %3 = vector.load %arg2[%c0, %c0_1, %c0_2] : memref<1x8x128xbf16, #tpu.memory_space<vmem>>, vector<1x8x128xbf16>
    %4 = vector.shape_cast %3 : vector<1x8x128xbf16> to vector<8x128xbf16>
    %c0_3 = arith.constant 0 : index
    %c0_4 = arith.constant 0 : index
    %5 = vector.load %arg14[%c0_3, %c0_4] : memref<4x128xbf16, #tpu.memory_space<vmem>>, vector<4x128xbf16>
    %6 = vector.extract_strided_slice %4 {offsets = [4, 0], sizes = [4, 128], strides = [1, 1]} : vector<8x128xbf16> to vector<4x128xbf16>
    %c0_5 = arith.constant 0 : index
    %c0_6 = arith.constant 0 : index
    %7 = vector.load %arg14[%c0_5, %c0_6] : memref<4x128xbf16, #tpu.memory_space<vmem>>, vector<4x128xbf16>
    tpu.vector_store %arg14[%c0_5, %c0_6], %6 {strides = array<i32>} : memref<4x128xbf16, #tpu.memory_space<vmem>>, vector<4x128xbf16>,
    %8 = tpu.concatenate %5, %4 in 0 : vector<4x128xbf16>, vector<8x128xbf16> -> vector<12x128xbf16>
    %cst = arith.constant 0.000000e+00 : f32
    %9 = vector.broadcast %cst : f32 to vector<8x256xf32>
    %10 = vector.extract_strided_slice %8 {offsets = [0, 0], sizes = [8, 128], strides = [1, 1]} : vector<12x128xbf16> to vector<8x128xbf16>
    %c0_7 = arith.constant 0 : index
    %c0_8 = arith.constant 0 : index
    %c0_9 = arith.constant 0 : index
    %11 = vector.load %arg3[%c0_7, %c0_8, %c0_9] : memref<5x128x256xbf16, #tpu.memory_space<vmem>>, vector<1x128x256xbf16>
    %12 = vector.shape_cast %11 : vector<1x128x256xbf16> to vector<128x256xbf16>
    %cst_10 = arith.constant dense<0.000000e+00> : vector<8x256xf32>
    %13 = tpu.matmul %10, %12, %cst_10 {dimension_numbers = #tpu.dot_dimension_numbers<[1], [0], [0], [1], [0, 0, 1, 1], [], []>} : vector<8x128xbf16>, vector<128x256xbf16>, vector<8x256xf32> -> vector<8x256xf32>
    %14 = arith.addf %9, %13 : vector<8x256xf32>
    %15 = vector.extract_strided_slice %8 {offsets = [1, 0], sizes = [8, 128], strides = [1, 1]} : vector<12x128xbf16> to vector<8x128xbf16>
    %c1 = arith.constant 1 : index
    %c0_11 = arith.constant 0 : index
    %c0_12 = arith.constant 0 : index
    %16 = vector.load %arg3[%c1, %c0_11, %c0_12] : memref<5x128x256xbf16, #tpu.memory_space<vmem>>, vector<1x128x256xbf16>
    %17 = vector.shape_cast %16 : vector<1x128x256xbf16> to vector<128x256xbf16>
    %cst_13 = arith.constant dense<0.000000e+00> : vector<8x256xf32>
    %18 = tpu.matmul %15, %17, %cst_13 {dimension_numbers = #tpu.dot_dimension_numbers<[1], [0], [0], [1], [0, 0, 1, 1], [], []>} : vector<8x128xbf16>, vector<128x256xbf16>, vector<8x256xf32> -> vector<8x256xf32>
    %19 = arith.addf %14, %18 : vector<8x256xf32>
    %20 = vector.extract_strided_slice %8 {offsets = [2, 0], sizes = [8, 128], strides = [1, 1]} : vector<12x128xbf16> to vector<8x128xbf16>
    %c2 = arith.constant 2 : index
    %c0_14 = arith.constant 0 : index
    %c0_15 = arith.constant 0 : index
    %21 = vector.load %arg3[%c2, %c0_14, %c0_15] : memref<5x128x256xbf16, #tpu.memory_space<vmem>>, vector<1x128x256xbf16>
    %22 = vector.shape_cast %21 : vector<1x128x256xbf16> to vector<128x256xbf16>
    %cst_16 = arith.constant dense<0.000000e+00> : vector<8x256xf32>
    %23 = tpu.matmul %20, %22, %cst_16 {dimension_numbers = #tpu.dot_dimension_numbers<[1], [0], [0], [1], [0, 0, 1, 1], [], []>} : vector<8x128xbf16>, vector<128x256xbf16>, vector<8x256xf32> -> vector<8x256xf32>
    %24 = arith.addf %19, %23 : vector<8x256xf32>
    %25 = vector.extract_strided_slice %8 {offsets = [3, 0], sizes = [8, 128], strides = [1, 1]} : vector<12x128xbf16> to vector<8x128xbf16>
    %c3 = arith.constant 3 : index
    %c0_17 = arith.constant 0 : index
    %c0_18 = arith.constant 0 : index
    %26 = vector.load %arg3[%c3, %c0_17, %c0_18] : memref<5x128x256xbf16, #tpu.memory_space<vmem>>, vector<1x128x256xbf16>
    %27 = vector.shape_cast %26 : vector<1x128x256xbf16> to vector<128x256xbf16>
    %cst_19 = arith.constant dense<0.000000e+00> : vector<8x256xf32>
    %28 = tpu.matmul %25, %27, %cst_19 {dimension_numbers = #tpu.dot_dimension_numbers<[1], [0], [0], [1], [0, 0, 1, 1], [], []>} : vector<8x128xbf16>, vector<128x256xbf16>, vector<8x256xf32> -> vector<8x256xf32>
    %29 = arith.addf %24, %28 : vector<8x256xf32>
    %30 = vector.extract_strided_slice %8 {offsets = [4, 0], sizes = [8, 128], strides = [1, 1]} : vector<12x128xbf16> to vector<8x128xbf16>
    %c4 = arith.constant 4 : index
    %c0_20 = arith.constant 0 : index
    %c0_21 = arith.constant 0 : index
    %31 = vector.load %arg3[%c4, %c0_20, %c0_21] : memref<5x128x256xbf16, #tpu.memory_space<vmem>>, vector<1x128x256xbf16>
    %32 = vector.shape_cast %31 : vector<1x128x256xbf16> to vector<128x256xbf16>
    %cst_22 = arith.constant dense<0.000000e+00> : vector<8x256xf32>
    %33 = tpu.matmul %30, %32, %cst_22 {dimension_numbers = #tpu.dot_dimension_numbers<[1], [0], [0], [1], [0, 0, 1, 1], [], []>} : vector<8x128xbf16>, vector<128x256xbf16>, vector<8x256xf32> -> vector<8x256xf32>
    %34 = arith.addf %29, %33 : vector<8x256xf32>
    %c0_23 = arith.constant 0 : index
    %c0_24 = arith.constant 0 : index
    %35 = vector.load %arg8[%c0_23, %c0_24] : memref<2x256xf32, #tpu.memory_space<vmem>>, vector<1x256xf32>
    %c1_25 = arith.constant 1 : index
    %c0_26 = arith.constant 0 : index
    %36 = vector.load %arg8[%c1_25, %c0_26] : memref<2x256xf32, #tpu.memory_space<vmem>>, vector<1x256xf32>
    %37 = vector.broadcast %35 : vector<1x256xf32> to vector<8x256xf32>
    %38 = arith.mulf %34, %37 : vector<8x256xf32>
    %39 = vector.broadcast %36 : vector<1x256xf32> to vector<8x256xf32>
    %40 = arith.addf %38, %39 : vector<8x256xf32>
    %41 = math.tanh %40 : vector<8x256xf32>
    %42 = arith.truncf %41 : vector<8x256xf32> to vector<8x256xbf16>
    %c0_27 = arith.constant 0 : index
    %c0_28 = arith.constant 0 : index
    %43 = vector.load %arg15[%c0_27, %c0_28] : memref<4x256xbf16, #tpu.memory_space<vmem>>, vector<4x256xbf16>
    %44 = vector.extract_strided_slice %42 {offsets = [4, 0], sizes = [4, 256], strides = [1, 1]} : vector<8x256xbf16> to vector<4x256xbf16>
    %c0_29 = arith.constant 0 : index
    %c0_30 = arith.constant 0 : index
    %45 = vector.load %arg15[%c0_29, %c0_30] : memref<4x256xbf16, #tpu.memory_space<vmem>>, vector<4x256xbf16>
    tpu.vector_store %arg15[%c0_29, %c0_30], %44 {strides = array<i32>} : memref<4x256xbf16, #tpu.memory_space<vmem>>, vector<4x256xbf16>,
    %46 = tpu.concatenate %43, %42 in 0 : vector<4x256xbf16>, vector<8x256xbf16> -> vector<12x256xbf16>
    %cst_31 = arith.constant 0.000000e+00 : f32
    %47 = vector.broadcast %cst_31 : f32 to vector<8x256xf32>
    %48 = vector.extract_strided_slice %46 {offsets = [0, 0], sizes = [8, 256], strides = [1, 1]} : vector<12x256xbf16> to vector<8x256xbf16>
    %c0_32 = arith.constant 0 : index
    %c0_33 = arith.constant 0 : index
    %c0_34 = arith.constant 0 : index
    %49 = vector.load %arg4[%c0_32, %c0_33, %c0_34] : memref<5x256x256xbf16, #tpu.memory_space<vmem>>, vector<1x256x256xbf16>
    %50 = vector.shape_cast %49 : vector<1x256x256xbf16> to vector<256x256xbf16>
    %cst_35 = arith.constant dense<0.000000e+00> : vector<8x256xf32>
    %51 = tpu.matmul %48, %50, %cst_35 {dimension_numbers = #tpu.dot_dimension_numbers<[1], [0], [0], [1], [0, 0, 1, 1], [], []>} : vector<8x256xbf16>, vector<256x256xbf16>, vector<8x256xf32> -> vector<8x256xf32>
    %52 = arith.addf %47, %51 : vector<8x256xf32>
    %53 = vector.extract_strided_slice %46 {offsets = [1, 0], sizes = [8, 256], strides = [1, 1]} : vector<12x256xbf16> to vector<8x256xbf16>
    %c1_36 = arith.constant 1 : index
    %c0_37 = arith.constant 0 : index
    %c0_38 = arith.constant 0 : index
    %54 = vector.load %arg4[%c1_36, %c0_37, %c0_38] : memref<5x256x256xbf16, #tpu.memory_space<vmem>>, vector<1x256x256xbf16>
    %55 = vector.shape_cast %54 : vector<1x256x256xbf16> to vector<256x256xbf16>
    %cst_39 = arith.constant dense<0.000000e+00> : vector<8x256xf32>
    %56 = tpu.matmul %53, %55, %cst_39 {dimension_numbers = #tpu.dot_dimension_numbers<[1], [0], [0], [1], [0, 0, 1, 1], [], []>} : vector<8x256xbf16>, vector<256x256xbf16>, vector<8x256xf32> -> vector<8x256xf32>
    %57 = arith.addf %52, %56 : vector<8x256xf32>
    %58 = vector.extract_strided_slice %46 {offsets = [2, 0], sizes = [8, 256], strides = [1, 1]} : vector<12x256xbf16> to vector<8x256xbf16>
    %c2_40 = arith.constant 2 : index
    %c0_41 = arith.constant 0 : index
    %c0_42 = arith.constant 0 : index
    %59 = vector.load %arg4[%c2_40, %c0_41, %c0_42] : memref<5x256x256xbf16, #tpu.memory_space<vmem>>, vector<1x256x256xbf16>
    %60 = vector.shape_cast %59 : vector<1x256x256xbf16> to vector<256x256xbf16>
    %cst_43 = arith.constant dense<0.000000e+00> : vector<8x256xf32>
    %61 = tpu.matmul %58, %60, %cst_43 {dimension_numbers = #tpu.dot_dimension_numbers<[1], [0], [0], [1], [0, 0, 1, 1], [], []>} : vector<8x256xbf16>, vector<256x256xbf16>, vector<8x256xf32> -> vector<8x256xf32>
    %62 = arith.addf %57, %61 : vector<8x256xf32>
    %63 = vector.extract_strided_slice %46 {offsets = [3, 0], sizes = [8, 256], strides = [1, 1]} : vector<12x256xbf16> to vector<8x256xbf16>
    %c3_44 = arith.constant 3 : index
    %c0_45 = arith.constant 0 : index
    %c0_46 = arith.constant 0 : index
    %64 = vector.load %arg4[%c3_44, %c0_45, %c0_46] : memref<5x256x256xbf16, #tpu.memory_space<vmem>>, vector<1x256x256xbf16>
    %65 = vector.shape_cast %64 : vector<1x256x256xbf16> to vector<256x256xbf16>
    %cst_47 = arith.constant dense<0.000000e+00> : vector<8x256xf32>
    %66 = tpu.matmul %63, %65, %cst_47 {dimension_numbers = #tpu.dot_dimension_numbers<[1], [0], [0], [1], [0, 0, 1, 1], [], []>} : vector<8x256xbf16>, vector<256x256xbf16>, vector<8x256xf32> -> vector<8x256xf32>
    %67 = arith.addf %62, %66 : vector<8x256xf32>
    %68 = vector.extract_strided_slice %46 {offsets = [4, 0], sizes = [8, 256], strides = [1, 1]} : vector<12x256xbf16> to vector<8x256xbf16>
    %c4_48 = arith.constant 4 : index
    %c0_49 = arith.constant 0 : index
    %c0_50 = arith.constant 0 : index
    %69 = vector.load %arg4[%c4_48, %c0_49, %c0_50] : memref<5x256x256xbf16, #tpu.memory_space<vmem>>, vector<1x256x256xbf16>
    %70 = vector.shape_cast %69 : vector<1x256x256xbf16> to vector<256x256xbf16>
    %cst_51 = arith.constant dense<0.000000e+00> : vector<8x256xf32>
    %71 = tpu.matmul %68, %70, %cst_51 {dimension_numbers = #tpu.dot_dimension_numbers<[1], [0], [0], [1], [0, 0, 1, 1], [], []>} : vector<8x256xbf16>, vector<256x256xbf16>, vector<8x256xf32> -> vector<8x256xf32>
    %72 = arith.addf %67, %71 : vector<8x256xf32>
    %c0_52 = arith.constant 0 : index
    %c0_53 = arith.constant 0 : index
    %73 = vector.load %arg9[%c0_52, %c0_53] : memref<2x256xf32, #tpu.memory_space<vmem>>, vector<1x256xf32>
    %c1_54 = arith.constant 1 : index
    %c0_55 = arith.constant 0 : index
    %74 = vector.load %arg9[%c1_54, %c0_55] : memref<2x256xf32, #tpu.memory_space<vmem>>, vector<1x256xf32>
    %75 = vector.broadcast %73 : vector<1x256xf32> to vector<8x256xf32>
    %76 = arith.mulf %72, %75 : vector<8x256xf32>
    %77 = vector.broadcast %74 : vector<1x256xf32> to vector<8x256xf32>
    %78 = arith.addf %76, %77 : vector<8x256xf32>
    %79 = math.tanh %78 : vector<8x256xf32>
    %80 = arith.truncf %79 : vector<8x256xf32> to vector<8x256xbf16>
    %c0_56 = arith.constant 0 : index
    %c0_57 = arith.constant 0 : index
    %81 = vector.load %arg16[%c0_56, %c0_57] : memref<4x256xbf16, #tpu.memory_space<vmem>>, vector<4x256xbf16>
    %82 = vector.extract_strided_slice %80 {offsets = [4, 0], sizes = [4, 256], strides = [1, 1]} : vector<8x256xbf16> to vector<4x256xbf16>
    %c0_58 = arith.constant 0 : index
    %c0_59 = arith.constant 0 : index
    %83 = vector.load %arg16[%c0_58, %c0_59] : memref<4x256xbf16, #tpu.memory_space<vmem>>, vector<4x256xbf16>
    tpu.vector_store %arg16[%c0_58, %c0_59], %82 {strides = array<i32>} : memref<4x256xbf16, #tpu.memory_space<vmem>>, vector<4x256xbf16>,
    %84 = tpu.concatenate %81, %80 in 0 : vector<4x256xbf16>, vector<8x256xbf16> -> vector<12x256xbf16>
    %cst_60 = arith.constant 0.000000e+00 : f32
    %85 = vector.broadcast %cst_60 : f32 to vector<8x256xf32>
    %86 = vector.extract_strided_slice %84 {offsets = [0, 0], sizes = [8, 256], strides = [1, 1]} : vector<12x256xbf16> to vector<8x256xbf16>
    %c0_61 = arith.constant 0 : index
    %c0_62 = arith.constant 0 : index
    %c0_63 = arith.constant 0 : index
    %87 = vector.load %arg5[%c0_61, %c0_62, %c0_63] : memref<5x256x256xbf16, #tpu.memory_space<vmem>>, vector<1x256x256xbf16>
    %88 = vector.shape_cast %87 : vector<1x256x256xbf16> to vector<256x256xbf16>
    %cst_64 = arith.constant dense<0.000000e+00> : vector<8x256xf32>
    %89 = tpu.matmul %86, %88, %cst_64 {dimension_numbers = #tpu.dot_dimension_numbers<[1], [0], [0], [1], [0, 0, 1, 1], [], []>} : vector<8x256xbf16>, vector<256x256xbf16>, vector<8x256xf32> -> vector<8x256xf32>
    %90 = arith.addf %85, %89 : vector<8x256xf32>
    %91 = vector.extract_strided_slice %84 {offsets = [1, 0], sizes = [8, 256], strides = [1, 1]} : vector<12x256xbf16> to vector<8x256xbf16>
    %c1_65 = arith.constant 1 : index
    %c0_66 = arith.constant 0 : index
    %c0_67 = arith.constant 0 : index
    %92 = vector.load %arg5[%c1_65, %c0_66, %c0_67] : memref<5x256x256xbf16, #tpu.memory_space<vmem>>, vector<1x256x256xbf16>
    %93 = vector.shape_cast %92 : vector<1x256x256xbf16> to vector<256x256xbf16>
    %cst_68 = arith.constant dense<0.000000e+00> : vector<8x256xf32>
    %94 = tpu.matmul %91, %93, %cst_68 {dimension_numbers = #tpu.dot_dimension_numbers<[1], [0], [0], [1], [0, 0, 1, 1], [], []>} : vector<8x256xbf16>, vector<256x256xbf16>, vector<8x256xf32> -> vector<8x256xf32>
    %95 = arith.addf %90, %94 : vector<8x256xf32>
    %96 = vector.extract_strided_slice %84 {offsets = [2, 0], sizes = [8, 256], strides = [1, 1]} : vector<12x256xbf16> to vector<8x256xbf16>
    %c2_69 = arith.constant 2 : index
    %c0_70 = arith.constant 0 : index
    %c0_71 = arith.constant 0 : index
    %97 = vector.load %arg5[%c2_69, %c0_70, %c0_71] : memref<5x256x256xbf16, #tpu.memory_space<vmem>>, vector<1x256x256xbf16>
    %98 = vector.shape_cast %97 : vector<1x256x256xbf16> to vector<256x256xbf16>
    %cst_72 = arith.constant dense<0.000000e+00> : vector<8x256xf32>
    %99 = tpu.matmul %96, %98, %cst_72 {dimension_numbers = #tpu.dot_dimension_numbers<[1], [0], [0], [1], [0, 0, 1, 1], [], []>} : vector<8x256xbf16>, vector<256x256xbf16>, vector<8x256xf32> -> vector<8x256xf32>
    %100 = arith.addf %95, %99 : vector<8x256xf32>
    %101 = vector.extract_strided_slice %84 {offsets = [3, 0], sizes = [8, 256], strides = [1, 1]} : vector<12x256xbf16> to vector<8x256xbf16>
    %c3_73 = arith.constant 3 : index
    %c0_74 = arith.constant 0 : index
    %c0_75 = arith.constant 0 : index
    %102 = vector.load %arg5[%c3_73, %c0_74, %c0_75] : memref<5x256x256xbf16, #tpu.memory_space<vmem>>, vector<1x256x256xbf16>
    %103 = vector.shape_cast %102 : vector<1x256x256xbf16> to vector<256x256xbf16>
    %cst_76 = arith.constant dense<0.000000e+00> : vector<8x256xf32>
    %104 = tpu.matmul %101, %103, %cst_76 {dimension_numbers = #tpu.dot_dimension_numbers<[1], [0], [0], [1], [0, 0, 1, 1], [], []>} : vector<8x256xbf16>, vector<256x256xbf16>, vector<8x256xf32> -> vector<8x256xf32>
    %105 = arith.addf %100, %104 : vector<8x256xf32>
    %106 = vector.extract_strided_slice %84 {offsets = [4, 0], sizes = [8, 256], strides = [1, 1]} : vector<12x256xbf16> to vector<8x256xbf16>
    %c4_77 = arith.constant 4 : index
    %c0_78 = arith.constant 0 : index
    %c0_79 = arith.constant 0 : index
    %107 = vector.load %arg5[%c4_77, %c0_78, %c0_79] : memref<5x256x256xbf16, #tpu.memory_space<vmem>>, vector<1x256x256xbf16>
    %108 = vector.shape_cast %107 : vector<1x256x256xbf16> to vector<256x256xbf16>
    %cst_80 = arith.constant dense<0.000000e+00> : vector<8x256xf32>
    %109 = tpu.matmul %106, %108, %cst_80 {dimension_numbers = #tpu.dot_dimension_numbers<[1], [0], [0], [1], [0, 0, 1, 1], [], []>} : vector<8x256xbf16>, vector<256x256xbf16>, vector<8x256xf32> -> vector<8x256xf32>
    %110 = arith.addf %105, %109 : vector<8x256xf32>
    %c0_81 = arith.constant 0 : index
    %c0_82 = arith.constant 0 : index
    %111 = vector.load %arg10[%c0_81, %c0_82] : memref<2x256xf32, #tpu.memory_space<vmem>>, vector<1x256xf32>
    %c1_83 = arith.constant 1 : index
    %c0_84 = arith.constant 0 : index
    %112 = vector.load %arg10[%c1_83, %c0_84] : memref<2x256xf32, #tpu.memory_space<vmem>>, vector<1x256xf32>
    %113 = vector.broadcast %111 : vector<1x256xf32> to vector<8x256xf32>
    %114 = arith.mulf %110, %113 : vector<8x256xf32>
    %115 = vector.broadcast %112 : vector<1x256xf32> to vector<8x256xf32>
    %116 = arith.addf %114, %115 : vector<8x256xf32>
    %117 = math.tanh %116 : vector<8x256xf32>
    %118 = arith.truncf %117 : vector<8x256xf32> to vector<8x256xbf16>
    %c0_85 = arith.constant 0 : index
    %c0_86 = arith.constant 0 : index
    %119 = vector.load %arg17[%c0_85, %c0_86] : memref<4x256xbf16, #tpu.memory_space<vmem>>, vector<4x256xbf16>
    %120 = vector.extract_strided_slice %118 {offsets = [4, 0], sizes = [4, 256], strides = [1, 1]} : vector<8x256xbf16> to vector<4x256xbf16>
    %c0_87 = arith.constant 0 : index
    %c0_88 = arith.constant 0 : index
    %121 = vector.load %arg17[%c0_87, %c0_88] : memref<4x256xbf16, #tpu.memory_space<vmem>>, vector<4x256xbf16>
    tpu.vector_store %arg17[%c0_87, %c0_88], %120 {strides = array<i32>} : memref<4x256xbf16, #tpu.memory_space<vmem>>, vector<4x256xbf16>,
    %122 = tpu.concatenate %119, %118 in 0 : vector<4x256xbf16>, vector<8x256xbf16> -> vector<12x256xbf16>
    %cst_89 = arith.constant 0.000000e+00 : f32
    %123 = vector.broadcast %cst_89 : f32 to vector<8x256xf32>
    %124 = vector.extract_strided_slice %122 {offsets = [0, 0], sizes = [8, 256], strides = [1, 1]} : vector<12x256xbf16> to vector<8x256xbf16>
    %c0_90 = arith.constant 0 : index
    %c0_91 = arith.constant 0 : index
    %c0_92 = arith.constant 0 : index
    %125 = vector.load %arg6[%c0_90, %c0_91, %c0_92] : memref<5x256x256xbf16, #tpu.memory_space<vmem>>, vector<1x256x256xbf16>
    %126 = vector.shape_cast %125 : vector<1x256x256xbf16> to vector<256x256xbf16>
    %cst_93 = arith.constant dense<0.000000e+00> : vector<8x256xf32>
    %127 = tpu.matmul %124, %126, %cst_93 {dimension_numbers = #tpu.dot_dimension_numbers<[1], [0], [0], [1], [0, 0, 1, 1], [], []>} : vector<8x256xbf16>, vector<256x256xbf16>, vector<8x256xf32> -> vector<8x256xf32>
    %128 = arith.addf %123, %127 : vector<8x256xf32>
    %129 = vector.extract_strided_slice %122 {offsets = [1, 0], sizes = [8, 256], strides = [1, 1]} : vector<12x256xbf16> to vector<8x256xbf16>
    %c1_94 = arith.constant 1 : index
    %c0_95 = arith.constant 0 : index
    %c0_96 = arith.constant 0 : index
    %130 = vector.load %arg6[%c1_94, %c0_95, %c0_96] : memref<5x256x256xbf16, #tpu.memory_space<vmem>>, vector<1x256x256xbf16>
    %131 = vector.shape_cast %130 : vector<1x256x256xbf16> to vector<256x256xbf16>
    %cst_97 = arith.constant dense<0.000000e+00> : vector<8x256xf32>
    %132 = tpu.matmul %129, %131, %cst_97 {dimension_numbers = #tpu.dot_dimension_numbers<[1], [0], [0], [1], [0, 0, 1, 1], [], []>} : vector<8x256xbf16>, vector<256x256xbf16>, vector<8x256xf32> -> vector<8x256xf32>
    %133 = arith.addf %128, %132 : vector<8x256xf32>
    %134 = vector.extract_strided_slice %122 {offsets = [2, 0], sizes = [8, 256], strides = [1, 1]} : vector<12x256xbf16> to vector<8x256xbf16>
    %c2_98 = arith.constant 2 : index
    %c0_99 = arith.constant 0 : index
    %c0_100 = arith.constant 0 : index
    %135 = vector.load %arg6[%c2_98, %c0_99, %c0_100] : memref<5x256x256xbf16, #tpu.memory_space<vmem>>, vector<1x256x256xbf16>
    %136 = vector.shape_cast %135 : vector<1x256x256xbf16> to vector<256x256xbf16>
    %cst_101 = arith.constant dense<0.000000e+00> : vector<8x256xf32>
    %137 = tpu.matmul %134, %136, %cst_101 {dimension_numbers = #tpu.dot_dimension_numbers<[1], [0], [0], [1], [0, 0, 1, 1], [], []>} : vector<8x256xbf16>, vector<256x256xbf16>, vector<8x256xf32> -> vector<8x256xf32>
    %138 = arith.addf %133, %137 : vector<8x256xf32>
    %139 = vector.extract_strided_slice %122 {offsets = [3, 0], sizes = [8, 256], strides = [1, 1]} : vector<12x256xbf16> to vector<8x256xbf16>
    %c3_102 = arith.constant 3 : index
    %c0_103 = arith.constant 0 : index
    %c0_104 = arith.constant 0 : index
    %140 = vector.load %arg6[%c3_102, %c0_103, %c0_104] : memref<5x256x256xbf16, #tpu.memory_space<vmem>>, vector<1x256x256xbf16>
    %141 = vector.shape_cast %140 : vector<1x256x256xbf16> to vector<256x256xbf16>
    %cst_105 = arith.constant dense<0.000000e+00> : vector<8x256xf32>
    %142 = tpu.matmul %139, %141, %cst_105 {dimension_numbers = #tpu.dot_dimension_numbers<[1], [0], [0], [1], [0, 0, 1, 1], [], []>} : vector<8x256xbf16>, vector<256x256xbf16>, vector<8x256xf32> -> vector<8x256xf32>
    %143 = arith.addf %138, %142 : vector<8x256xf32>
    %144 = vector.extract_strided_slice %122 {offsets = [4, 0], sizes = [8, 256], strides = [1, 1]} : vector<12x256xbf16> to vector<8x256xbf16>
    %c4_106 = arith.constant 4 : index
    %c0_107 = arith.constant 0 : index
    %c0_108 = arith.constant 0 : index
    %145 = vector.load %arg6[%c4_106, %c0_107, %c0_108] : memref<5x256x256xbf16, #tpu.memory_space<vmem>>, vector<1x256x256xbf16>
    %146 = vector.shape_cast %145 : vector<1x256x256xbf16> to vector<256x256xbf16>
    %cst_109 = arith.constant dense<0.000000e+00> : vector<8x256xf32>
    %147 = tpu.matmul %144, %146, %cst_109 {dimension_numbers = #tpu.dot_dimension_numbers<[1], [0], [0], [1], [0, 0, 1, 1], [], []>} : vector<8x256xbf16>, vector<256x256xbf16>, vector<8x256xf32> -> vector<8x256xf32>
    %148 = arith.addf %143, %147 : vector<8x256xf32>
    %c0_110 = arith.constant 0 : index
    %c0_111 = arith.constant 0 : index
    %149 = vector.load %arg11[%c0_110, %c0_111] : memref<2x256xf32, #tpu.memory_space<vmem>>, vector<1x256xf32>
    %c1_112 = arith.constant 1 : index
    %c0_113 = arith.constant 0 : index
    %150 = vector.load %arg11[%c1_112, %c0_113] : memref<2x256xf32, #tpu.memory_space<vmem>>, vector<1x256xf32>
    %151 = vector.broadcast %149 : vector<1x256xf32> to vector<8x256xf32>
    %152 = arith.mulf %148, %151 : vector<8x256xf32>
    %153 = vector.broadcast %150 : vector<1x256xf32> to vector<8x256xf32>
    %154 = arith.addf %152, %153 : vector<8x256xf32>
    %155 = math.tanh %154 : vector<8x256xf32>
    %156 = arith.truncf %155 : vector<8x256xf32> to vector<8x256xbf16>
    %c0_114 = arith.constant 0 : index
    %c0_115 = arith.constant 0 : index
    %157 = vector.load %arg18[%c0_114, %c0_115] : memref<4x256xbf16, #tpu.memory_space<vmem>>, vector<4x256xbf16>
    %158 = vector.extract_strided_slice %156 {offsets = [4, 0], sizes = [4, 256], strides = [1, 1]} : vector<8x256xbf16> to vector<4x256xbf16>
    %c0_116 = arith.constant 0 : index
    %c0_117 = arith.constant 0 : index
    %159 = vector.load %arg18[%c0_116, %c0_117] : memref<4x256xbf16, #tpu.memory_space<vmem>>, vector<4x256xbf16>
    tpu.vector_store %arg18[%c0_116, %c0_117], %158 {strides = array<i32>} : memref<4x256xbf16, #tpu.memory_space<vmem>>, vector<4x256xbf16>,
    %160 = tpu.concatenate %157, %156 in 0 : vector<4x256xbf16>, vector<8x256xbf16> -> vector<12x256xbf16>
    %cst_118 = arith.constant 0.000000e+00 : f32
    %161 = vector.broadcast %cst_118 : f32 to vector<8x128xf32>
    %162 = vector.extract_strided_slice %160 {offsets = [0, 0], sizes = [8, 256], strides = [1, 1]} : vector<12x256xbf16> to vector<8x256xbf16>
    %c0_119 = arith.constant 0 : index
    %c0_120 = arith.constant 0 : index
    %c0_121 = arith.constant 0 : index
    %163 = vector.load %arg7[%c0_119, %c0_120, %c0_121] : memref<5x256x128xbf16, #tpu.memory_space<vmem>>, vector<1x256x128xbf16>
    %164 = vector.shape_cast %163 : vector<1x256x128xbf16> to vector<256x128xbf16>
    %cst_122 = arith.constant dense<0.000000e+00> : vector<8x128xf32>
    %165 = tpu.matmul %162, %164, %cst_122 {dimension_numbers = #tpu.dot_dimension_numbers<[1], [0], [0], [1], [0, 0, 1, 1], [], []>} : vector<8x256xbf16>, vector<256x128xbf16>, vector<8x128xf32> -> vector<8x128xf32>
    %166 = arith.addf %161, %165 : vector<8x128xf32>
    %167 = vector.extract_strided_slice %160 {offsets = [1, 0], sizes = [8, 256], strides = [1, 1]} : vector<12x256xbf16> to vector<8x256xbf16>
    %c1_123 = arith.constant 1 : index
    %c0_124 = arith.constant 0 : index
    %c0_125 = arith.constant 0 : index
    %168 = vector.load %arg7[%c1_123, %c0_124, %c0_125] : memref<5x256x128xbf16, #tpu.memory_space<vmem>>, vector<1x256x128xbf16>
    %169 = vector.shape_cast %168 : vector<1x256x128xbf16> to vector<256x128xbf16>
    %cst_126 = arith.constant dense<0.000000e+00> : vector<8x128xf32>
    %170 = tpu.matmul %167, %169, %cst_126 {dimension_numbers = #tpu.dot_dimension_numbers<[1], [0], [0], [1], [0, 0, 1, 1], [], []>} : vector<8x256xbf16>, vector<256x128xbf16>, vector<8x128xf32> -> vector<8x128xf32>
    %171 = arith.addf %166, %170 : vector<8x128xf32>
    %172 = vector.extract_strided_slice %160 {offsets = [2, 0], sizes = [8, 256], strides = [1, 1]} : vector<12x256xbf16> to vector<8x256xbf16>
    %c2_127 = arith.constant 2 : index
    %c0_128 = arith.constant 0 : index
    %c0_129 = arith.constant 0 : index
    %173 = vector.load %arg7[%c2_127, %c0_128, %c0_129] : memref<5x256x128xbf16, #tpu.memory_space<vmem>>, vector<1x256x128xbf16>
    %174 = vector.shape_cast %173 : vector<1x256x128xbf16> to vector<256x128xbf16>
    %cst_130 = arith.constant dense<0.000000e+00> : vector<8x128xf32>
    %175 = tpu.matmul %172, %174, %cst_130 {dimension_numbers = #tpu.dot_dimension_numbers<[1], [0], [0], [1], [0, 0, 1, 1], [], []>} : vector<8x256xbf16>, vector<256x128xbf16>, vector<8x128xf32> -> vector<8x128xf32>
    %176 = arith.addf %171, %175 : vector<8x128xf32>
    %177 = vector.extract_strided_slice %160 {offsets = [3, 0], sizes = [8, 256], strides = [1, 1]} : vector<12x256xbf16> to vector<8x256xbf16>
    %c3_131 = arith.constant 3 : index
    %c0_132 = arith.constant 0 : index
    %c0_133 = arith.constant 0 : index
    %178 = vector.load %arg7[%c3_131, %c0_132, %c0_133] : memref<5x256x128xbf16, #tpu.memory_space<vmem>>, vector<1x256x128xbf16>
    %179 = vector.shape_cast %178 : vector<1x256x128xbf16> to vector<256x128xbf16>
    %cst_134 = arith.constant dense<0.000000e+00> : vector<8x128xf32>
    %180 = tpu.matmul %177, %179, %cst_134 {dimension_numbers = #tpu.dot_dimension_numbers<[1], [0], [0], [1], [0, 0, 1, 1], [], []>} : vector<8x256xbf16>, vector<256x128xbf16>, vector<8x128xf32> -> vector<8x128xf32>
    %181 = arith.addf %176, %180 : vector<8x128xf32>
    %182 = vector.extract_strided_slice %160 {offsets = [4, 0], sizes = [8, 256], strides = [1, 1]} : vector<12x256xbf16> to vector<8x256xbf16>
    %c4_135 = arith.constant 4 : index
    %c0_136 = arith.constant 0 : index
    %c0_137 = arith.constant 0 : index
    %183 = vector.load %arg7[%c4_135, %c0_136, %c0_137] : memref<5x256x128xbf16, #tpu.memory_space<vmem>>, vector<1x256x128xbf16>
    %184 = vector.shape_cast %183 : vector<1x256x128xbf16> to vector<256x128xbf16>
    %cst_138 = arith.constant dense<0.000000e+00> : vector<8x128xf32>
    %185 = tpu.matmul %182, %184, %cst_138 {dimension_numbers = #tpu.dot_dimension_numbers<[1], [0], [0], [1], [0, 0, 1, 1], [], []>} : vector<8x256xbf16>, vector<256x128xbf16>, vector<8x128xf32> -> vector<8x128xf32>
    %186 = arith.addf %181, %185 : vector<8x128xf32>
    %c0_139 = arith.constant 0 : index
    %c0_140 = arith.constant 0 : index
    %187 = vector.load %arg12[%c0_139, %c0_140] : memref<2x128xf32, #tpu.memory_space<vmem>>, vector<1x128xf32>
    %c1_141 = arith.constant 1 : index
    %c0_142 = arith.constant 0 : index
    %188 = vector.load %arg12[%c1_141, %c0_142] : memref<2x128xf32, #tpu.memory_space<vmem>>, vector<1x128xf32>
    %189 = vector.broadcast %187 : vector<1x128xf32> to vector<8x128xf32>
    %190 = arith.mulf %186, %189 : vector<8x128xf32>
    %191 = vector.broadcast %188 : vector<1x128xf32> to vector<8x128xf32>
    %192 = arith.addf %190, %191 : vector<8x128xf32>
    %c0_143 = arith.constant 0 : index
    %c0_144 = arith.constant 0 : index
    %c0_145 = arith.constant 0 : index
    %193 = vector.load %arg13[%c0_143, %c0_144, %c0_145] : memref<1x8x128xf32, #tpu.memory_space<vmem>>, vector<1x8x128xf32>
    %194 = vector.shape_cast %193 : vector<1x8x128xf32> to vector<8x128xf32>
    %195 = vector.shape_cast %192 : vector<8x128xf32> to vector<1x8x128xf32>
    tpu.vector_store %arg13[%c0_143, %c0_144, %c0_145], %195 {strides = array<i32>} : memref<1x8x128xf32, #tpu.memory_space<vmem>>, vector<1x8x128xf32>,
    return
  }
  func.func @transform_0(%arg0: i32, %arg1: i32) -> (i32, i32, i32) {
    %c0_i32 = arith.constant 0 : i32
    %c0_i32_0 = arith.constant 0 : i32
    return %arg0, %arg1, %c0_i32 : i32, i32, i32
  }
  func.func @transform_1(%arg0: i32, %arg1: i32) -> (i32, i32, i32) {
    %c0_i32 = arith.constant 0 : i32
    %c0_i32_0 = arith.constant 0 : i32
    %c0_i32_1 = arith.constant 0 : i32
    %c0_i32_2 = arith.constant 0 : i32
    return %c0_i32, %c0_i32_0, %c0_i32_1 : i32, i32, i32
  }
  func.func @transform_2(%arg0: i32, %arg1: i32) -> (i32, i32, i32) {
    %c0_i32 = arith.constant 0 : i32
    %c0_i32_0 = arith.constant 0 : i32
    %c0_i32_1 = arith.constant 0 : i32
    %c0_i32_2 = arith.constant 0 : i32
    return %c0_i32, %c0_i32_0, %c0_i32_1 : i32, i32, i32
  }
  func.func @transform_3(%arg0: i32, %arg1: i32) -> (i32, i32, i32) {
    %c0_i32 = arith.constant 0 : i32
    %c0_i32_0 = arith.constant 0 : i32
    %c0_i32_1 = arith.constant 0 : i32
    %c0_i32_2 = arith.constant 0 : i32
    return %c0_i32, %c0_i32_0, %c0_i32_1 : i32, i32, i32
  }
  func.func @transform_4(%arg0: i32, %arg1: i32) -> (i32, i32, i32) {
    %c0_i32 = arith.constant 0 : i32
    %c0_i32_0 = arith.constant 0 : i32
    %c0_i32_1 = arith.constant 0 : i32
    %c0_i32_2 = arith.constant 0 : i32
    return %c0_i32, %c0_i32_0, %c0_i32_1 : i32, i32, i32
  }
  func.func @transform_5(%arg0: i32, %arg1: i32) -> (i32, i32, i32) {
    %c0_i32 = arith.constant 0 : i32
    %c0_i32_0 = arith.constant 0 : i32
    %c0_i32_1 = arith.constant 0 : i32
    %c0_i32_2 = arith.constant 0 : i32
    return %c0_i32, %c0_i32_0, %c0_i32_1 : i32, i32, i32
  }
  func.func @transform_6(%arg0: i32, %arg1: i32) -> (i32, i32) {
    %c0_i32 = arith.constant 0 : i32
    %c0_i32_0 = arith.constant 0 : i32
    %c0_i32_1 = arith.constant 0 : i32
    return %c0_i32, %c0_i32_0 : i32, i32
  }
  func.func @transform_7(%arg0: i32, %arg1: i32) -> (i32, i32) {
    %c0_i32 = arith.constant 0 : i32
    %c0_i32_0 = arith.constant 0 : i32
    %c0_i32_1 = arith.constant 0 : i32
    return %c0_i32, %c0_i32_0 : i32, i32
  }
  func.func @transform_8(%arg0: i32, %arg1: i32) -> (i32, i32) {
    %c0_i32 = arith.constant 0 : i32
    %c0_i32_0 = arith.constant 0 : i32
    %c0_i32_1 = arith.constant 0 : i32
    return %c0_i32, %c0_i32_0 : i32, i32
  }
  func.func @transform_9(%arg0: i32, %arg1: i32) -> (i32, i32) {
    %c0_i32 = arith.constant 0 : i32
    %c0_i32_0 = arith.constant 0 : i32
    %c0_i32_1 = arith.constant 0 : i32
    return %c0_i32, %c0_i32_0 : i32, i32
  }
  func.func @transform_10(%arg0: i32, %arg1: i32) -> (i32, i32) {
    %c0_i32 = arith.constant 0 : i32
    %c0_i32_0 = arith.constant 0 : i32
    %c0_i32_1 = arith.constant 0 : i32
    return %c0_i32, %c0_i32_0 : i32, i32
  }
  func.func @transform_11(%arg0: i32, %arg1: i32) -> (i32, i32, i32) {
    %c0_i32 = arith.constant 0 : i32
    %c0_i32_0 = arith.constant 0 : i32
    return %arg0, %arg1, %c0_i32 : i32, i32, i32
  }
}

</mosaic_0001>

<bundles_post_ra>
// kernel: tpu_custom_call.1
= control target key start
LH: loop header
LB: loop body
LE: loop exit
PB: predicated region body
PF: predicated region fallthrough
CT: control target
= control target key end

     0   :  { %s8959_s0 = inlined_call_operand.hbm [shape: bf16[2,8,128], index: 0, kind: input, shape index: {}]   ;;  %s8960_s1 = inlined_call_operand.hbm [shape: bf16[5,128,256], index: 1, kind: input, shape index: {}]   ;;  %s8961_s2 = inlined_call_operand.hbm [shape: bf16[5,256,256], index: 2, kind: input, shape index: {}]   ;;  %s8962_s3 = inlined_call_operand.hbm [shape: bf16[5,256,256], index: 3, kind: input, shape index: {}]   ;;  %s8963_s4 = inlined_call_operand.hbm [shape: bf16[5,256,256], index: 4, kind: input, shape index: {}]   ;;  %s8964_s5 = inlined_call_operand.hbm [shape: bf16[5,256,128], index: 5, kind: input, shape index: {}]   ;;  %s8965_s6 = inlined_call_operand.vmem [shape: f32[2,256], index: 6, kind: input, shape index: {}]   ;;  %s8966_s7 = inlined_call_operand.vmem [shape: f32[2,256], index: 7, kind: input, shape index: {}]   ;;  %s8967_s8 = inlined_call_operand.vmem [shape: f32[2,256], index: 8, kind: input, shape index: {}]   ;;  %s8968_s9 = inlined_call_operand.vmem [shape: f32[2,256], index: 9, kind: input, shape index: {}]   ;;  %s8969_s10 = inlined_call_operand.vmem [shape: f32[2,128], index: 10, kind: input, shape index: {}]   ;;  %s8970_s11 = inlined_call_operand.hbm [shape: f32[2,8,128], index: 11, kind: output, shape index: {}]  }
   0x1   :  { %8980 = sst [smem:[#allocation25_spill]] %s8959_s0 }
   0x2   :  { %8981 = sst [smem:[#allocation26_spill]] %s8960_s1 }
   0x3   :  { %8982 = sst [smem:[#allocation27_spill]] %s8961_s2 }
   0x4   :  { %8983 = sst [smem:[#allocation28_spill]] %s8967_s8 }
   0x5   :  { %8984 = sst [smem:[#allocation29_spill]] %s8968_s9 }
   0x6   :  { %8985 = sst [smem:[#allocation30_spill]] %s8969_s10 }
   0x7   :  { %8986 = sst [smem:[#allocation31_spill]] %s8970_s11 }
   0x8   :  { %16 = vsyncpa [#allocation8], 0 }
   0x9   :  { %18 = vsyncpa [#allocation8 + $0x1], 0 }
   0xa   :  { %19 = vsyncpa [#allocation11], 0 }
   0xb   :  { %20 = vsyncpa [#allocation14], 0 }
   0xc   :  { %21 = vsyncpa [#allocation17], 0 }
   0xd   :  { %22 = vsyncpa [#allocation9], 0 }
   0xe   :  { %24 = vsyncpa [#allocation9 + $0x1], 0  ;;  %s8401_s17 = smov 0   ;;  %s8403_s18 = smov 0  }
   0xf   :  { %s8405_s19 = smov 0   ;;  %s8407_s20 = smov 0  }
  0x10   :  { %s8409_s21 = smov 0   ;;  %s8411_s22 = smov 0  }
  0x11 LB: > { %8987 = sst [smem:[#allocation24_spill]] %s8318_s20  ;;  %s8971_s23 = sadd.s32 4294967295, %s8326_s22   ;;  %s8326_s22 = sphi %s8411_s22, %s30_s22   ;;  %s8322_s21 = sphi %s8409_s21, %s9016_s21   ;;  %s8318_s20 = sphi %s8407_s20, %s9015_s20   ;;  %s8314_s19 = sphi %s8405_s19, %s9014_s19   ;;  %s8310_s18 = sphi %s8403_s18, %s9013_s18   ;;  %s8306_s17 = sphi %s8401_s17, %s9012_s17  }
  0x12   : > { %p6156_p0 = scmp.ge.s32.totalorder %s8326_s22, 1  ;;  %p8435_p1 = scmp.eq.s32.totalorder %s8971_s23, 0 }
  0x13   : > { %p313_p2 = scmp.lt.s32.totalorder %s8326_s22, 3  ;;  %s8328_s26 = smov [#allocation10]  }
  0x14   : > { %s8988_s24 = scalar_select %p8435_p1, 1, 0 }
  0x15   : > { %p8440_p3 = pnand %p6156_p0, %p313_p2  ;;  %s325_s27 = sshll.u32 %s8328_s26, 4  ;;  %s8444_s27 = int_to_ptr.vmem [resolvable:$true] %s325_s27 }
  0x16   : > { %s8329_s29 = smov [#allocation13]   ;;  %s8330_s12 = smov [#allocation12]  }
  0x17   : > { %s8989_s25 = scalar_select %p8440_p3, 1, 0 }
  0x18   : > { %p7030_p4 = pneg %p8440_p3  ;;  %s351_s30 = sshll.u32 %s8329_s29, 4  ;;  %s8455_s30 = int_to_ptr.vmem [resolvable:$true] %s351_s30 }
  0x19   : > { %s8457_s13 = sshll.u32 %s8330_s12, 4  ;;  %s8991_s1 = sld [smem:[#allocation26_spill]]  ;;  %s339_s13 = int_to_ptr.vmem [resolvable:$true] %s8457_s13 }
  0x1a   : > { %p8451_p6 = pnand %p7030_p4, %p8435_p1 }
  0x1c   : > { %p8467_p8 = pneg %p8451_p6 }
  0x1f   : > { %s8062_s16 = scalar_lea.hbm %s8991_s1, 10240 }
  0x20   : > { %p8063_p7 = scmp.ne.s32.totalorder %s8991_s1, %s8062_s16  ;;  %p8069_p11 = scmp.lt.u32.totalorder %s8062_s16, %s8991_s1 }
  0x22   : > { %p8065_p9 = pnand %p8467_p8, %p8063_p7 }
  0x24   : > { %p8066_p10 = pneg %p8065_p9 }
  0x26   : > { %p8071_p12 = pnand %p8069_p11, %p8066_p10 }
  0x28   : > { %8074 = shalt.err (!%p8071_p12)
}
  0x29   : > { %s8075_s23 = scalar_lea.vmem %s8444_s27, 10240  ;;  %p8083_p4 = scmp.lt.s32.totalorder %s8444_s27, %s8444_s27 }
  0x2a   : > { %p8076_p13 = scmp.ne.s32.totalorder %s8444_s27, %s8075_s23  ;;  %p8084_p5 = scmp.lt.s32.totalorder %s8075_s23, %s8075_s23 }
  0x2c   : > { %p8078_p0 = pnand %p8076_p13, %p8467_p8  ;;  %p8085_p7 = por %p8084_p5, %p8083_p4 }
  0x2e   : > { %p8079_p2 = pneg %p8078_p0 }
  0x30   : > { %p8086_p9 = pnand %p8085_p7, %p8079_p2 }
  0x32   : > { %8089 = shalt.err (!%p8086_p9)
}
  0x33   : > { %s8331_s14 = smov 128   ;;  %s8332_s15 = smov 8  }
  0x34   : > { %7033 = dma.hbm_to_vmem [thread:$0]  (!%p8451_p6), %s8991_s1, 10240, %s8444_s27, [#allocation11], %s8331_s14, %s8331_s14, %s8332_s15  }
  0x35   : > { %s8090_s23 = scalar_lea.hbm %s8962_s3, 20480 }
  0x36   : > { %p8091_p5 = scmp.ne.s32.totalorder %s8962_s3, %s8090_s23  ;;  %p8097_p12 = scmp.lt.u32.totalorder %s8090_s23, %s8962_s3 }
  0x38   : > { %p8093_p10 = pnand %p8091_p5, %p8467_p8 }
  0x3a   : > { %p8094_p11 = pneg %p8093_p10 }
  0x3c   : > { %p8099_p13 = pnand %p8097_p12, %p8094_p11 }
  0x3e   : > { %8102 = shalt.err (!%p8099_p13)
}
  0x3f   : > { %s8103_s27 = scalar_lea.vmem %s8455_s30, 20480  ;;  %p8111_p7 = scmp.lt.s32.totalorder %s8455_s30, %s8455_s30 }
  0x40   : > { %p8104_p0 = scmp.ne.s32.totalorder %s8455_s30, %s8103_s27  ;;  %p8112_p9 = scmp.lt.s32.totalorder %s8103_s27, %s8103_s27 }
  0x42   : > { %p8106_p2 = pnand %p8104_p0, %p8467_p8  ;;  %p8113_p5 = por %p8112_p9, %p8111_p7 }
  0x44   : > { %p8107_p4 = pneg %p8106_p2 }
  0x46   : > { %p8114_p10 = pnand %p8113_p5, %p8107_p4 }
  0x48   : > { %8117 = shalt.err (!%p8114_p10)
}
  0x49   : > { %7039 = dma.hbm_to_vmem [thread:$0]  (!%p8451_p6), %s8962_s3, 20480, %s8455_s30, [#allocation14], %s8331_s14, %s8331_s14, %s8332_s15  }
  0x4a   : > { %s8993_s2 = sld [smem:[#allocation27_spill]] }
  0x50   : > { %s8118_s16 = scalar_lea.hbm %s8993_s2, 20480 }
  0x51   : > { %p8119_p11 = scmp.ne.s32.totalorder %s8993_s2, %s8118_s16  ;;  %p8125_p0 = scmp.lt.u32.totalorder %s8118_s16, %s8993_s2 }
  0x53   : > { %p8121_p12 = pnand %p8119_p11, %p8467_p8 }
  0x55   : > { %p8122_p13 = pneg %p8121_p12 }
  0x57   : > { %p8127_p2 = pnand %p8125_p0, %p8122_p13 }
  0x59   : > { %8130 = shalt.err (!%p8127_p2)
}
  0x5a   : > { %s8131_s27 = scalar_lea.vmem %s339_s13, 20480  ;;  %p8139_p5 = scmp.lt.s32.totalorder %s339_s13, %s339_s13 }
  0x5b   : > { %p8132_p4 = scmp.ne.s32.totalorder %s339_s13, %s8131_s27  ;;  %p8140_p10 = scmp.lt.s32.totalorder %s8131_s27, %s8131_s27 }
  0x5d   : > { %p8134_p7 = pnand %p8132_p4, %p8467_p8  ;;  %p8141_p3 = por %p8140_p10, %p8139_p5 }
  0x5f   : > { %p8135_p9 = pneg %p8134_p7 }
  0x61   : > { %p8142_p1 = pnand %p8141_p3, %p8135_p9 }
  0x63   : > { %8145 = shalt.err (!%p8142_p1)
}
  0x64   : > { %7036 = dma.hbm_to_vmem [thread:$0]  (!%p8451_p6), %s8993_s2, 20480, %s339_s13, [#allocation11], %s8331_s14, %s8331_s14, %s8332_s15  }
  0x65   : > { %s8333_s9 = smov [#allocation15]   ;;  %s8334_s20 = smov [#allocation16]  }
  0x66   : > { %s364_s10 = sshll.u32 %s8333_s9, 4  ;;  %s377_s16 = sshll.u32 %s8334_s20, 4  ;;  %s365_s10 = int_to_ptr.vmem [resolvable:$true] %s364_s10  ;;  %s378_s16 = int_to_ptr.vmem [resolvable:$true] %s377_s16 }
  0x67   : > { %s8146_s12 = scalar_lea.hbm %s8963_s4, 20480 }
  0x68   : > { %p8147_p1 = scmp.ne.s32.totalorder %s8963_s4, %s8146_s12  ;;  %p8153_p12 = scmp.lt.u32.totalorder %s8146_s12, %s8963_s4 }
  0x6a   : > { %p8149_p3 = pnand %p8147_p1, %p8467_p8 }
  0x6c   : > { %p8150_p11 = pneg %p8149_p3 }
  0x6e   : > { %p8155_p13 = pnand %p8153_p12, %p8150_p11 }
  0x70   : > { %8158 = shalt.err (!%p8155_p13)
}
  0x71   : > { %s8159_s13 = scalar_lea.vmem %s365_s10, 20480  ;;  %p8167_p7 = scmp.lt.s32.totalorder %s365_s10, %s365_s10 }
  0x72   : > { %p8160_p0 = scmp.ne.s32.totalorder %s365_s10, %s8159_s13  ;;  %p8168_p9 = scmp.lt.s32.totalorder %s8159_s13, %s8159_s13 }
  0x74   : > { %p8162_p2 = pnand %p8160_p0, %p8467_p8  ;;  %p8169_p5 = por %p8168_p9, %p8167_p7 }
  0x76   : > { %p8163_p4 = pneg %p8162_p2 }
  0x78   : > { %p8170_p10 = pnand %p8169_p5, %p8163_p4 }
  0x7a   : > { %8173 = shalt.err (!%p8170_p10)
}
  0x7b   : > { %7042 = dma.hbm_to_vmem [thread:$0]  (!%p8451_p6), %s8963_s4, 20480, %s365_s10, [#allocation14], %s8331_s14, %s8331_s14, %s8332_s15  }
  0x7c   : > { %s8174_s26 = scalar_lea.hbm %s8964_s5, 10240 }
  0x7d   : > { %p8175_p1 = scmp.ne.s32.totalorder %s8964_s5, %s8174_s26  ;;  %p8181_p12 = scmp.lt.u32.totalorder %s8174_s26, %s8964_s5 }
  0x7f   : > { %p8177_p3 = pnand %p8175_p1, %p8467_p8 }
  0x81   : > { %p8178_p11 = pneg %p8177_p3 }
  0x83   : > { %p8183_p13 = pnand %p8181_p12, %p8178_p11 }
  0x85   : > { %8186 = shalt.err (!%p8183_p13)
}
  0x86   : > { %s8187_s30 = scalar_lea.vmem %s378_s16, 10240  ;;  %p8195_p7 = scmp.lt.s32.totalorder %s378_s16, %s378_s16 }
  0x87   : > { %p8188_p0 = scmp.ne.s32.totalorder %s378_s16, %s8187_s30  ;;  %p8196_p9 = scmp.lt.s32.totalorder %s8187_s30, %s8187_s30 }
  0x89   : > { %p8190_p2 = pnand %p8188_p0, %p8467_p8  ;;  %p8197_p5 = por %p8196_p9, %p8195_p7 }
  0x8b   : > { %p8191_p4 = pneg %p8190_p2 }
  0x8d   : > { %p8198_p10 = pnand %p8197_p5, %p8191_p4 }
  0x8f   : > { %8201 = shalt.err (!%p8198_p10)
}
  0x90   : > { %s8335_s14 = smov 64   ;;  %s8336_s11 = smov 4  }
  0x91   : > { %7045 = dma.hbm_to_vmem [thread:$0]  (!%p8451_p6), %s8964_s5, 10240, %s378_s16, [#allocation17], %s8335_s14, %s8335_s14, %s8336_s11  }
  0x92   : > { %s6155_s13 = sadd.s32 4294967294, %s8326_s22   ;;  %s42_s1 = sadd.s32 1, %s8322_s21 }
  0x93   : > { %s51_s8 = sadd.s32 1, %s8314_s19  ;;  %p44_p8 = scmp.ge.s32.totalorder %s42_s1, 2 }
  0x94   : > { %p58_p1 = scmp.ne.s32.totalorder %s8314_s19, %s8310_s18  ;;  %p59_p3 = scmp.eq.s32.totalorder %s8326_s22, 0 }
  0x95   : > { %p64_p11 = scmp.ne.s32.totalorder %s8310_s18, %s8306_s17  ;;  %s9018_s1 = smov (%p44_p8, %s42_s1), 0 }
  0x96   : > { %p8588_p12 = por %p59_p3, %p58_p1  ;;  %p8995_p13 = scmp.ne.s32.totalorder %s8988_s24, 0 }
  0x97   : > { %s46_s9 = ssub.s32 %s8322_s21, %s9018_s1  ;;  %s8997_s20 = sadd.s32 4294967295, %s8326_s22  }
  0x98   : > { %p8594_p6 = por %p8995_p13, %p64_p11  ;;  %p300_p0 = scmp.eq.s32.totalorder %s8997_s20, 1 }
  0x99   : > { %p49_p2 = scmp.eq.s32.totalorder %s46_s9, 0  ;;  %p306_p4 = scmp.eq.s32.totalorder %s6155_s13, 1 }
  0x9a   : > { %p8602_p7 = por %p300_p0, %p58_p1  ;;  %p7059_p9 = scmp.lt.s32.totalorder %s8326_s22, 2 }
  0x9b   : > { %s8608_s29 = scalar_select %p49_p2, %s8314_s19, %s51_s8  }
  0x9c   : > { %s8998_s26 = scalar_select %p8602_p7, 1, 0 }
  0x9d   : > { %p8610_p5 = por %p306_p4, %p64_p11  ;;  %s406_s23 = sand.u32 1, %s8314_s19  }
  0x9e   : > { %s6163_s27 = sshll.u32 %s406_s23, 2  ;;  %s6164_s30 = sshll.u32 %s8322_s21, 6 }
  0x9f   : > { %s8999_s12 = scalar_select %p8610_p5, 1, 0 }
  0xa0   : > { %s9000_s0 = sld [smem:[#allocation25_spill]]  ;;  %s410_s10 = scalar_lea.vmem [#allocation7], %s6163_s27 }
  0xa1   : > { %s418_s13 = sshll.u32 %s410_s10, 4  ;;  %p8625_p10 = pnand %p7059_p9, %p8588_p12  ;;  %s8621_s13 = int_to_ptr.vmem [resolvable:$true] %s418_s13 }
  0xa2   : > { %s407_s9 = scalar_lea.sflag [#allocation8], %s406_s23 }
  0xa3   : > { %p8204_p1 = pneg %p8625_p10 }
  0xa6   : > { %s8619_s15 = scalar_lea.hbm %s9000_s0, %s6164_s30  ;;  %s8207_s14 = scalar_lea.hbm %s9000_s0, 128 }
  0xa7   : > { %s8202_s20 = scalar_lea.hbm %s8619_s15, 64  ;;  %p8208_p12 = scmp.lt.u32.totalorder %s8619_s15, %s9000_s0 }
  0xa8   : > { %p8203_p8 = scmp.ne.s32.totalorder %s8619_s15, %s8202_s20  ;;  %p8209_p13 = scmp.lt.u32.totalorder %s8207_s14, %s8202_s20 }
  0xa9   : > { %p8211_p2 = scmp.lt.u32.totalorder %s8202_s20, %s8619_s15 }
  0xaa   : > { %p8205_p3 = pnand %p8204_p1, %p8203_p8  ;;  %p8210_p0 = por %p8209_p13, %p8208_p12 }
  0xac   : > { %p8206_p11 = pneg %p8205_p3  ;;  %p8212_p4 = por %p8211_p2, %p8210_p0 }
  0xae   : > { %p8213_p9 = pnand %p8212_p4, %p8206_p11 }
  0xb0   : > { %8216 = shalt.err (!%p8213_p9)
}
  0xb1   : > { %s8217_s23 = scalar_lea.vmem %s8621_s13, 64  ;;  %s8337_s10 = smov [#allocation7]  }
  0xb2   : > { %p8218_p8 = scmp.ne.s32.totalorder %s8621_s13, %s8217_s23  ;;  %s8222_s27 = sshll.u32 %s8337_s10, 4  ;;  %s8223_s27 = int_to_ptr.vmem [resolvable:$false] %s8222_s27 }
  0xb3   : > { %s8224_s30 = scalar_lea.vmem %s8223_s27, 128  ;;  %p8225_p7 = scmp.lt.s32.totalorder %s8621_s13, %s8223_s27 }
  0xb4   : > { %p8220_p3 = pnand %p8218_p8, %p8204_p1  ;;  %p8226_p12 = scmp.lt.s32.totalorder %s8224_s30, %s8217_s23 }
  0xb6   : > { %p8221_p5 = pneg %p8220_p3  ;;  %p8227_p13 = por %p8226_p12, %p8225_p7 }
  0xb8   : > { %p8228_p0 = pnand %p8227_p13, %p8221_p5 }
  0xba   : > { %8231 = shalt.err (!%p8228_p0)
}
  0xbb   : > { %7049 = dma.hbm_to_vmem [thread:$0]  (!%p8625_p10), %s8619_s15, 64, %s8621_s13, %s407_s9  }
  0xbc   : > { %p9002_p11 = scmp.ne.s32.totalorder %s8989_s25, 0 }
  0xbd   : > { %s8657_s20 = sand.u32 (!%p9002_p11), 1, %s8310_s18  }
  0xbe   : > { %427 = sbr.rel (%p9002_p11) target bundleno = 2457 (0x999), region = 64  ;;  %s6166_s14 = sshll.u32 (!%p9002_p11), %s8657_s20, 2 }
  0xbf   : > { %s430_s28 = scalar_lea.sflag (!%p9002_p11), [#allocation8], %s8657_s20  ;;  %s8661_s11 = scalar_lea.vmem (!%p9002_p11), [#allocation7], %s6166_s14 }
  0xc5   : > { %8285 = dma.done.wait (%p8594_p6), %s430_s28, 64  }
  0xc6   : > { %8287 = vsyncadd (%p8594_p6), %s430_s28, 4294967232  ;;  %p9003_p7 = scmp.ne.s32.totalorder %s8988_s24, 0 }
  0xc8   : > { %8289 = dma.done.wait (%p9003_p7), [#allocation11], 30720  }
  0xc9   : > { %8291 = vsyncadd (%p9003_p7), [#allocation11], 4294936576 }
  0xca   : > { %8293 = dma.done.wait (%p9003_p7), [#allocation14], 40960  }
  0xcb   : > { %8295 = vsyncadd (%p9003_p7), [#allocation14], 4294926336 }
  0xcc   : > { %8297 = dma.done.wait (%p9003_p7), [#allocation17], 10240  }
  0xcd   : > { %8299 = vsyncadd (%p9003_p7), [#allocation17], 4294957056  ;;  %v8338_v0 = vmov 0   ;;  %v7125_v1 = vld [vmem:[#allocation10 + $0x84] ss:$8 sps:$4 sm:$0xff]   ;;  %v508_v8 = vlaneseq  ;;  %vm518_vm0 = vcmask 1041408  }
  0xce   : > { %675 = vmatprep.mubr.bf16.mxu0 %v8338_v0  ;;  %497 = vst [vmem:[#allocation2] sm:$0x3] %v8338_v0  ;;  %498 = vst [vmem:[#allocation3] sm:$0xf] %v8338_v0  ;;  %v7127_v2 = vld [vmem:[#allocation10 + $0x80] ss:$8 sps:$4 sm:$0xff]   ;;  %643 = vmatprep.subr.bf16.mxu0 %v7125_v1 }
  0xcf   : > { %499 = vst [vmem:[#allocation4] sm:$0xf] %v8338_v0  ;;  %500 = vst [vmem:[#allocation5] sm:$0xf] %v8338_v0  ;;  %v7128_v3 = vld [vmem:[#allocation10 + $0x94] ss:$8 sps:$4 sm:$0xff]   ;;  %644 = vmatpush1.bf16.msra.mxu0 %v7127_v2 }
  0xd0   : > { %501 = vst [vmem:[#allocation6] sm:$0xf] %v8338_v0  ;;  %v7130_v4 = vld [vmem:[#allocation10 + $0x90] ss:$8 sps:$4 sm:$0xff]   ;;  %v8339_v5 = vmov 1983009808   ;;  %645 = vmatprep.subr.bf16.mxu0 %v7128_v3 }
  0xd1   : > { %v506_v6 = vunpack.c.l.s4 %v8339_v5  ;;  %v7131_v7 = vld [vmem:[#allocation10 + $0xa4] ss:$8 sps:$4 sm:$0xff]   ;;  %v7133_v9 = vld [vmem:[#allocation10 + $0xa0] ss:$8 sps:$4 sm:$0xff]   ;;  %v7134_v11 = vld [vmem:[#allocation10 + $0xb4] ss:$8 sps:$4 sm:$0xff]  }
  0xd2   : > { %v8685_v12 = vshrl.u32 %v508_v8, 7  ;;  %v7136_v13 = vld [vmem:[#allocation10 + $0xb0] ss:$8 sps:$4 sm:$0xff]   ;;  %v7137_v15 = vld [vmem:[#allocation10 + $0xc4] ss:$8 sps:$4 sm:$0xff]   ;;  %s9004_s30 = sld [smem:[#allocation28_spill]] }
  0xd3   : > { %646 = vmatpush1.bf16.msra.mxu0 %v7130_v4  ;;  %v507_v10 = vunpack.c.0.s8 %v506_v6  ;;  %v502_v16 = vld [vmem:[%s8661_s11] sm:$0xf]  ;;  %v7139_v20 = vld [vmem:[#allocation10 + $0xc0] ss:$8 sps:$4 sm:$0xff]   ;;  %v7143_v28 = vld [vmem:[#allocation10 + $0xe4] ss:$8 sps:$4 sm:$0xff]  }
  0xd4   : > { %647 = vmatprep.subr.bf16.mxu0 %v7131_v7  ;;  %v6173_v18 = vcombine.low %v502_v16, %v502_v16  ;;  %v7140_v23 = vld [vmem:[#allocation10 + $0xd4] ss:$8 sps:$4 sm:$0xff]   ;;  %v7142_v26 = vld [vmem:[#allocation10 + $0xd0] ss:$8 sps:$4 sm:$0xff]   ;;  %v7145_v31 = vld [vmem:[#allocation10 + $0xe0] ss:$8 sps:$4 sm:$0xff]  }
  0xd5   : > { %v8688_v14 = vsub.s32 %v507_v10, %v8685_v12  ;;  %v503_v19 = vld [vmem:[#allocation2] sm:$0x3]  ;;  %v7146_v33 = vld [vmem:[#allocation10 + $0xf4] ss:$8 sps:$4 sm:$0xff]   ;;  %v7148_v35 = vld [vmem:[#allocation10 + $0xf0] ss:$8 sps:$4 sm:$0xff]  }
  0xd6   : > { %v517_v22 = vrot.slane %v6173_v18, 6  ;;  %v7151_v36 = vld [vmem:[#allocation10 + $0x4] ss:$8 sps:$4 sm:$0xff]   ;;  %v7149_v38 = vld [vmem:[#allocation10] ss:$8 sps:$4 sm:$0xff]   ;;  %s9005_s25 = sld [smem:[#allocation29_spill]] }
  0xd7   : > { %648 = vmatpush1.bf16.msra.mxu0 %v7133_v9  ;;  %v511_v17 = vrot.slane %v502_v16, %v8688_v14  ;;  %v7155_v39 = vld [vmem:[#allocation10 + $0x14] ss:$8 sps:$4 sm:$0xff]   ;;  %v7153_v40 = vld [vmem:[#allocation10 + $0x10] ss:$8 sps:$4 sm:$0xff]   ;;  %v7158_v41 = vld [vmem:[#allocation10 + $0x24] ss:$8 sps:$4 sm:$0xff]  }
  0xd8   : > { %649 = vmatprep.subr.bf16.mxu0 %v7134_v11  ;;  %v8693_v24 = vsel %vm518_vm0, %v503_v19, %v517_v22  ;;  %v7156_v42 = vld [vmem:[#allocation10 + $0x20] ss:$8 sps:$4 sm:$0xff]   ;;  %v7161_v43 = vld [vmem:[#allocation10 + $0x34] ss:$8 sps:$4 sm:$0xff]   ;;  %v7159_v44 = vld [vmem:[#allocation10 + $0x30] ss:$8 sps:$4 sm:$0xff]  }
  0xd9   : > { %v512_v21 = vcombine.high %v511_v17, %v511_v17  ;;  %v556_v25 = vshrl.u32 %v8693_v24, 16  ;;  %v558_v27 = vshll.u32 %v8693_v24, 16  ;;  %v7164_v45 = vld [vmem:[#allocation10 + $0x44] ss:$8 sps:$4 sm:$0xff]   ;;  %v7162_v46 = vld [vmem:[#allocation10 + $0x40] ss:$8 sps:$4 sm:$0xff]  }
  0xda   : > { %v7167_v47 = vld [vmem:[#allocation10 + $0x54] ss:$8 sps:$4 sm:$0xff]   ;;  %v7165_v48 = vld [vmem:[#allocation10 + $0x50] ss:$8 sps:$4 sm:$0xff]   ;;  %v7170_v49 = vld [vmem:[#allocation10 + $0x64] ss:$8 sps:$4 sm:$0xff]  }
  0xdb   : > { %650 = vmatpush1.bf16.msra.mxu0 %v7136_v13  ;;  %514 = vst [vmem:[#allocation2] sm:$0x3] %v512_v21  ;;  %v8697_v29 = vrot.slane %v556_v25, 1  ;;  %v8699_v30 = vrot.slane %v558_v27, 2  ;;  %v560_v34 = vrot.slane %v558_v27, 1  ;;  %s9006_s13 = sld [smem:[#allocation24_spill]] }
  0xdc   : > { %651 = vmatprep.subr.bf16.mxu0 %v7137_v15  ;;  %v7168_v50 = vld [vmem:[#allocation10 + $0x60] ss:$8 sps:$4 sm:$0xff]   ;;  %v7246_v51 = vld [vmem:[#allocation12 + $0x104] ss:$8 sps:$4 sm:$0xff]   ;;  %v7173_v53 = vld [vmem:[#allocation10 + $0x74] ss:$8 sps:$4 sm:$0xff]  }
  0xdd   : > { %v967_v32 = vor.u32 %v8699_v30, %v8697_v29  ;;  %v561_v37 = vor.u32 %v560_v34, %v556_v25  ;;  %v7248_v52 = vld [vmem:[#allocation12 + $0x100] ss:$8 sps:$4 sm:$0xff]   ;;  %v7249_v54 = vld [vmem:[#allocation12 + $0x114] ss:$8 sps:$4 sm:$0xff]   ;;  %1539 = vmatprep.subr.bf16.mxu1 %v7246_v51  ;;  %v7251_v55 = vld [vmem:[#allocation12 + $0x110] ss:$8 sps:$4 sm:$0xff]  }
  0xde   : > { %1540 = vmatpush1.bf16.msra.mxu1 %v7248_v52  ;;  %v7171_v56 = vld [vmem:[#allocation10 + $0x70] ss:$8 sps:$4 sm:$0xff]   ;;  %v7252_v57 = vld [vmem:[#allocation12 + $0x124] ss:$8 sps:$4 sm:$0xff]   ;;  %v7254_v59 = vld [vmem:[#allocation12 + $0x120] ss:$8 sps:$4 sm:$0xff]  }
  0xdf   : > { %652 = vmatpush1.bf16.msra.mxu0 %v7139_v20  ;;  %1541 = vmatprep.subr.bf16.mxu1 %v7249_v54  ;;  %v7176_v58 = vld [vmem:[#allocation10 + $0x104] ss:$8 sps:$4 sm:$0xff]   ;;  %v7174_v60 = vld [vmem:[#allocation10 + $0x100] ss:$8 sps:$4 sm:$0xff]   ;;  %v7179_v61 = vld [vmem:[#allocation10 + $0x114] ss:$8 sps:$4 sm:$0xff]  }
  0xe0   : > { %653 = vmatprep.subr.bf16.mxu0 %v7140_v23  ;;  %v7255_v62 = vld [vmem:[#allocation12 + $0x134] ss:$8 sps:$4 sm:$0xff]   ;;  %v7177_v63 = vld [vmem:[#allocation10 + $0x110] ss:$8 sps:$4 sm:$0xff]   ;;  %v7182_v2 = vld [vmem:[#allocation10 + $0x124] ss:$8 sps:$4 sm:$0xff]  }
  0xe1   : > { %v7257_v1 = vld [vmem:[#allocation12 + $0x130] ss:$8 sps:$4 sm:$0xff]   ;;  %v7258_v3 = vld [vmem:[#allocation12 + $0x144] ss:$8 sps:$4 sm:$0xff]   ;;  %v7260_v4 = vld [vmem:[#allocation12 + $0x140] ss:$8 sps:$4 sm:$0xff]  }
  0xe2   : > { %1542 = vmatpush1.bf16.msra.mxu1 %v7251_v55  ;;  %v7180_v5 = vld [vmem:[#allocation10 + $0x120] ss:$8 sps:$4 sm:$0xff]   ;;  %v7261_v6 = vld [vmem:[#allocation12 + $0x154] ss:$8 sps:$4 sm:$0xff]   ;;  %v7263_v8 = vld [vmem:[#allocation12 + $0x150] ss:$8 sps:$4 sm:$0xff]  }
  0xe3   : > { %654 = vmatpush1.bf16.msra.mxu0 %v7142_v26  ;;  %1543 = vmatprep.subr.bf16.mxu1 %v7252_v57  ;;  %v7185_v7 = vld [vmem:[#allocation10 + $0x134] ss:$8 sps:$4 sm:$0xff]   ;;  %v7183_v9 = vld [vmem:[#allocation10 + $0x130] ss:$8 sps:$4 sm:$0xff]   ;;  %v7264_v10 = vld [vmem:[#allocation12 + $0x164] ss:$8 sps:$4 sm:$0xff]  }
  0xe4   : > { %655 = vmatprep.subr.bf16.mxu0 %v7143_v28  ;;  %v7188_v11 = vld [vmem:[#allocation10 + $0x144] ss:$8 sps:$4 sm:$0xff]   ;;  %v7266_v13 = vld [vmem:[#allocation12 + $0x160] ss:$8 sps:$4 sm:$0xff]   ;;  %v7267_v16 = vld [vmem:[#allocation12 + $0x174] ss:$8 sps:$4 sm:$0xff]  }
  0xe5   : > { %v7186_v15 = vld [vmem:[#allocation10 + $0x140] ss:$8 sps:$4 sm:$0xff]   ;;  %v7191_v17 = vld [vmem:[#allocation10 + $0x154] ss:$8 sps:$4 sm:$0xff]   ;;  %v7269_v18 = vld [vmem:[#allocation12 + $0x170] ss:$8 sps:$4 sm:$0xff]  }
  0xe6   : > { %1544 = vmatpush1.bf16.msra.mxu1 %v7254_v59  ;;  %v7189_v19 = vld [vmem:[#allocation10 + $0x150] ss:$8 sps:$4 sm:$0xff]   ;;  %v7270_v20 = vld [vmem:[#allocation12 + $0x184] ss:$8 sps:$4 sm:$0xff]   ;;  %v7272_v22 = vld [vmem:[#allocation12 + $0x180] ss:$8 sps:$4 sm:$0xff]  }
  0xe7   : > { %656 = vmatpush1.bf16.msra.mxu0 %v7145_v31  ;;  %1545 = vmatprep.subr.bf16.mxu1 %v7255_v62  ;;  %v7194_v21 = vld [vmem:[#allocation10 + $0x164] ss:$8 sps:$4 sm:$0xff]   ;;  %v7192_v23 = vld [vmem:[#allocation10 + $0x160] ss:$8 sps:$4 sm:$0xff]   ;;  %v7197_v25 = vld [vmem:[#allocation10 + $0x174] ss:$8 sps:$4 sm:$0xff]  }
  0xe8   : > { %657 = vmatprep.subr.bf16.mxu0 %v7146_v33  ;;  %v7195_v26 = vld [vmem:[#allocation10 + $0x170] ss:$8 sps:$4 sm:$0xff]   ;;  %v7200_v27 = vld [vmem:[#allocation10 + $0x184] ss:$8 sps:$4 sm:$0xff]   ;;  %v7198_v28 = vld [vmem:[#allocation10 + $0x180] ss:$8 sps:$4 sm:$0xff]  }
  0xe9   : > { %v823_v31 = vrot.slane %v8693_v24, 1  ;;  %v7203_v33 = vld [vmem:[#allocation10 + $0x194] ss:$8 sps:$4 sm:$0xff]   ;;  %v7201_v34 = vld [vmem:[#allocation10 + $0x190] ss:$8 sps:$4 sm:$0xff]   ;;  %v1109_v59 = vrot.slane %v8693_v24, 2 }
  0xea   : > { %1546 = vmatpush1.bf16.msra.mxu1 %v7257_v1  ;;  %v7230_v51 = vld [vmem:[#allocation10 + $0x224] ss:$8 sps:$4 sm:$0xff]   ;;  %v7228_v52 = vld [vmem:[#allocation10 + $0x220] ss:$8 sps:$4 sm:$0xff]   ;;  %v7231_v54 = vld [vmem:[#allocation10 + $0x230] ss:$8 sps:$4 sm:$0xff]  }
  0xeb   : > { %658 = vmatpush1.bf16.msra.mxu0 %v7148_v35  ;;  %1547 = vmatprep.subr.bf16.mxu1 %v7258_v3  ;;  %v7206_v35 = vld [vmem:[#allocation10 + $0x1a4] ss:$8 sps:$4 sm:$0xff]   ;;  %v7239_v57 = vld [vmem:[#allocation10 + $0x254] ss:$8 sps:$4 sm:$0xff]   ;;  %v7240_v30 = vld [vmem:[#allocation10 + $0x260] ss:$8 sps:$4 sm:$0xff]  }
  0xec   : > { %764 = vmatprep.subr.bf16.mxu0 %v7151_v36  ;;  %v7204_v36 = vld [vmem:[#allocation10 + $0x1a0] ss:$8 sps:$4 sm:$0xff]   ;;  %v7236_v55 = vld [vmem:[#allocation10 + $0x244] ss:$8 sps:$4 sm:$0xff]   ;;  %v7279_v1 = vld [vmem:[#allocation12 + $0x1b4] ss:$8 sps:$4 sm:$0xff]  }
  0xed   : > { %v7242_v29 = vld [vmem:[#allocation10 + $0x264] ss:$8 sps:$4 sm:$0xff]   ;;  %s6172_s8 = sshll.u32 %s8657_s20, 3  ;;  %s9007_s10 = sld [smem:[#allocation30_spill]] }
  0xee   : > { %676 = vmatmul.mubr.bf16.vlgmr.msra.gmra.mrb[0].mxu0 %v561_v37  ;;  %1548 = vmatpush1.bf16.msra.mxu1 %v7260_v4  ;;  %v7209_v37 = vld [vmem:[#allocation10 + $0x1b4] ss:$8 sps:$4 sm:$0xff]   ;;  %v7276_v62 = vld [vmem:[#allocation12 + $0x1a4] ss:$8 sps:$4 sm:$0xff]   ;;  %v7284_v4 = vld [vmem:[#allocation12 + $0x1c0] ss:$8 sps:$4 sm:$0xff]  }
  0xef   : > { %765 = vmatpush1.bf16.msra.mxu0 %v7149_v38  ;;  %796 = vmatprep.mubr.bf16.mxu0 %v8338_v0  ;;  %v7207_v38 = vld [vmem:[#allocation10 + $0x1b0] ss:$8 sps:$4 sm:$0xff]   ;;  %v7282_v3 = vld [vmem:[#allocation12 + $0x1c4] ss:$8 sps:$4 sm:$0xff]   ;;  %s6829_s28 = sshll.u32 %s9006_s13, 7  ;;  %s491_s11 = scalar_lea.vmem [#allocation18], %s6172_s8 }
  0xf0   : > { %766 = vmatprep.subr.bf16.mxu0 %v7155_v39  ;;  %1549 = vmatprep.subr.bf16.mxu1 %v7261_v6  ;;  %v7212_v39 = vld [vmem:[#allocation10 + $0x1c4] ss:$8 sps:$4 sm:$0xff]   ;;  %s6026_s24 = sshll.u32 %s491_s11, 4  ;;  %s9008_s0 = sld [smem:[#allocation31_spill]]  ;;  %s8912_s24 = int_to_ptr.vmem [resolvable:$true] %s6026_s24 }
  0xf1   : > { %v7288_v6 = vld [vmem:[#allocation12 + $0x1e4] ss:$8 sps:$4 sm:$0xff]   ;;  %s6012_s9 = scalar_lea.sflag [#allocation9], %s8657_s20  ;;  %s8232_s23 = scalar_lea.vmem %s8912_s24, 128 }
  0xf2   : > { %1550 = vmatpush1.bf16.msra.mxu1 %v7263_v8  ;;  %v7291_v8 = vld [vmem:[#allocation12 + $0x1f4] ss:$8 sps:$4 sm:$0xff]   ;;  %p8233_p6 = scmp.ne.s32.totalorder %s8912_s24, %s8232_s23  ;;  %p9009_p5 = scmp.ne.s32.totalorder %s8998_s26, 0 }
  0xf3   : > { %767 = vmatpush1.bf16.msra.mxu0 %v7153_v40  ;;  %1551 = vmatprep.subr.bf16.mxu1 %v7264_v10  ;;  %v7210_v40 = vld [vmem:[#allocation10 + $0x1c0] ss:$8 sps:$4 sm:$0xff]   ;;  %v7296_v10 = vld [vmem:[#allocation12 + $0x4] ss:$8 sps:$4 sm:$0xff]   ;;  %s8340_s13 = smov [#allocation18]  }
  0xf4   : > { %768 = vmatprep.subr.bf16.mxu0 %v7158_v41  ;;  %v7215_v41 = vld [vmem:[#allocation10 + $0x1d4] ss:$8 sps:$4 sm:$0xff]   ;;  %p8234_p10 = pnand %p8233_p6, %p9009_p5  ;;  %s8236_s8 = sshll.u32 %s8340_s13, 4  ;;  %s8237_s8 = int_to_ptr.vmem [resolvable:$false] %s8236_s8 }
  0xf5   : > { %s8238_s27 = scalar_lea.vmem %s8237_s8, 256  ;;  %p8239_p2 = scmp.lt.s32.totalorder %s8912_s24, %s8237_s8 }
  0xf6   : > { %1552 = vmatpush1.bf16.msra.mxu1 %v7266_v13  ;;  %v1234_v13 = vld [vmem:[%s8965_s6] ss:$2 sm:$0x3]  ;;  %s8910_s2 = scalar_lea.hbm %s9008_s0, %s6829_s28  ;;  %p8235_p1 = pneg %p8234_p10 }
  0xf7   : > { %769 = vmatpush1.bf16.msra.mxu0 %v7156_v42  ;;  %1553 = vmatprep.subr.bf16.mxu1 %v7267_v16  ;;  %v7213_v42 = vld [vmem:[#allocation10 + $0x1d0] ss:$8 sps:$4 sm:$0xff]   ;;  %v6254_v16 = vld [vmem:[%s8965_s6 + $0x1] ss:$2 sm:$0x3]  ;;  %p8240_p4 = scmp.lt.s32.totalorder %s8238_s27, %s8232_s23 }
  0xf8   : > { %770 = vmatprep.subr.bf16.mxu0 %v7161_v43  ;;  %v7218_v43 = vld [vmem:[#allocation10 + $0x1e4] ss:$8 sps:$4 sm:$0xff]  }
  0xf9   : > { %p8241_p9 = por %p8240_p4, %p8239_p2 }
  0xfa   : > { %1554 = vmatpush1.bf16.msra.mxu1 %v7269_v18 }
  0xfb   : > { %771 = vmatpush1.bf16.msra.mxu0 %v7159_v44  ;;  %1555 = vmatprep.subr.bf16.mxu1 %v7270_v20  ;;  %v7216_v44 = vld [vmem:[#allocation10 + $0x1e0] ss:$8 sps:$4 sm:$0xff]   ;;  %p8242_p8 = pnand %p8241_p9, %p8235_p1 }
  0xfc   : > { %772 = vmatprep.subr.bf16.mxu0 %v7164_v45  ;;  %v7221_v45 = vld [vmem:[#allocation10 + $0x1f4] ss:$8 sps:$4 sm:$0xff]  }
  0xfe   : > { %1556 = vmatpush1.bf16.msra.mxu1 %v7272_v22 }
  0xff   : > { %773 = vmatpush1.bf16.msra.mxu0 %v7162_v46  ;;  %v7219_v46 = vld [vmem:[#allocation10 + $0x1f0] ss:$8 sps:$4 sm:$0xff]  }
 0x100   : > { %774 = vmatprep.subr.bf16.mxu0 %v7167_v47  ;;  %v7224_v47 = vld [vmem:[#allocation10 + $0x204] ss:$8 sps:$4 sm:$0xff]  }
 0x103   : > { %775 = vmatpush1.bf16.msra.mxu0 %v7165_v48  ;;  %v7222_v48 = vld [vmem:[#allocation10 + $0x200] ss:$8 sps:$4 sm:$0xff]  }
 0x104   : > { %776 = vmatprep.subr.bf16.mxu0 %v7170_v49  ;;  %v7227_v49 = vld [vmem:[#allocation10 + $0x214] ss:$8 sps:$4 sm:$0xff]  }
 0x107   : > { %777 = vmatpush1.bf16.msra.mxu0 %v7168_v50  ;;  %v7225_v50 = vld [vmem:[#allocation10 + $0x210] ss:$8 sps:$4 sm:$0xff]  }
 0x108   : > { %778 = vmatprep.subr.bf16.mxu0 %v7173_v53  ;;  %v7233_v53 = vld [vmem:[#allocation10 + $0x234] ss:$8 sps:$4 sm:$0xff]  }
 0x10b   : > { %779 = vmatpush1.bf16.msra.mxu0 %v7171_v56  ;;  %v7234_v56 = vld [vmem:[#allocation10 + $0x240] ss:$8 sps:$4 sm:$0xff]  }
 0x10c   : > { %905 = vmatprep.subr.bf16.mxu0 %v7176_v58  ;;  %v7237_v58 = vld [vmem:[#allocation10 + $0x250] ss:$8 sps:$4 sm:$0xff]  }
 0x10e   : > { %797 = vmatmul.mubr.bf16.vlgmr.msra.gmra.mrb[0].mxu0 %v8693_v24  ;;  %v7287_v24 = vld [vmem:[#allocation12 + $0x1d0] ss:$8 sps:$4 sm:$0xff]  }
 0x10f   : > { %906 = vmatpush1.bf16.msra.mxu0 %v7174_v60  ;;  %937 = vmatprep.mubr.bf16.mxu0 %v8338_v0  ;;  %v7273_v60 = vld [vmem:[#allocation12 + $0x194] ss:$8 sps:$4 sm:$0xff]  }
 0x110   : > { %907 = vmatprep.subr.bf16.mxu0 %v7179_v61  ;;  %v7275_v61 = vld [vmem:[#allocation12 + $0x190] ss:$8 sps:$4 sm:$0xff]   ;;  %1557 = vmatprep.subr.bf16.mxu1 %v7273_v60  ;;  %v7305_v60 = vld [vmem:[#allocation12 + $0x34] ss:$8 sps:$4 sm:$0xff]  }
 0x111   : > { %1558 = vmatpush1.bf16.msra.mxu1 %v7275_v61  ;;  %v7303_v61 = vld [vmem:[#allocation12 + $0x30] ss:$8 sps:$4 sm:$0xff]  }
 0x112   : > { %1559 = vmatprep.subr.bf16.mxu1 %v7276_v62  ;;  %v7308_v62 = vld [vmem:[#allocation12 + $0x44] ss:$8 sps:$4 sm:$0xff]  }
 0x113   : > { %908 = vmatpush1.bf16.msra.mxu0 %v7177_v63  ;;  %v7278_v63 = vld [vmem:[#allocation12 + $0x1a0] ss:$8 sps:$4 sm:$0xff]  }
 0x114   : > { %909 = vmatprep.subr.bf16.mxu0 %v7182_v2  ;;  %v7281_v2 = vld [vmem:[#allocation12 + $0x1b0] ss:$8 sps:$4 sm:$0xff]  }
 0x115   : > { %1560 = vmatpush1.bf16.msra.mxu1 %v7278_v63  ;;  %v7306_v63 = vld [vmem:[#allocation12 + $0x40] ss:$8 sps:$4 sm:$0xff]  }
 0x116   : > { %1561 = vmatprep.subr.bf16.mxu1 %v7279_v1  ;;  %v7311_v1 = vld [vmem:[#allocation12 + $0x54] ss:$8 sps:$4 sm:$0xff]  }
 0x117   : > { %910 = vmatpush1.bf16.msra.mxu0 %v7180_v5  ;;  %v7285_v5 = vld [vmem:[#allocation12 + $0x1d4] ss:$8 sps:$4 sm:$0xff]  }
 0x118   : > { %911 = vmatprep.subr.bf16.mxu0 %v7185_v7  ;;  %v7290_v7 = vld [vmem:[#allocation12 + $0x1e0] ss:$8 sps:$4 sm:$0xff]  }
 0x119   : > { %1562 = vmatpush1.bf16.msra.mxu1 %v7281_v2  ;;  %v7309_v2 = vld [vmem:[#allocation12 + $0x50] ss:$8 sps:$4 sm:$0xff]  }
 0x11a   : > { %1563 = vmatprep.subr.bf16.mxu1 %v7282_v3  ;;  %v7314_v3 = vld [vmem:[#allocation12 + $0x64] ss:$8 sps:$4 sm:$0xff]  }
 0x11b   : > { %912 = vmatpush1.bf16.msra.mxu0 %v7183_v9  ;;  %v7293_v9 = vld [vmem:[#allocation12 + $0x1f0] ss:$8 sps:$4 sm:$0xff]  }
 0x11c   : > { %913 = vmatprep.subr.bf16.mxu0 %v7188_v11  ;;  %v8714_v11 = vsub.s32 0, %v8685_v12 }
 0x11d   : > { %1564 = vmatpush1.bf16.msra.mxu1 %v7284_v4  ;;  %v7312_v4 = vld [vmem:[#allocation12 + $0x60] ss:$8 sps:$4 sm:$0xff]  }
 0x11e   : > { %1565 = vmatprep.subr.bf16.mxu1 %v7285_v5  ;;  %v7317_v5 = vld [vmem:[#allocation12 + $0x74] ss:$8 sps:$4 sm:$0xff]  }
 0x11f   : > { %914 = vmatpush1.bf16.msra.mxu0 %v7186_v15  ;;  %v8720_v15 = vsub.s32 1, %v8685_v12 }
 0x120   : > { %915 = vmatprep.subr.bf16.mxu0 %v7191_v17  ;;  %v1241_v17 = vrot.slane %v1234_v13, %v8714_v11 }
 0x121   : > { %1566 = vmatpush1.bf16.msra.mxu1 %v7287_v24  ;;  %v1245_v18 = vrot.slane %v1234_v13, %v8720_v15  ;;  %v7315_v24 = vld [vmem:[#allocation12 + $0x70] ss:$8 sps:$4 sm:$0xff]   ;;  %v7324_v13 = vld [vmem:[#allocation12 + $0xa0] ss:$8 sps:$4 sm:$0xff]  }
 0x122   : > { %1567 = vmatprep.subr.bf16.mxu1 %v7288_v6  ;;  %v7320_v6 = vld [vmem:[#allocation12 + $0x84] ss:$8 sps:$4 sm:$0xff]  }
 0x123   : > { %916 = vmatpush1.bf16.msra.mxu0 %v7189_v19  ;;  %v1254_v19 = vrot.slane %v6254_v16, %v8714_v11 }
 0x124   : > { %917 = vmatprep.subr.bf16.mxu0 %v7194_v21  ;;  %v1258_v21 = vrot.slane %v6254_v16, %v8720_v15  ;;  %v7329_v16 = vld [vmem:[#allocation12 + $0xb4] ss:$8 sps:$4 sm:$0xff]  }
 0x125   : > { %1568 = vmatpush1.bf16.msra.mxu1 %v7290_v7  ;;  %v7318_v7 = vld [vmem:[#allocation12 + $0x80] ss:$8 sps:$4 sm:$0xff]  }
 0x126   : > { %1569 = vmatprep.subr.bf16.mxu1 %v7291_v8  ;;  %v7323_v8 = vld [vmem:[#allocation12 + $0x94] ss:$8 sps:$4 sm:$0xff]  }
 0x127   : > { %918 = vmatpush1.bf16.msra.mxu0 %v7192_v23 }
 0x128   : > { %919 = vmatprep.subr.bf16.mxu0 %v7197_v25 }
 0x129   : > { %1570 = vmatpush1.bf16.msra.mxu1 %v7293_v9  ;;  %v7321_v9 = vld [vmem:[#allocation12 + $0x90] ss:$8 sps:$4 sm:$0xff]  }
 0x12a   : > { %1740 = vmatprep.subr.bf16.mxu1 %v7296_v10  ;;  %v7326_v10 = vld [vmem:[#allocation12 + $0xa4] ss:$8 sps:$4 sm:$0xff]  }
 0x12b   : > { %920 = vmatpush1.bf16.msra.mxu0 %v7195_v26 }
 0x12c   : > { %1049 = vmatprep.subr.bf16.mxu0 %v7200_v27 }
 0x12e   : > { %938 = vmatmul.mubr.bf16.vlgmr.msra.gmra.mrb[0].mxu0 %v823_v31  ;;  %v6256_v31 = vld.sshfl [vmem:[#allocation3] sm:$0x33 pattern:$0x76325410] }
 0x12f   : > { %1050 = vmatpush1.bf16.msra.mxu0 %v7198_v28  ;;  %1081 = vmatprep.mubr.bf16.mxu0 %v8338_v0 }
 0x130   : > { %1051 = vmatprep.subr.bf16.mxu0 %v7203_v33 }
 0x133   : > { %1052 = vmatpush1.bf16.msra.mxu0 %v7201_v34 }
 0x134   : > { %1053 = vmatprep.subr.bf16.mxu0 %v7206_v35 }
 0x137   : > { %1054 = vmatpush1.bf16.msra.mxu0 %v7204_v36 }
 0x138   : > { %1055 = vmatprep.subr.bf16.mxu0 %v7209_v37 }
 0x13b   : > { %1056 = vmatpush1.bf16.msra.mxu0 %v7207_v38  ;;  %v1289_v38 = vcombine.high %v6256_v31, %v6256_v31 }
 0x13c   : > { %1057 = vmatprep.subr.bf16.mxu0 %v7212_v39 }
 0x13f   : > { %1058 = vmatpush1.bf16.msra.mxu0 %v7210_v40 }
 0x140   : > { %1059 = vmatprep.subr.bf16.mxu0 %v7215_v41 }
 0x143   : > { %1060 = vmatpush1.bf16.msra.mxu0 %v7213_v42 }
 0x144   : > { %1061 = vmatprep.subr.bf16.mxu0 %v7218_v43 }
 0x147   : > { %1062 = vmatpush1.bf16.msra.mxu0 %v7216_v44 }
 0x148   : > { %1063 = vmatprep.subr.bf16.mxu0 %v7221_v45 }
 0x14b   : > { %1064 = vmatpush1.bf16.msra.mxu0 %v7219_v46 }
 0x14c   : > { %1191 = vmatprep.subr.bf16.mxu0 %v7224_v47 }
 0x14e   : > { %1082 = vmatmul.mubr.bf16.vlgmr.msra.gmra.mrb[0].mxu0 %v967_v32  ;;  %v7245_v32 = vld [vmem:[#allocation10 + $0x274] ss:$8 sps:$4 sm:$0xff]  }
 0x14f   : > { %1192 = vmatpush1.bf16.msra.mxu0 %v7222_v48  ;;  %1223 = vmatprep.mubr.bf16.mxu0 %v8338_v0  ;;  %v7243_v0 = vld [vmem:[#allocation10 + $0x270] ss:$8 sps:$4 sm:$0xff]  }
 0x150   : > { %1193 = vmatprep.subr.bf16.mxu0 %v7227_v49 }
 0x153   : > { %1194 = vmatpush1.bf16.msra.mxu0 %v7225_v50 }
 0x154   : > { %1195 = vmatprep.subr.bf16.mxu0 %v7230_v51 }
 0x157   : > { %1196 = vmatpush1.bf16.msra.mxu0 %v7228_v52 }
 0x158   : > { %1197 = vmatprep.subr.bf16.mxu0 %v7233_v53 }
 0x15b   : > { %1198 = vmatpush1.bf16.msra.mxu0 %v7231_v54 }
 0x15c   : > { %1199 = vmatprep.subr.bf16.mxu0 %v7236_v55 }
 0x15f   : > { %1200 = vmatpush1.bf16.msra.mxu0 %v7234_v56 }
 0x160   : > { %1201 = vmatprep.subr.bf16.mxu0 %v7239_v57  ;;  %v7294_v57 = vld [vmem:[#allocation12] ss:$8 sps:$4 sm:$0xff]  }
 0x163   : > { %1202 = vmatpush1.bf16.msra.mxu0 %v7237_v58 }
 0x164   : > { %1203 = vmatprep.subr.bf16.mxu0 %v7242_v29 }
 0x167   : > { %1204 = vmatpush1.bf16.msra.mxu0 %v7240_v30  ;;  %v7299_v30 = vld [vmem:[#allocation12 + $0x14] ss:$8 sps:$4 sm:$0xff]  }
 0x168   : > { %1205 = vmatprep.subr.bf16.mxu0 %v7245_v32  ;;  %v7297_v32 = vld [vmem:[#allocation12 + $0x10] ss:$8 sps:$4 sm:$0xff]  }
 0x16b   : > { %1206 = vmatpush1.bf16.msra.mxu0 %v7243_v0  ;;  %v7302_v0 = vld [vmem:[#allocation12 + $0x24] ss:$8 sps:$4 sm:$0xff]  }
 0x16e   : > { %1224 = vmatmul.mubr.bf16.vlgmr.msra.gmra.mrb[0].mxu0 %v1109_v59  ;;  %v7300_v59 = vld [vmem:[#allocation12 + $0x20] ss:$8 sps:$4 sm:$0xff]  }
 0x241   : > { %v1225_v20 = vpop.f32.mrb[0].mxu0 }
 0x242   : > { %v1248_v22 = vmul.f32 %v1241_v17, %v1225_v20  ;;  %v1227_v23 = vpop.f32.mrb[1].mxu0  ;;  %v7327_v17 = vld [vmem:[#allocation12 + $0xb0] ss:$8 sps:$4 sm:$0xff]   ;;  %v7335_v20 = vld [vmem:[#allocation12 + $0xd4] ss:$8 sps:$4 sm:$0xff]  }
 0x243   : > { %v1249_v25 = vmul.f32 %v1245_v18, %v1227_v23  ;;  %v1229_v26 = vpop.f32.mrb[2].mxu0  ;;  %v7332_v18 = vld [vmem:[#allocation12 + $0xc4] ss:$8 sps:$4 sm:$0xff]   ;;  %v7336_v23 = vld [vmem:[#allocation12 + $0xe0] ss:$8 sps:$4 sm:$0xff]  }
 0x244   : > { %v1261_v27 = vadd.f32 %v1254_v19, %v1248_v22  ;;  %v1230_v12 = vpop.f32.mrb[3].mxu0  ;;  %v7330_v19 = vld [vmem:[#allocation12 + $0xc0] ss:$8 sps:$4 sm:$0xff]   ;;  %v7338_v22 = vld [vmem:[#allocation12 + $0xe4] ss:$8 sps:$4 sm:$0xff]  }
 0x245   : > { %v1262_v28 = vadd.f32 %v1258_v21, %v1249_v25  ;;  %v7333_v21 = vld [vmem:[#allocation12 + $0xd0] ss:$8 sps:$4 sm:$0xff]   ;;  %v7341_v25 = vld [vmem:[#allocation12 + $0xf4] ss:$8 sps:$4 sm:$0xff]   ;;  %v7342_v12 = vld [vmem:[#allocation12 + $0x200] ss:$8 sps:$4 sm:$0xff]  }
 0x246   : > { %8046 = vtanh.f32 %v1261_v27  ;;  %v7339_v26 = vld [vmem:[#allocation12 + $0xf0] ss:$8 sps:$4 sm:$0xff]   ;;  %v7344_v27 = vld [vmem:[#allocation12 + $0x204] ss:$8 sps:$4 sm:$0xff]  }
 0x247   : > { %8048 = vtanh.f32 %v1262_v28  ;;  %v7347_v28 = vld [vmem:[#allocation12 + $0x214] ss:$8 sps:$4 sm:$0xff]  }
 0x250   : > { %v8047_v33 = vpop.eup %8046 }
 0x251   : > { %v8049_v34 = vpop.eup %8048  ;;  %v1265_v35 = vpack.c.bf16 %v8047_v33, %v8047_v33 }
 0x252   : > { %v6255_v36 = vpack.c.bf16 %v8049_v34, %v8047_v33  ;;  %v1266_v37 = vpack.c.bf16 %v8049_v34, %v8049_v34  ;;  %v7345_v33 = vld [vmem:[#allocation12 + $0x210] ss:$8 sps:$4 sm:$0xff]   ;;  %v7350_v34 = vld [vmem:[#allocation12 + $0x224] ss:$8 sps:$4 sm:$0xff]  }
 0x253   : > { %v1290_v39 = vrot.slane %v1265_v35, 6  ;;  %v7348_v35 = vld [vmem:[#allocation12 + $0x220] ss:$8 sps:$4 sm:$0xff]  }
 0x254   : > { %v1277_v40 = vrot.slane %v6255_v36, %v8688_v14  ;;  %v1291_v41 = vrot.slane %v1266_v37, 6  ;;  %v7353_v36 = vld [vmem:[#allocation12 + $0x234] ss:$8 sps:$4 sm:$0xff]   ;;  %v7351_v37 = vld [vmem:[#allocation12 + $0x230] ss:$8 sps:$4 sm:$0xff]  }
 0x255   : > { %v8731_v42 = vsel %vm518_vm0, %v6256_v31, %v1290_v39  ;;  %v7354_v39 = vld [vmem:[#allocation12 + $0x240] ss:$8 sps:$4 sm:$0xff]  }
 0x256   : > { %v1278_v43 = vcombine.high %v1277_v40, %v1277_v40  ;;  %v8734_v44 = vsel %vm518_vm0, %v1289_v38, %v1291_v41  ;;  %v1365_v45 = vshrl.u32 %v8731_v42, 16  ;;  %v1367_v46 = vshll.u32 %v8731_v42, 16  ;;  %v7356_v38 = vld [vmem:[#allocation12 + $0x244] ss:$8 sps:$4 sm:$0xff]   ;;  %v7359_v40 = vld [vmem:[#allocation12 + $0x254] ss:$8 sps:$4 sm:$0xff]  }
 0x257   : > { %v1371_v47 = vshrl.u32 %v8734_v44, 16  ;;  %v1373_v48 = vshll.u32 %v8734_v44, 16  ;;  %v1817_v31 = vrot.slane %v8734_v44, 1  ;;  %v7357_v41 = vld [vmem:[#allocation12 + $0x250] ss:$8 sps:$4 sm:$0xff]  }
 0x258   : > { %1280 = vst [vmem:[#allocation3] sm:$0xf] %v1278_v43  ;;  %v1369_v49 = vrot.slane %v1367_v46, 1  ;;  %v8740_v50 = vrot.slane %v1365_v45, 1  ;;  %v8742_v51 = vrot.slane %v1367_v46, 2 }
 0x259   : > { %v1375_v52 = vrot.slane %v1373_v48, 1  ;;  %v8744_v53 = vrot.slane %v1371_v47, 1  ;;  %v8746_v54 = vrot.slane %v1373_v48, 2  ;;  %v7362_v43 = vld [vmem:[#allocation12 + $0x264] ss:$8 sps:$4 sm:$0xff]  }
 0x25a   : > { %v2058_v55 = vor.u32 %v8742_v51, %v8740_v50  ;;  %v1370_v29 = vor.u32 %v1369_v49, %v1365_v45  ;;  %v7360_v45 = vld [vmem:[#allocation12 + $0x260] ss:$8 sps:$4 sm:$0xff]   ;;  %v7365_v46 = vld [vmem:[#allocation12 + $0x274] ss:$8 sps:$4 sm:$0xff]   ;;  %v7368_v48 = vld [vmem:[#allocation12 + $0x284] ss:$8 sps:$4 sm:$0xff]  }
 0x25b   : > { %v1376_v56 = vor.u32 %v1375_v52, %v1371_v47  ;;  %v2061_v58 = vor.u32 %v8746_v54, %v8744_v53  ;;  %v7363_v47 = vld [vmem:[#allocation12 + $0x270] ss:$8 sps:$4 sm:$0xff]   ;;  %v7366_v49 = vld [vmem:[#allocation12 + $0x280] ss:$8 sps:$4 sm:$0xff]   ;;  %v7371_v52 = vld [vmem:[#allocation12 + $0x294] ss:$8 sps:$4 sm:$0xff]  }
 0x25c   : > { %v7399_v53 = vld [vmem:[#allocation12 + $0x330] ss:$8 sps:$4 sm:$0xff]   ;;  %v7404_v54 = vld [vmem:[#allocation12 + $0x344] ss:$8 sps:$4 sm:$0xff]  }
 0x25d   : > { %1571 = vmatprep.mubr.bf16.mxu1 %v1376_v56  ;;  %v7369_v56 = vld [vmem:[#allocation12 + $0x290] ss:$8 sps:$4 sm:$0xff]   ;;  %v7458_v51 = vld [vmem:[#allocation12 + $0x464] ss:$8 sps:$4 sm:$0xff]  }
 0x25e   : > { %1572 = vmatmul.mubr.bf16.vlgmr.msra.gmra.mrb[0].mxu1 %v1370_v29  ;;  %v7372_v29 = vld [vmem:[#allocation12 + $0x2a0] ss:$8 sps:$4 sm:$0xff]   ;;  %v7453_v50 = vld [vmem:[#allocation12 + $0x450] ss:$8 sps:$4 sm:$0xff]  }
 0x25f   : > { %1741 = vmatpush1.bf16.msra.mxu1 %v7294_v57  ;;  %1772 = vmatprep.mubr.bf16.mxu1 %v8734_v44  ;;  %v7374_v57 = vld [vmem:[#allocation12 + $0x2a4] ss:$8 sps:$4 sm:$0xff]  }
 0x260   : > { %1742 = vmatprep.subr.bf16.mxu1 %v7299_v30  ;;  %v7377_v30 = vld [vmem:[#allocation12 + $0x2b4] ss:$8 sps:$4 sm:$0xff]  }
 0x263   : > { %1743 = vmatpush1.bf16.msra.mxu1 %v7297_v32  ;;  %v7375_v32 = vld [vmem:[#allocation12 + $0x2b0] ss:$8 sps:$4 sm:$0xff]  }
 0x264   : > { %1744 = vmatprep.subr.bf16.mxu1 %v7302_v0  ;;  %v7380_v0 = vld [vmem:[#allocation12 + $0x2c4] ss:$8 sps:$4 sm:$0xff]  }
 0x267   : > { %1745 = vmatpush1.bf16.msra.mxu1 %v7300_v59  ;;  %v7378_v59 = vld [vmem:[#allocation12 + $0x2c0] ss:$8 sps:$4 sm:$0xff]  }
 0x268   : > { %1746 = vmatprep.subr.bf16.mxu1 %v7305_v60  ;;  %v7383_v60 = vld [vmem:[#allocation12 + $0x2d4] ss:$8 sps:$4 sm:$0xff]  }
 0x26b   : > { %1747 = vmatpush1.bf16.msra.mxu1 %v7303_v61  ;;  %v7381_v61 = vld [vmem:[#allocation12 + $0x2d0] ss:$8 sps:$4 sm:$0xff]  }
 0x26c   : > { %1748 = vmatprep.subr.bf16.mxu1 %v7308_v62  ;;  %v7386_v62 = vld [vmem:[#allocation12 + $0x2e4] ss:$8 sps:$4 sm:$0xff]  }
 0x26f   : > { %1749 = vmatpush1.bf16.msra.mxu1 %v7306_v63  ;;  %v7384_v63 = vld [vmem:[#allocation12 + $0x2e0] ss:$8 sps:$4 sm:$0xff]  }
 0x270   : > { %1750 = vmatprep.subr.bf16.mxu1 %v7311_v1  ;;  %v7389_v1 = vld [vmem:[#allocation12 + $0x2f4] ss:$8 sps:$4 sm:$0xff]  }
 0x273   : > { %1751 = vmatpush1.bf16.msra.mxu1 %v7309_v2  ;;  %v7387_v2 = vld [vmem:[#allocation12 + $0x2f0] ss:$8 sps:$4 sm:$0xff]  }
 0x274   : > { %1752 = vmatprep.subr.bf16.mxu1 %v7314_v3  ;;  %v7392_v3 = vld [vmem:[#allocation12 + $0x304] ss:$8 sps:$4 sm:$0xff]  }
 0x277   : > { %1753 = vmatpush1.bf16.msra.mxu1 %v7312_v4  ;;  %v7390_v4 = vld [vmem:[#allocation12 + $0x300] ss:$8 sps:$4 sm:$0xff]  }
 0x278   : > { %1754 = vmatprep.subr.bf16.mxu1 %v7317_v5  ;;  %v1816_v5 = vrot.slane %v8731_v42, 1 }
 0x27b   : > { %1755 = vmatpush1.bf16.msra.mxu1 %v7315_v24  ;;  %v7395_v24 = vld [vmem:[#allocation12 + $0x314] ss:$8 sps:$4 sm:$0xff]  }
 0x27c   : > { %1756 = vmatprep.subr.bf16.mxu1 %v7320_v6  ;;  %v7486_v6 = vld [vmem:[#allocation13 + $0x100] ss:$8 sps:$4 sm:$0xff]  }
 0x27f   : > { %1757 = vmatpush1.bf16.msra.mxu1 %v7318_v7  ;;  %v7488_v7 = vld [vmem:[#allocation13 + $0x104] ss:$8 sps:$4 sm:$0xff]  }
 0x280   : > { %1758 = vmatprep.subr.bf16.mxu1 %v7323_v8  ;;  %v7393_v8 = vld [vmem:[#allocation12 + $0x310] ss:$8 sps:$4 sm:$0xff]   ;;  %2812 = vmatprep.subr.bf16.mxu0 %v7488_v7  ;;  %v7450_v7 = vld [vmem:[#allocation12 + $0x440] ss:$8 sps:$4 sm:$0xff]  }
 0x281   : > { %2813 = vmatpush1.bf16.msra.mxu0 %v7486_v6  ;;  %v7452_v6 = vld [vmem:[#allocation12 + $0x444] ss:$8 sps:$4 sm:$0xff]  }
 0x283   : > { %1759 = vmatpush1.bf16.msra.mxu1 %v7321_v9  ;;  %v7491_v9 = vld [vmem:[#allocation13 + $0x114] ss:$8 sps:$4 sm:$0xff]  }
 0x284   : > { %1760 = vmatprep.subr.bf16.mxu1 %v7326_v10  ;;  %v7398_v10 = vld [vmem:[#allocation12 + $0x324] ss:$8 sps:$4 sm:$0xff]   ;;  %2814 = vmatprep.subr.bf16.mxu0 %v7491_v9  ;;  %v7459_v9 = vld [vmem:[#allocation12 + $0x470] ss:$8 sps:$4 sm:$0xff]  }
 0x287   : > { %1761 = vmatpush1.bf16.msra.mxu1 %v7324_v13  ;;  %v7489_v13 = vld [vmem:[#allocation13 + $0x110] ss:$8 sps:$4 sm:$0xff]  }
 0x288   : > { %1762 = vmatprep.subr.bf16.mxu1 %v7329_v16  ;;  %v7494_v16 = vld [vmem:[#allocation13 + $0x124] ss:$8 sps:$4 sm:$0xff]   ;;  %2815 = vmatpush1.bf16.msra.mxu0 %v7489_v13  ;;  %v7462_v13 = vld [vmem:[#allocation12 + $0x480] ss:$8 sps:$4 sm:$0xff]  }
 0x289   : > { %2816 = vmatprep.subr.bf16.mxu0 %v7494_v16  ;;  %v7467_v16 = vld [vmem:[#allocation12 + $0x494] ss:$8 sps:$4 sm:$0xff]  }
 0x28b   : > { %1763 = vmatpush1.bf16.msra.mxu1 %v7327_v17  ;;  %v7396_v17 = vld [vmem:[#allocation12 + $0x320] ss:$8 sps:$4 sm:$0xff]  }
 0x28c   : > { %1764 = vmatprep.subr.bf16.mxu1 %v7332_v18  ;;  %v7401_v18 = vld [vmem:[#allocation12 + $0x334] ss:$8 sps:$4 sm:$0xff]  }
 0x28f   : > { %1765 = vmatpush1.bf16.msra.mxu1 %v7330_v19  ;;  %v7492_v19 = vld [vmem:[#allocation13 + $0x120] ss:$8 sps:$4 sm:$0xff]  }
 0x290   : > { %1766 = vmatprep.subr.bf16.mxu1 %v7335_v20  ;;  %v7497_v20 = vld [vmem:[#allocation13 + $0x134] ss:$8 sps:$4 sm:$0xff]   ;;  %2817 = vmatpush1.bf16.msra.mxu0 %v7492_v19  ;;  %v7468_v19 = vld [vmem:[#allocation12 + $0x4a0] ss:$8 sps:$4 sm:$0xff]  }
 0x291   : > { %2818 = vmatprep.subr.bf16.mxu0 %v7497_v20  ;;  %v7473_v20 = vld [vmem:[#allocation12 + $0x4b4] ss:$8 sps:$4 sm:$0xff]  }
 0x293   : > { %1767 = vmatpush1.bf16.msra.mxu1 %v7333_v21  ;;  %v7500_v21 = vld [vmem:[#allocation13 + $0x144] ss:$8 sps:$4 sm:$0xff]  }
 0x294   : > { %1768 = vmatprep.subr.bf16.mxu1 %v7338_v22  ;;  %v7402_v22 = vld [vmem:[#allocation12 + $0x340] ss:$8 sps:$4 sm:$0xff]  }
 0x297   : > { %1769 = vmatpush1.bf16.msra.mxu1 %v7336_v23  ;;  %v7407_v23 = vld [vmem:[#allocation12 + $0x354] ss:$8 sps:$4 sm:$0xff]  }
 0x298   : > { %1770 = vmatprep.subr.bf16.mxu1 %v7341_v25  ;;  %v7498_v25 = vld [vmem:[#allocation13 + $0x140] ss:$8 sps:$4 sm:$0xff]  }
 0x29b   : > { %1771 = vmatpush1.bf16.msra.mxu1 %v7339_v26  ;;  %v7503_v26 = vld [vmem:[#allocation13 + $0x154] ss:$8 sps:$4 sm:$0xff]  }
 0x29c   : > { %1980 = vmatprep.subr.bf16.mxu1 %v7344_v27  ;;  %v7405_v27 = vld [vmem:[#allocation12 + $0x350] ss:$8 sps:$4 sm:$0xff]  }
 0x29e   : > { %1773 = vmatmul.mubr.bf16.vlgmr.msra.gmra.mrb[0].mxu1 %v8731_v42 }
 0x29f   : > { %1981 = vmatpush1.bf16.msra.mxu1 %v7342_v12  ;;  %2012 = vmatprep.mubr.bf16.mxu1 %v1817_v31  ;;  %v7410_v12 = vld [vmem:[#allocation12 + $0x364] ss:$8 sps:$4 sm:$0xff]  }
 0x2a0   : > { %1982 = vmatprep.subr.bf16.mxu1 %v7347_v28  ;;  %v7501_v28 = vld [vmem:[#allocation13 + $0x150] ss:$8 sps:$4 sm:$0xff]   ;;  %v7506_v31 = vld [vmem:[#allocation13 + $0x164] ss:$8 sps:$4 sm:$0xff]  }
 0x2a3   : > { %1983 = vmatpush1.bf16.msra.mxu1 %v7345_v33  ;;  %v7408_v33 = vld [vmem:[#allocation12 + $0x360] ss:$8 sps:$4 sm:$0xff]  }
 0x2a4   : > { %1984 = vmatprep.subr.bf16.mxu1 %v7350_v34  ;;  %v7413_v34 = vld [vmem:[#allocation12 + $0x374] ss:$8 sps:$4 sm:$0xff]  }
 0x2a7   : > { %1985 = vmatpush1.bf16.msra.mxu1 %v7348_v35  ;;  %v7504_v35 = vld [vmem:[#allocation13 + $0x160] ss:$8 sps:$4 sm:$0xff]  }
 0x2a8   : > { %1986 = vmatprep.subr.bf16.mxu1 %v7353_v36  ;;  %v7509_v36 = vld [vmem:[#allocation13 + $0x174] ss:$8 sps:$4 sm:$0xff]  }
 0x2ab   : > { %1987 = vmatpush1.bf16.msra.mxu1 %v7351_v37  ;;  %v7411_v37 = vld [vmem:[#allocation12 + $0x370] ss:$8 sps:$4 sm:$0xff]  }
 0x2ac   : > { %1988 = vmatprep.subr.bf16.mxu1 %v7356_v38  ;;  %v7416_v38 = vld [vmem:[#allocation12 + $0x384] ss:$8 sps:$4 sm:$0xff]  }
 0x2af   : > { %1989 = vmatpush1.bf16.msra.mxu1 %v7354_v39  ;;  %v7507_v39 = vld [vmem:[#allocation13 + $0x170] ss:$8 sps:$4 sm:$0xff]  }
 0x2b0   : > { %1990 = vmatprep.subr.bf16.mxu1 %v7359_v40  ;;  %v7512_v40 = vld [vmem:[#allocation13 + $0x184] ss:$8 sps:$4 sm:$0xff]  }
 0x2b3   : > { %1991 = vmatpush1.bf16.msra.mxu1 %v7357_v41  ;;  %v7414_v41 = vld [vmem:[#allocation12 + $0x380] ss:$8 sps:$4 sm:$0xff]  }
 0x2b4   : > { %1992 = vmatprep.subr.bf16.mxu1 %v7362_v43  ;;  %v7419_v43 = vld [vmem:[#allocation12 + $0x394] ss:$8 sps:$4 sm:$0xff]  }
 0x2b7   : > { %1993 = vmatpush1.bf16.msra.mxu1 %v7360_v45  ;;  %v7510_v45 = vld [vmem:[#allocation13 + $0x180] ss:$8 sps:$4 sm:$0xff]  }
 0x2b8   : > { %1994 = vmatprep.subr.bf16.mxu1 %v7365_v46  ;;  %v7417_v46 = vld [vmem:[#allocation12 + $0x390] ss:$8 sps:$4 sm:$0xff]  }
 0x2bb   : > { %1995 = vmatpush1.bf16.msra.mxu1 %v7363_v47  ;;  %v7422_v47 = vld [vmem:[#allocation12 + $0x3a4] ss:$8 sps:$4 sm:$0xff]  }
 0x2bc   : > { %1996 = vmatprep.subr.bf16.mxu1 %v7368_v48  ;;  %v7420_v48 = vld [vmem:[#allocation12 + $0x3a0] ss:$8 sps:$4 sm:$0xff]  }
 0x2bf   : > { %1997 = vmatpush1.bf16.msra.mxu1 %v7366_v49  ;;  %v7425_v49 = vld [vmem:[#allocation12 + $0x3b4] ss:$8 sps:$4 sm:$0xff]  }
 0x2c0   : > { %1998 = vmatprep.subr.bf16.mxu1 %v7371_v52  ;;  %v7423_v52 = vld [vmem:[#allocation12 + $0x3b0] ss:$8 sps:$4 sm:$0xff]  }
 0x2c3   : > { %1999 = vmatpush1.bf16.msra.mxu1 %v7369_v56  ;;  %v7428_v56 = vld [vmem:[#allocation12 + $0x3c4] ss:$8 sps:$4 sm:$0xff]  }
 0x2c4   : > { %2000 = vmatprep.subr.bf16.mxu1 %v7374_v57  ;;  %v7426_v57 = vld [vmem:[#allocation12 + $0x3c0] ss:$8 sps:$4 sm:$0xff]  }
 0x2c7   : > { %2001 = vmatpush1.bf16.msra.mxu1 %v7372_v29  ;;  %v7431_v29 = vld [vmem:[#allocation12 + $0x3d4] ss:$8 sps:$4 sm:$0xff]  }
 0x2c8   : > { %2002 = vmatprep.subr.bf16.mxu1 %v7377_v30  ;;  %v7429_v30 = vld [vmem:[#allocation12 + $0x3d0] ss:$8 sps:$4 sm:$0xff]  }
 0x2cb   : > { %2003 = vmatpush1.bf16.msra.mxu1 %v7375_v32  ;;  %v7434_v32 = vld [vmem:[#allocation12 + $0x3e4] ss:$8 sps:$4 sm:$0xff]  }
 0x2cc   : > { %2004 = vmatprep.subr.bf16.mxu1 %v7380_v0  ;;  %v7432_v0 = vld [vmem:[#allocation12 + $0x3e0] ss:$8 sps:$4 sm:$0xff]  }
 0x2cf   : > { %2005 = vmatpush1.bf16.msra.mxu1 %v7378_v59  ;;  %v7437_v59 = vld [vmem:[#allocation12 + $0x3f4] ss:$8 sps:$4 sm:$0xff]  }
 0x2d0   : > { %2006 = vmatprep.subr.bf16.mxu1 %v7383_v60  ;;  %v7435_v60 = vld [vmem:[#allocation12 + $0x3f0] ss:$8 sps:$4 sm:$0xff]  }
 0x2d3   : > { %2007 = vmatpush1.bf16.msra.mxu1 %v7381_v61  ;;  %v7440_v61 = vld [vmem:[#allocation12 + $0x404] ss:$8 sps:$4 sm:$0xff]  }
 0x2d4   : > { %2008 = vmatprep.subr.bf16.mxu1 %v7386_v62  ;;  %v7438_v62 = vld [vmem:[#allocation12 + $0x400] ss:$8 sps:$4 sm:$0xff]  }
 0x2d7   : > { %2009 = vmatpush1.bf16.msra.mxu1 %v7384_v63  ;;  %v7443_v63 = vld [vmem:[#allocation12 + $0x414] ss:$8 sps:$4 sm:$0xff]  }
 0x2d8   : > { %2010 = vmatprep.subr.bf16.mxu1 %v7389_v1  ;;  %v2301_v1 = vrot.slane %v8734_v44, 2  ;;  %v7455_v44 = vld [vmem:[#allocation12 + $0x454] ss:$8 sps:$4 sm:$0xff]  }
 0x2db   : > { %2011 = vmatpush1.bf16.msra.mxu1 %v7387_v2  ;;  %v7441_v2 = vld [vmem:[#allocation12 + $0x410] ss:$8 sps:$4 sm:$0xff]  }
 0x2dc   : > { %2224 = vmatprep.subr.bf16.mxu1 %v7392_v3  ;;  %v7446_v3 = vld [vmem:[#allocation12 + $0x424] ss:$8 sps:$4 sm:$0xff]  }
 0x2de   : > { %2013 = vmatmul.mubr.bf16.vlgmr.msra.gmra.mrb[0].mxu1 %v1816_v5  ;;  %v7449_v5 = vld [vmem:[#allocation12 + $0x434] ss:$8 sps:$4 sm:$0xff]  }
 0x2df   : > { %2225 = vmatpush1.bf16.msra.mxu1 %v7390_v4  ;;  %2256 = vmatprep.mubr.bf16.mxu1 %v2061_v58  ;;  %v7495_v58 = vld [vmem:[#allocation13 + $0x130] ss:$8 sps:$4 sm:$0xff]   ;;  %v7444_v4 = vld [vmem:[#allocation12 + $0x420] ss:$8 sps:$4 sm:$0xff]  }
 0x2e0   : > { %2226 = vmatprep.subr.bf16.mxu1 %v7395_v24  ;;  %2819 = vmatpush1.bf16.msra.mxu0 %v7495_v58  ;;  %v7447_v24 = vld [vmem:[#allocation12 + $0x430] ss:$8 sps:$4 sm:$0xff]   ;;  %v7474_v58 = vld [vmem:[#allocation12 + $0x4c0] ss:$8 sps:$4 sm:$0xff]  }
 0x2e1   : > { %2820 = vmatprep.subr.bf16.mxu0 %v7500_v21  ;;  %v7479_v21 = vld [vmem:[#allocation12 + $0x4d4] ss:$8 sps:$4 sm:$0xff]  }
 0x2e3   : > { %2227 = vmatpush1.bf16.msra.mxu1 %v7393_v8  ;;  %v7461_v8 = vld [vmem:[#allocation12 + $0x474] ss:$8 sps:$4 sm:$0xff]  }
 0x2e4   : > { %2228 = vmatprep.subr.bf16.mxu1 %v7398_v10  ;;  %2821 = vmatpush1.bf16.msra.mxu0 %v7498_v25  ;;  %v7464_v10 = vld [vmem:[#allocation12 + $0x484] ss:$8 sps:$4 sm:$0xff]   ;;  %v7480_v25 = vld [vmem:[#allocation12 + $0x4e0] ss:$8 sps:$4 sm:$0xff]  }
 0x2e5   : > { %2822 = vmatprep.subr.bf16.mxu0 %v7503_v26  ;;  %v7485_v26 = vld [vmem:[#allocation12 + $0x4f4] ss:$8 sps:$4 sm:$0xff]  }
 0x2e7   : > { %2229 = vmatpush1.bf16.msra.mxu1 %v7396_v17  ;;  %v7465_v17 = vld [vmem:[#allocation12 + $0x490] ss:$8 sps:$4 sm:$0xff]  }
 0x2e8   : > { %2230 = vmatprep.subr.bf16.mxu1 %v7401_v18  ;;  %2823 = vmatpush1.bf16.msra.mxu0 %v7501_v28  ;;  %v7470_v18 = vld [vmem:[#allocation12 + $0x4a4] ss:$8 sps:$4 sm:$0xff]   ;;  %v7513_v28 = vld [vmem:[#allocation13 + $0x190] ss:$8 sps:$4 sm:$0xff]  }
 0x2e9   : > { %2824 = vmatprep.subr.bf16.mxu0 %v7506_v31  ;;  %v7515_v31 = vld [vmem:[#allocation13 + $0x194] ss:$8 sps:$4 sm:$0xff]  }
 0x2eb   : > { %2231 = vmatpush1.bf16.msra.mxu1 %v7399_v53  ;;  %v7471_v53 = vld [vmem:[#allocation12 + $0x4b0] ss:$8 sps:$4 sm:$0xff]  }
 0x2ec   : > { %2232 = vmatprep.subr.bf16.mxu1 %v7404_v54  ;;  %2825 = vmatpush1.bf16.msra.mxu0 %v7504_v35  ;;  %v7476_v54 = vld [vmem:[#allocation12 + $0x4c4] ss:$8 sps:$4 sm:$0xff]   ;;  %v7521_v35 = vld [vmem:[#allocation13 + $0x1b4] ss:$8 sps:$4 sm:$0xff]  }
 0x2ed   : > { %2826 = vmatprep.subr.bf16.mxu0 %v7509_v36  ;;  %v7519_v36 = vld [vmem:[#allocation13 + $0x1b0] ss:$8 sps:$4 sm:$0xff]  }
 0x2ef   : > { %2233 = vmatpush1.bf16.msra.mxu1 %v7402_v22  ;;  %v7477_v22 = vld [vmem:[#allocation12 + $0x4d0] ss:$8 sps:$4 sm:$0xff]  }
 0x2f0   : > { %2234 = vmatprep.subr.bf16.mxu1 %v7407_v23  ;;  %2827 = vmatpush1.bf16.msra.mxu0 %v7507_v39  ;;  %v7482_v23 = vld [vmem:[#allocation12 + $0x4e4] ss:$8 sps:$4 sm:$0xff]   ;;  %v7527_v39 = vld [vmem:[#allocation13 + $0x1d4] ss:$8 sps:$4 sm:$0xff]  }
 0x2f1   : > { %2828 = vmatprep.subr.bf16.mxu0 %v7512_v40  ;;  %v7525_v40 = vld [vmem:[#allocation13 + $0x1d0] ss:$8 sps:$4 sm:$0xff]  }
 0x2f3   : > { %2235 = vmatpush1.bf16.msra.mxu1 %v7405_v27  ;;  %v7483_v27 = vld [vmem:[#allocation12 + $0x4f0] ss:$8 sps:$4 sm:$0xff]  }
 0x2f4   : > { %2236 = vmatprep.subr.bf16.mxu1 %v7410_v12  ;;  %2829 = vmatpush1.bf16.msra.mxu0 %v7510_v45  ;;  %v2300_v12 = vrot.slane %v8731_v42, 2  ;;  %v7530_v42 = vld [vmem:[#allocation13 + $0x1e4] ss:$8 sps:$4 sm:$0xff]   ;;  %v7531_v45 = vld [vmem:[#allocation13 + $0x1f0] ss:$8 sps:$4 sm:$0xff]  }
 0x2f5   : > { %2830 = vmatprep.subr.bf16.mxu0 %v7515_v31  ;;  %v7543_v31 = vld [vmem:[#allocation13 + $0x30] ss:$8 sps:$4 sm:$0xff]  }
 0x2f7   : > { %2237 = vmatpush1.bf16.msra.mxu1 %v7408_v33  ;;  %v7518_v33 = vld [vmem:[#allocation13 + $0x1a4] ss:$8 sps:$4 sm:$0xff]  }
 0x2f8   : > { %2238 = vmatprep.subr.bf16.mxu1 %v7413_v34  ;;  %2831 = vmatpush1.bf16.msra.mxu0 %v7513_v28  ;;  %v7516_v34 = vld [vmem:[#allocation13 + $0x1a0] ss:$8 sps:$4 sm:$0xff]   ;;  %v7545_v28 = vld [vmem:[#allocation13 + $0x34] ss:$8 sps:$4 sm:$0xff]  }
 0x2f9   : > { %2832 = vmatprep.subr.bf16.mxu0 %v7518_v33  ;;  %v7548_v33 = vld [vmem:[#allocation13 + $0x44] ss:$8 sps:$4 sm:$0xff]  }
 0x2fb   : > { %2239 = vmatpush1.bf16.msra.mxu1 %v7411_v37  ;;  %v7524_v37 = vld [vmem:[#allocation13 + $0x1c4] ss:$8 sps:$4 sm:$0xff]  }
 0x2fc   : > { %2240 = vmatprep.subr.bf16.mxu1 %v7416_v38  ;;  %2833 = vmatpush1.bf16.msra.mxu0 %v7516_v34  ;;  %v7522_v38 = vld [vmem:[#allocation13 + $0x1c0] ss:$8 sps:$4 sm:$0xff]  }
 0x2fd   : > { %2834 = vmatprep.subr.bf16.mxu0 %v7521_v35  ;;  %v7546_v34 = vld [vmem:[#allocation13 + $0x40] ss:$8 sps:$4 sm:$0xff]   ;;  %v7551_v35 = vld [vmem:[#allocation13 + $0x54] ss:$8 sps:$4 sm:$0xff]  }
 0x2ff   : > { %2241 = vmatpush1.bf16.msra.mxu1 %v7414_v41  ;;  %v7528_v41 = vld [vmem:[#allocation13 + $0x1e0] ss:$8 sps:$4 sm:$0xff]  }
 0x300   : > { %2242 = vmatprep.subr.bf16.mxu1 %v7419_v43  ;;  %2835 = vmatpush1.bf16.msra.mxu0 %v7519_v36  ;;  %v7533_v43 = vld [vmem:[#allocation13 + $0x1f4] ss:$8 sps:$4 sm:$0xff]   ;;  %v7549_v36 = vld [vmem:[#allocation13 + $0x50] ss:$8 sps:$4 sm:$0xff]  }
 0x301   : > { %2836 = vmatprep.subr.bf16.mxu0 %v7524_v37  ;;  %v7554_v37 = vld [vmem:[#allocation13 + $0x64] ss:$8 sps:$4 sm:$0xff]  }
 0x303   : > { %2243 = vmatpush1.bf16.msra.mxu1 %v7417_v46  ;;  %v7536_v46 = vld [vmem:[#allocation13 + $0x4] ss:$8 sps:$4 sm:$0xff]  }
 0x304   : > { %2244 = vmatprep.subr.bf16.mxu1 %v7422_v47  ;;  %2837 = vmatpush1.bf16.msra.mxu0 %v7522_v38  ;;  %v2507_v47 = vld [vmem:[%s8966_s7] ss:$2 sm:$0x3] }
 0x305   : > { %2838 = vmatprep.subr.bf16.mxu0 %v7527_v39  ;;  %v7552_v38 = vld [vmem:[#allocation13 + $0x60] ss:$8 sps:$4 sm:$0xff]   ;;  %v7557_v39 = vld [vmem:[#allocation13 + $0x74] ss:$8 sps:$4 sm:$0xff]  }
 0x307   : > { %2245 = vmatpush1.bf16.msra.mxu1 %v7420_v48  ;;  %v6417_v48 = vld [vmem:[%s8966_s7 + $0x1] ss:$2 sm:$0x3] }
 0x308   : > { %2246 = vmatprep.subr.bf16.mxu1 %v7425_v49  ;;  %2839 = vmatpush1.bf16.msra.mxu0 %v7525_v40  ;;  %v2514_v49 = vrot.slane %v2507_v47, %v8714_v11  ;;  %v7555_v40 = vld [vmem:[#allocation13 + $0x70] ss:$8 sps:$4 sm:$0xff]  }
 0x309   : > { %2840 = vmatprep.subr.bf16.mxu0 %v7530_v42  ;;  %v7560_v42 = vld [vmem:[#allocation13 + $0x84] ss:$8 sps:$4 sm:$0xff]  }
 0x30b   : > { %2247 = vmatpush1.bf16.msra.mxu1 %v7423_v52  ;;  %v2518_v52 = vrot.slane %v2507_v47, %v8720_v15  ;;  %v7564_v47 = vld [vmem:[#allocation13 + $0xa0] ss:$8 sps:$4 sm:$0xff]  }
 0x30c   : > { %2248 = vmatprep.subr.bf16.mxu1 %v7428_v56  ;;  %2841 = vmatpush1.bf16.msra.mxu0 %v7528_v41  ;;  %v2527_v56 = vrot.slane %v6417_v48, %v8714_v11  ;;  %v7558_v41 = vld [vmem:[#allocation13 + $0x80] ss:$8 sps:$4 sm:$0xff]  }
 0x30d   : > { %2842 = vmatprep.subr.bf16.mxu0 %v7533_v43  ;;  %v7563_v43 = vld [vmem:[#allocation13 + $0x94] ss:$8 sps:$4 sm:$0xff]  }
 0x30f   : > { %2249 = vmatpush1.bf16.msra.mxu1 %v7426_v57 }
 0x310   : > { %2250 = vmatprep.subr.bf16.mxu1 %v7431_v29  ;;  %2843 = vmatpush1.bf16.msra.mxu0 %v7531_v45  ;;  %v2531_v29 = vrot.slane %v6417_v48, %v8720_v15  ;;  %v7561_v45 = vld [vmem:[#allocation13 + $0x90] ss:$8 sps:$4 sm:$0xff]   ;;  %v7569_v48 = vld [vmem:[#allocation13 + $0xb4] ss:$8 sps:$4 sm:$0xff]  }
 0x311   : > { %3013 = vmatprep.subr.bf16.mxu0 %v7536_v46  ;;  %v7566_v46 = vld [vmem:[#allocation13 + $0xa4] ss:$8 sps:$4 sm:$0xff]  }
 0x313   : > { %2251 = vmatpush1.bf16.msra.mxu1 %v7429_v30 }
 0x314   : > { %2252 = vmatprep.subr.bf16.mxu1 %v7434_v32 }
 0x317   : > { %2253 = vmatpush1.bf16.msra.mxu1 %v7432_v0 }
 0x318   : > { %2254 = vmatprep.subr.bf16.mxu1 %v7437_v59 }
 0x31b   : > { %2255 = vmatpush1.bf16.msra.mxu1 %v7435_v60 }
 0x31c   : > { %2464 = vmatprep.subr.bf16.mxu1 %v7440_v61 }
 0x31e   : > { %2257 = vmatmul.mubr.bf16.vlgmr.msra.gmra.mrb[0].mxu1 %v2058_v55  ;;  %v7456_v55 = vld [vmem:[#allocation12 + $0x460] ss:$8 sps:$4 sm:$0xff]  }
 0x31f   : > { %2465 = vmatpush1.bf16.msra.mxu1 %v7438_v62  ;;  %2496 = vmatprep.mubr.bf16.mxu1 %v2301_v1 }
 0x320   : > { %2466 = vmatprep.subr.bf16.mxu1 %v7443_v63  ;;  %v6419_v63 = vld.sshfl [vmem:[#allocation4] sm:$0x33 pattern:$0x76325410] }
 0x323   : > { %2467 = vmatpush1.bf16.msra.mxu1 %v7441_v2 }
 0x324   : > { %2468 = vmatprep.subr.bf16.mxu1 %v7446_v3 }
 0x327   : > { %2469 = vmatpush1.bf16.msra.mxu1 %v7444_v4 }
 0x328   : > { %2470 = vmatprep.subr.bf16.mxu1 %v7449_v5 }
 0x32b   : > { %2471 = vmatpush1.bf16.msra.mxu1 %v7447_v24  ;;  %v2562_v24 = vcombine.high %v6419_v63, %v6419_v63 }
 0x32c   : > { %2472 = vmatprep.subr.bf16.mxu1 %v7452_v6 }
 0x32f   : > { %2473 = vmatpush1.bf16.msra.mxu1 %v7450_v7 }
 0x330   : > { %2474 = vmatprep.subr.bf16.mxu1 %v7455_v44 }
 0x333   : > { %2475 = vmatpush1.bf16.msra.mxu1 %v7453_v50 }
 0x334   : > { %2476 = vmatprep.subr.bf16.mxu1 %v7458_v51 }
 0x337   : > { %2477 = vmatpush1.bf16.msra.mxu1 %v7456_v55 }
 0x338   : > { %2478 = vmatprep.subr.bf16.mxu1 %v7461_v8 }
 0x33b   : > { %2479 = vmatpush1.bf16.msra.mxu1 %v7459_v9 }
 0x33c   : > { %2480 = vmatprep.subr.bf16.mxu1 %v7464_v10 }
 0x33f   : > { %2481 = vmatpush1.bf16.msra.mxu1 %v7462_v13 }
 0x340   : > { %2482 = vmatprep.subr.bf16.mxu1 %v7467_v16 }
 0x343   : > { %2483 = vmatpush1.bf16.msra.mxu1 %v7465_v17 }
 0x344   : > { %2484 = vmatprep.subr.bf16.mxu1 %v7470_v18 }
 0x347   : > { %2485 = vmatpush1.bf16.msra.mxu1 %v7468_v19 }
 0x348   : > { %2486 = vmatprep.subr.bf16.mxu1 %v7473_v20 }
 0x34b   : > { %2487 = vmatpush1.bf16.msra.mxu1 %v7471_v53 }
 0x34c   : > { %2488 = vmatprep.subr.bf16.mxu1 %v7476_v54 }
 0x34f   : > { %2489 = vmatpush1.bf16.msra.mxu1 %v7474_v58 }
 0x350   : > { %2490 = vmatprep.subr.bf16.mxu1 %v7479_v21  ;;  %v7534_v21 = vld [vmem:[#allocation13] ss:$8 sps:$4 sm:$0xff]  }
 0x353   : > { %2491 = vmatpush1.bf16.msra.mxu1 %v7477_v22 }
 0x354   : > { %2492 = vmatprep.subr.bf16.mxu1 %v7482_v23 }
 0x357   : > { %2493 = vmatpush1.bf16.msra.mxu1 %v7480_v25  ;;  %v7539_v25 = vld [vmem:[#allocation13 + $0x14] ss:$8 sps:$4 sm:$0xff]  }
 0x358   : > { %2494 = vmatprep.subr.bf16.mxu1 %v7485_v26  ;;  %v7537_v26 = vld [vmem:[#allocation13 + $0x10] ss:$8 sps:$4 sm:$0xff]  }
 0x35b   : > { %2495 = vmatpush1.bf16.msra.mxu1 %v7483_v27  ;;  %v7542_v27 = vld [vmem:[#allocation13 + $0x24] ss:$8 sps:$4 sm:$0xff]  }
 0x35e   : > { %2497 = vmatmul.mubr.bf16.vlgmr.msra.gmra.mrb[0].mxu1 %v2300_v12  ;;  %v7540_v12 = vld [vmem:[#allocation13 + $0x20] ss:$8 sps:$4 sm:$0xff]  }
 0x431   : > { %v2498_v57 = vpop.f32.mrb[0].mxu1 }
 0x432   : > { %v2521_v30 = vmul.f32 %v2514_v49, %v2498_v57  ;;  %v2500_v32 = vpop.f32.mrb[1].mxu1  ;;  %v7567_v49 = vld [vmem:[#allocation13 + $0xb0] ss:$8 sps:$4 sm:$0xff]   ;;  %v7575_v57 = vld [vmem:[#allocation13 + $0xd4] ss:$8 sps:$4 sm:$0xff]  }
 0x433   : > { %v2522_v0 = vmul.f32 %v2518_v52, %v2500_v32  ;;  %v2502_v59 = vpop.f32.mrb[2].mxu1  ;;  %v7572_v52 = vld [vmem:[#allocation13 + $0xc4] ss:$8 sps:$4 sm:$0xff]   ;;  %v7576_v32 = vld [vmem:[#allocation13 + $0xe0] ss:$8 sps:$4 sm:$0xff]  }
 0x434   : > { %v2534_v60 = vadd.f32 %v2527_v56, %v2521_v30  ;;  %v2503_v61 = vpop.f32.mrb[3].mxu1  ;;  %v7570_v56 = vld [vmem:[#allocation13 + $0xc0] ss:$8 sps:$4 sm:$0xff]   ;;  %v7578_v30 = vld [vmem:[#allocation13 + $0xe4] ss:$8 sps:$4 sm:$0xff]  }
 0x435   : > { %v2535_v62 = vadd.f32 %v2531_v29, %v2522_v0  ;;  %v7573_v29 = vld [vmem:[#allocation13 + $0xd0] ss:$8 sps:$4 sm:$0xff]   ;;  %v7581_v0 = vld [vmem:[#allocation13 + $0xf4] ss:$8 sps:$4 sm:$0xff]   ;;  %v7582_v61 = vld [vmem:[#allocation13 + $0x200] ss:$8 sps:$4 sm:$0xff]  }
 0x436   : > { %8050 = vtanh.f32 %v2534_v60  ;;  %v7579_v59 = vld [vmem:[#allocation13 + $0xf0] ss:$8 sps:$4 sm:$0xff]   ;;  %v7584_v60 = vld [vmem:[#allocation13 + $0x204] ss:$8 sps:$4 sm:$0xff]  }
 0x437   : > { %8052 = vtanh.f32 %v2535_v62  ;;  %v7587_v62 = vld [vmem:[#allocation13 + $0x214] ss:$8 sps:$4 sm:$0xff]  }
 0x440   : > { %v8051_v1 = vpop.eup %8050 }
 0x441   : > { %v8053_v2 = vpop.eup %8052  ;;  %v2538_v3 = vpack.c.bf16 %v8051_v1, %v8051_v1 }
 0x442   : > { %v2539_v4 = vpack.c.bf16 %v8053_v2, %v8053_v2  ;;  %v6418_v5 = vpack.c.bf16 %v8053_v2, %v8051_v1  ;;  %v7585_v1 = vld [vmem:[#allocation13 + $0x210] ss:$8 sps:$4 sm:$0xff]   ;;  %v7590_v2 = vld [vmem:[#allocation13 + $0x224] ss:$8 sps:$4 sm:$0xff]  }
 0x443   : > { %v2563_v6 = vrot.slane %v2538_v3, 6  ;;  %v7588_v3 = vld [vmem:[#allocation13 + $0x220] ss:$8 sps:$4 sm:$0xff]  }
 0x444   : > { %v2550_v7 = vrot.slane %v6418_v5, %v8688_v14  ;;  %v2564_v44 = vrot.slane %v2539_v4, 6  ;;  %v7593_v4 = vld [vmem:[#allocation13 + $0x234] ss:$8 sps:$4 sm:$0xff]   ;;  %v7591_v5 = vld [vmem:[#allocation13 + $0x230] ss:$8 sps:$4 sm:$0xff]  }
 0x445   : > { %v8776_v50 = vsel %vm518_vm0, %v6419_v63, %v2563_v6  ;;  %v7594_v6 = vld [vmem:[#allocation13 + $0x240] ss:$8 sps:$4 sm:$0xff]  }
 0x446   : > { %v2551_v51 = vcombine.high %v2550_v7, %v2550_v7  ;;  %v8779_v55 = vsel %vm518_vm0, %v2562_v24, %v2564_v44  ;;  %v2638_v8 = vshrl.u32 %v8776_v50, 16  ;;  %v2640_v9 = vshll.u32 %v8776_v50, 16  ;;  %v7596_v24 = vld [vmem:[#allocation13 + $0x244] ss:$8 sps:$4 sm:$0xff]   ;;  %v7599_v7 = vld [vmem:[#allocation13 + $0x254] ss:$8 sps:$4 sm:$0xff]  }
 0x447   : > { %v2644_v10 = vshrl.u32 %v8779_v55, 16  ;;  %v2646_v13 = vshll.u32 %v8779_v55, 16  ;;  %v3090_v63 = vrot.slane %v8779_v55, 1  ;;  %v7597_v44 = vld [vmem:[#allocation13 + $0x250] ss:$8 sps:$4 sm:$0xff]  }
 0x448   : > { %2553 = vst [vmem:[#allocation4] sm:$0xf] %v2551_v51  ;;  %v2642_v16 = vrot.slane %v2640_v9, 1  ;;  %v8785_v17 = vrot.slane %v2638_v8, 1  ;;  %v8787_v18 = vrot.slane %v2640_v9, 2 }
 0x449   : > { %v2648_v19 = vrot.slane %v2646_v13, 1  ;;  %v8789_v20 = vrot.slane %v2644_v10, 1  ;;  %v8791_v53 = vrot.slane %v2646_v13, 2  ;;  %v7602_v51 = vld [vmem:[#allocation13 + $0x264] ss:$8 sps:$4 sm:$0xff]  }
 0x44a   : > { %v3331_v54 = vor.u32 %v8787_v18, %v8785_v17  ;;  %v2643_v23 = vor.u32 %v2642_v16, %v2638_v8  ;;  %v7600_v8 = vld [vmem:[#allocation13 + $0x260] ss:$8 sps:$4 sm:$0xff]   ;;  %v7605_v9 = vld [vmem:[#allocation13 + $0x274] ss:$8 sps:$4 sm:$0xff]   ;;  %v7608_v13 = vld [vmem:[#allocation13 + $0x284] ss:$8 sps:$4 sm:$0xff]  }
 0x44b   : > { %v2649_v58 = vor.u32 %v2648_v19, %v2644_v10  ;;  %v3334_v22 = vor.u32 %v8791_v53, %v8789_v20  ;;  %v7603_v10 = vld [vmem:[#allocation13 + $0x270] ss:$8 sps:$4 sm:$0xff]   ;;  %v7606_v16 = vld [vmem:[#allocation13 + $0x280] ss:$8 sps:$4 sm:$0xff]   ;;  %v7611_v19 = vld [vmem:[#allocation13 + $0x294] ss:$8 sps:$4 sm:$0xff]  }
 0x44c   : > { %v7639_v20 = vld [vmem:[#allocation13 + $0x330] ss:$8 sps:$4 sm:$0xff]   ;;  %v7644_v53 = vld [vmem:[#allocation13 + $0x344] ss:$8 sps:$4 sm:$0xff]  }
 0x44d   : > { %2844 = vmatprep.mubr.bf16.mxu0 %v2649_v58  ;;  %v7609_v58 = vld [vmem:[#allocation13 + $0x290] ss:$8 sps:$4 sm:$0xff]   ;;  %v7698_v18 = vld [vmem:[#allocation13 + $0x464] ss:$8 sps:$4 sm:$0xff]  }
 0x44e   : > { %2845 = vmatmul.mubr.bf16.vlgmr.msra.gmra.mrb[4].mxu0 %v2643_v23  ;;  %v7612_v23 = vld [vmem:[#allocation13 + $0x2a0] ss:$8 sps:$4 sm:$0xff]   ;;  %v7693_v17 = vld [vmem:[#allocation13 + $0x450] ss:$8 sps:$4 sm:$0xff]  }
 0x44f   : > { %3014 = vmatpush1.bf16.msra.mxu0 %v7534_v21  ;;  %3045 = vmatprep.mubr.bf16.mxu0 %v8779_v55  ;;  %v7614_v21 = vld [vmem:[#allocation13 + $0x2a4] ss:$8 sps:$4 sm:$0xff]  }
 0x450   : > { %3015 = vmatprep.subr.bf16.mxu0 %v7539_v25  ;;  %v7617_v25 = vld [vmem:[#allocation13 + $0x2b4] ss:$8 sps:$4 sm:$0xff]  }
 0x453   : > { %3016 = vmatpush1.bf16.msra.mxu0 %v7537_v26  ;;  %v7615_v26 = vld [vmem:[#allocation13 + $0x2b0] ss:$8 sps:$4 sm:$0xff]  }
 0x454   : > { %3017 = vmatprep.subr.bf16.mxu0 %v7542_v27  ;;  %v7620_v27 = vld [vmem:[#allocation13 + $0x2c4] ss:$8 sps:$4 sm:$0xff]  }
 0x457   : > { %3018 = vmatpush1.bf16.msra.mxu0 %v7540_v12  ;;  %v7618_v12 = vld [vmem:[#allocation13 + $0x2c0] ss:$8 sps:$4 sm:$0xff]  }
 0x458   : > { %3019 = vmatprep.subr.bf16.mxu0 %v7545_v28  ;;  %v7623_v28 = vld [vmem:[#allocation13 + $0x2d4] ss:$8 sps:$4 sm:$0xff]  }
 0x45b   : > { %3020 = vmatpush1.bf16.msra.mxu0 %v7543_v31  ;;  %v7621_v31 = vld [vmem:[#allocation13 + $0x2d0] ss:$8 sps:$4 sm:$0xff]  }
 0x45c   : > { %3021 = vmatprep.subr.bf16.mxu0 %v7548_v33  ;;  %v7626_v33 = vld [vmem:[#allocation13 + $0x2e4] ss:$8 sps:$4 sm:$0xff]  }
 0x45f   : > { %3022 = vmatpush1.bf16.msra.mxu0 %v7546_v34  ;;  %v7624_v34 = vld [vmem:[#allocation13 + $0x2e0] ss:$8 sps:$4 sm:$0xff]  }
 0x460   : > { %3023 = vmatprep.subr.bf16.mxu0 %v7551_v35  ;;  %v7629_v35 = vld [vmem:[#allocation13 + $0x2f4] ss:$8 sps:$4 sm:$0xff]  }
 0x463   : > { %3024 = vmatpush1.bf16.msra.mxu0 %v7549_v36  ;;  %v7627_v36 = vld [vmem:[#allocation13 + $0x2f0] ss:$8 sps:$4 sm:$0xff]  }
 0x464   : > { %3025 = vmatprep.subr.bf16.mxu0 %v7554_v37  ;;  %v7632_v37 = vld [vmem:[#allocation13 + $0x304] ss:$8 sps:$4 sm:$0xff]  }
 0x467   : > { %3026 = vmatpush1.bf16.msra.mxu0 %v7552_v38  ;;  %v7630_v38 = vld [vmem:[#allocation13 + $0x300] ss:$8 sps:$4 sm:$0xff]  }
 0x468   : > { %3027 = vmatprep.subr.bf16.mxu0 %v7557_v39  ;;  %v3089_v39 = vrot.slane %v8776_v50, 1 }
 0x46b   : > { %3028 = vmatpush1.bf16.msra.mxu0 %v7555_v40  ;;  %v7635_v40 = vld [vmem:[#allocation13 + $0x314] ss:$8 sps:$4 sm:$0xff]  }
 0x46c   : > { %3029 = vmatprep.subr.bf16.mxu0 %v7560_v42  ;;  %v7726_v42 = vld [vmem:[#allocation15 + $0x100] ss:$8 sps:$4 sm:$0xff]  }
 0x46f   : > { %3030 = vmatpush1.bf16.msra.mxu0 %v7558_v41  ;;  %v7728_v41 = vld [vmem:[#allocation15 + $0x104] ss:$8 sps:$4 sm:$0xff]  }
 0x470   : > { %3031 = vmatprep.subr.bf16.mxu0 %v7563_v43  ;;  %v7633_v43 = vld [vmem:[#allocation13 + $0x310] ss:$8 sps:$4 sm:$0xff]   ;;  %4085 = vmatprep.subr.bf16.mxu1 %v7728_v41  ;;  %v7690_v41 = vld [vmem:[#allocation13 + $0x440] ss:$8 sps:$4 sm:$0xff]  }
 0x471   : > { %4086 = vmatpush1.bf16.msra.mxu1 %v7726_v42  ;;  %v7692_v42 = vld [vmem:[#allocation13 + $0x444] ss:$8 sps:$4 sm:$0xff]  }
 0x473   : > { %3032 = vmatpush1.bf16.msra.mxu0 %v7561_v45  ;;  %v7731_v45 = vld [vmem:[#allocation15 + $0x114] ss:$8 sps:$4 sm:$0xff]  }
 0x474   : > { %3033 = vmatprep.subr.bf16.mxu0 %v7566_v46  ;;  %v7638_v46 = vld [vmem:[#allocation13 + $0x324] ss:$8 sps:$4 sm:$0xff]   ;;  %4087 = vmatprep.subr.bf16.mxu1 %v7731_v45  ;;  %v7699_v45 = vld [vmem:[#allocation13 + $0x470] ss:$8 sps:$4 sm:$0xff]  }
 0x477   : > { %3034 = vmatpush1.bf16.msra.mxu0 %v7564_v47  ;;  %v7729_v47 = vld [vmem:[#allocation15 + $0x110] ss:$8 sps:$4 sm:$0xff]  }
 0x478   : > { %3035 = vmatprep.subr.bf16.mxu0 %v7569_v48  ;;  %v7734_v48 = vld [vmem:[#allocation15 + $0x124] ss:$8 sps:$4 sm:$0xff]   ;;  %4088 = vmatpush1.bf16.msra.mxu1 %v7729_v47  ;;  %v7702_v47 = vld [vmem:[#allocation13 + $0x480] ss:$8 sps:$4 sm:$0xff]  }
 0x479   : > { %4089 = vmatprep.subr.bf16.mxu1 %v7734_v48  ;;  %v7707_v48 = vld [vmem:[#allocation13 + $0x494] ss:$8 sps:$4 sm:$0xff]  }
 0x47b   : > { %3036 = vmatpush1.bf16.msra.mxu0 %v7567_v49  ;;  %v7636_v49 = vld [vmem:[#allocation13 + $0x320] ss:$8 sps:$4 sm:$0xff]  }
 0x47c   : > { %3037 = vmatprep.subr.bf16.mxu0 %v7572_v52  ;;  %v7641_v52 = vld [vmem:[#allocation13 + $0x334] ss:$8 sps:$4 sm:$0xff]  }
 0x47f   : > { %3038 = vmatpush1.bf16.msra.mxu0 %v7570_v56  ;;  %v7732_v56 = vld [vmem:[#allocation15 + $0x120] ss:$8 sps:$4 sm:$0xff]  }
 0x480   : > { %3039 = vmatprep.subr.bf16.mxu0 %v7575_v57  ;;  %v7737_v57 = vld [vmem:[#allocation15 + $0x134] ss:$8 sps:$4 sm:$0xff]   ;;  %4090 = vmatpush1.bf16.msra.mxu1 %v7732_v56  ;;  %v7708_v56 = vld [vmem:[#allocation13 + $0x4a0] ss:$8 sps:$4 sm:$0xff]  }
 0x481   : > { %4091 = vmatprep.subr.bf16.mxu1 %v7737_v57  ;;  %v7713_v57 = vld [vmem:[#allocation13 + $0x4b4] ss:$8 sps:$4 sm:$0xff]  }
 0x483   : > { %3040 = vmatpush1.bf16.msra.mxu0 %v7573_v29  ;;  %v7740_v29 = vld [vmem:[#allocation15 + $0x144] ss:$8 sps:$4 sm:$0xff]  }
 0x484   : > { %3041 = vmatprep.subr.bf16.mxu0 %v7578_v30  ;;  %v7642_v30 = vld [vmem:[#allocation13 + $0x340] ss:$8 sps:$4 sm:$0xff]  }
 0x487   : > { %3042 = vmatpush1.bf16.msra.mxu0 %v7576_v32  ;;  %v7647_v32 = vld [vmem:[#allocation13 + $0x354] ss:$8 sps:$4 sm:$0xff]  }
 0x488   : > { %3043 = vmatprep.subr.bf16.mxu0 %v7581_v0  ;;  %v7738_v0 = vld [vmem:[#allocation15 + $0x140] ss:$8 sps:$4 sm:$0xff]  }
 0x48b   : > { %3044 = vmatpush1.bf16.msra.mxu0 %v7579_v59  ;;  %v7743_v59 = vld [vmem:[#allocation15 + $0x154] ss:$8 sps:$4 sm:$0xff]  }
 0x48c   : > { %3253 = vmatprep.subr.bf16.mxu0 %v7584_v60  ;;  %v7645_v60 = vld [vmem:[#allocation13 + $0x350] ss:$8 sps:$4 sm:$0xff]  }
 0x48e   : > { %3046 = vmatmul.mubr.bf16.vlgmr.msra.gmra.mrb[4].mxu0 %v8776_v50 }
 0x48f   : > { %3254 = vmatpush1.bf16.msra.mxu0 %v7582_v61  ;;  %3285 = vmatprep.mubr.bf16.mxu0 %v3090_v63  ;;  %v7650_v61 = vld [vmem:[#allocation13 + $0x364] ss:$8 sps:$4 sm:$0xff]  }
 0x490   : > { %3255 = vmatprep.subr.bf16.mxu0 %v7587_v62  ;;  %v7741_v62 = vld [vmem:[#allocation15 + $0x150] ss:$8 sps:$4 sm:$0xff]   ;;  %v7746_v63 = vld [vmem:[#allocation15 + $0x164] ss:$8 sps:$4 sm:$0xff]  }
 0x493   : > { %3256 = vmatpush1.bf16.msra.mxu0 %v7585_v1  ;;  %v7648_v1 = vld [vmem:[#allocation13 + $0x360] ss:$8 sps:$4 sm:$0xff]  }
 0x494   : > { %3257 = vmatprep.subr.bf16.mxu0 %v7590_v2  ;;  %v7653_v2 = vld [vmem:[#allocation13 + $0x374] ss:$8 sps:$4 sm:$0xff]  }
 0x497   : > { %3258 = vmatpush1.bf16.msra.mxu0 %v7588_v3  ;;  %v7744_v3 = vld [vmem:[#allocation15 + $0x160] ss:$8 sps:$4 sm:$0xff]  }
 0x498   : > { %3259 = vmatprep.subr.bf16.mxu0 %v7593_v4  ;;  %v7749_v4 = vld [vmem:[#allocation15 + $0x174] ss:$8 sps:$4 sm:$0xff]  }
 0x49b   : > { %3260 = vmatpush1.bf16.msra.mxu0 %v7591_v5  ;;  %v7651_v5 = vld [vmem:[#allocation13 + $0x370] ss:$8 sps:$4 sm:$0xff]  }
 0x49c   : > { %3261 = vmatprep.subr.bf16.mxu0 %v7596_v24  ;;  %v7656_v24 = vld [vmem:[#allocation13 + $0x384] ss:$8 sps:$4 sm:$0xff]  }
 0x49f   : > { %3262 = vmatpush1.bf16.msra.mxu0 %v7594_v6  ;;  %v7747_v6 = vld [vmem:[#allocation15 + $0x170] ss:$8 sps:$4 sm:$0xff]  }
 0x4a0   : > { %3263 = vmatprep.subr.bf16.mxu0 %v7599_v7  ;;  %v7752_v7 = vld [vmem:[#allocation15 + $0x184] ss:$8 sps:$4 sm:$0xff]  }
 0x4a3   : > { %3264 = vmatpush1.bf16.msra.mxu0 %v7597_v44  ;;  %v7654_v44 = vld [vmem:[#allocation13 + $0x380] ss:$8 sps:$4 sm:$0xff]  }
 0x4a4   : > { %3265 = vmatprep.subr.bf16.mxu0 %v7602_v51  ;;  %v7659_v51 = vld [vmem:[#allocation13 + $0x394] ss:$8 sps:$4 sm:$0xff]  }
 0x4a7   : > { %3266 = vmatpush1.bf16.msra.mxu0 %v7600_v8  ;;  %v7750_v8 = vld [vmem:[#allocation15 + $0x180] ss:$8 sps:$4 sm:$0xff]  }
 0x4a8   : > { %3267 = vmatprep.subr.bf16.mxu0 %v7605_v9  ;;  %v7657_v9 = vld [vmem:[#allocation13 + $0x390] ss:$8 sps:$4 sm:$0xff]  }
 0x4ab   : > { %3268 = vmatpush1.bf16.msra.mxu0 %v7603_v10  ;;  %v7662_v10 = vld [vmem:[#allocation13 + $0x3a4] ss:$8 sps:$4 sm:$0xff]  }
 0x4ac   : > { %3269 = vmatprep.subr.bf16.mxu0 %v7608_v13  ;;  %v7660_v13 = vld [vmem:[#allocation13 + $0x3a0] ss:$8 sps:$4 sm:$0xff]  }
 0x4af   : > { %3270 = vmatpush1.bf16.msra.mxu0 %v7606_v16  ;;  %v7665_v16 = vld [vmem:[#allocation13 + $0x3b4] ss:$8 sps:$4 sm:$0xff]  }
 0x4b0   : > { %3271 = vmatprep.subr.bf16.mxu0 %v7611_v19  ;;  %v7663_v19 = vld [vmem:[#allocation13 + $0x3b0] ss:$8 sps:$4 sm:$0xff]  }
 0x4b3   : > { %3272 = vmatpush1.bf16.msra.mxu0 %v7609_v58  ;;  %v7668_v58 = vld [vmem:[#allocation13 + $0x3c4] ss:$8 sps:$4 sm:$0xff]  }
 0x4b4   : > { %3273 = vmatprep.subr.bf16.mxu0 %v7614_v21  ;;  %v7666_v21 = vld [vmem:[#allocation13 + $0x3c0] ss:$8 sps:$4 sm:$0xff]  }
 0x4b7   : > { %3274 = vmatpush1.bf16.msra.mxu0 %v7612_v23  ;;  %v7671_v23 = vld [vmem:[#allocation13 + $0x3d4] ss:$8 sps:$4 sm:$0xff]  }
 0x4b8   : > { %3275 = vmatprep.subr.bf16.mxu0 %v7617_v25  ;;  %v7669_v25 = vld [vmem:[#allocation13 + $0x3d0] ss:$8 sps:$4 sm:$0xff]  }
 0x4bb   : > { %3276 = vmatpush1.bf16.msra.mxu0 %v7615_v26  ;;  %v7674_v26 = vld [vmem:[#allocation13 + $0x3e4] ss:$8 sps:$4 sm:$0xff]  }
 0x4bc   : > { %3277 = vmatprep.subr.bf16.mxu0 %v7620_v27  ;;  %v7672_v27 = vld [vmem:[#allocation13 + $0x3e0] ss:$8 sps:$4 sm:$0xff]  }
 0x4bf   : > { %3278 = vmatpush1.bf16.msra.mxu0 %v7618_v12  ;;  %v7677_v12 = vld [vmem:[#allocation13 + $0x3f4] ss:$8 sps:$4 sm:$0xff]  }
 0x4c0   : > { %3279 = vmatprep.subr.bf16.mxu0 %v7623_v28  ;;  %v7675_v28 = vld [vmem:[#allocation13 + $0x3f0] ss:$8 sps:$4 sm:$0xff]  }
 0x4c3   : > { %3280 = vmatpush1.bf16.msra.mxu0 %v7621_v31  ;;  %v7680_v31 = vld [vmem:[#allocation13 + $0x404] ss:$8 sps:$4 sm:$0xff]  }
 0x4c4   : > { %3281 = vmatprep.subr.bf16.mxu0 %v7626_v33  ;;  %v7678_v33 = vld [vmem:[#allocation13 + $0x400] ss:$8 sps:$4 sm:$0xff]  }
 0x4c7   : > { %3282 = vmatpush1.bf16.msra.mxu0 %v7624_v34  ;;  %v7683_v34 = vld [vmem:[#allocation13 + $0x414] ss:$8 sps:$4 sm:$0xff]  }
 0x4c8   : > { %3283 = vmatprep.subr.bf16.mxu0 %v7629_v35  ;;  %v3574_v35 = vrot.slane %v8779_v55, 2  ;;  %v7695_v55 = vld [vmem:[#allocation13 + $0x454] ss:$8 sps:$4 sm:$0xff]  }
 0x4cb   : > { %3284 = vmatpush1.bf16.msra.mxu0 %v7627_v36  ;;  %v7681_v36 = vld [vmem:[#allocation13 + $0x410] ss:$8 sps:$4 sm:$0xff]  }
 0x4cc   : > { %3497 = vmatprep.subr.bf16.mxu0 %v7632_v37  ;;  %v7686_v37 = vld [vmem:[#allocation13 + $0x424] ss:$8 sps:$4 sm:$0xff]  }
 0x4ce   : > { %3286 = vmatmul.mubr.bf16.vlgmr.msra.gmra.mrb[4].mxu0 %v3089_v39  ;;  %v7689_v39 = vld [vmem:[#allocation13 + $0x434] ss:$8 sps:$4 sm:$0xff]  }
 0x4cf   : > { %3498 = vmatpush1.bf16.msra.mxu0 %v7630_v38  ;;  %3529 = vmatprep.mubr.bf16.mxu0 %v3334_v22  ;;  %v7735_v22 = vld [vmem:[#allocation15 + $0x130] ss:$8 sps:$4 sm:$0xff]   ;;  %v7684_v38 = vld [vmem:[#allocation13 + $0x420] ss:$8 sps:$4 sm:$0xff]  }
 0x4d0   : > { %3499 = vmatprep.subr.bf16.mxu0 %v7635_v40  ;;  %4092 = vmatpush1.bf16.msra.mxu1 %v7735_v22  ;;  %v7687_v40 = vld [vmem:[#allocation13 + $0x430] ss:$8 sps:$4 sm:$0xff]   ;;  %v7714_v22 = vld [vmem:[#allocation13 + $0x4c0] ss:$8 sps:$4 sm:$0xff]  }
 0x4d1   : > { %4093 = vmatprep.subr.bf16.mxu1 %v7740_v29  ;;  %v7719_v29 = vld [vmem:[#allocation13 + $0x4d4] ss:$8 sps:$4 sm:$0xff]  }
 0x4d3   : > { %3500 = vmatpush1.bf16.msra.mxu0 %v7633_v43  ;;  %v7701_v43 = vld [vmem:[#allocation13 + $0x474] ss:$8 sps:$4 sm:$0xff]  }
 0x4d4   : > { %3501 = vmatprep.subr.bf16.mxu0 %v7638_v46  ;;  %4094 = vmatpush1.bf16.msra.mxu1 %v7738_v0  ;;  %v7704_v46 = vld [vmem:[#allocation13 + $0x484] ss:$8 sps:$4 sm:$0xff]   ;;  %v7720_v0 = vld [vmem:[#allocation13 + $0x4e0] ss:$8 sps:$4 sm:$0xff]  }
 0x4d5   : > { %4095 = vmatprep.subr.bf16.mxu1 %v7743_v59  ;;  %v7725_v59 = vld [vmem:[#allocation13 + $0x4f4] ss:$8 sps:$4 sm:$0xff]  }
 0x4d7   : > { %3502 = vmatpush1.bf16.msra.mxu0 %v7636_v49  ;;  %v7705_v49 = vld [vmem:[#allocation13 + $0x490] ss:$8 sps:$4 sm:$0xff]  }
 0x4d8   : > { %3503 = vmatprep.subr.bf16.mxu0 %v7641_v52  ;;  %4096 = vmatpush1.bf16.msra.mxu1 %v7741_v62  ;;  %v7710_v52 = vld [vmem:[#allocation13 + $0x4a4] ss:$8 sps:$4 sm:$0xff]   ;;  %v7753_v62 = vld [vmem:[#allocation15 + $0x190] ss:$8 sps:$4 sm:$0xff]  }
 0x4d9   : > { %4097 = vmatprep.subr.bf16.mxu1 %v7746_v63  ;;  %v7755_v63 = vld [vmem:[#allocation15 + $0x194] ss:$8 sps:$4 sm:$0xff]  }
 0x4db   : > { %3504 = vmatpush1.bf16.msra.mxu0 %v7639_v20  ;;  %v7711_v20 = vld [vmem:[#allocation13 + $0x4b0] ss:$8 sps:$4 sm:$0xff]  }
 0x4dc   : > { %3505 = vmatprep.subr.bf16.mxu0 %v7644_v53  ;;  %4098 = vmatpush1.bf16.msra.mxu1 %v7744_v3  ;;  %v7716_v53 = vld [vmem:[#allocation13 + $0x4c4] ss:$8 sps:$4 sm:$0xff]   ;;  %v7761_v3 = vld [vmem:[#allocation15 + $0x1b4] ss:$8 sps:$4 sm:$0xff]  }
 0x4dd   : > { %4099 = vmatprep.subr.bf16.mxu1 %v7749_v4  ;;  %v7759_v4 = vld [vmem:[#allocation15 + $0x1b0] ss:$8 sps:$4 sm:$0xff]  }
 0x4df   : > { %3506 = vmatpush1.bf16.msra.mxu0 %v7642_v30  ;;  %v7717_v30 = vld [vmem:[#allocation13 + $0x4d0] ss:$8 sps:$4 sm:$0xff]  }
 0x4e0   : > { %3507 = vmatprep.subr.bf16.mxu0 %v7647_v32  ;;  %4100 = vmatpush1.bf16.msra.mxu1 %v7747_v6  ;;  %v7722_v32 = vld [vmem:[#allocation13 + $0x4e4] ss:$8 sps:$4 sm:$0xff]   ;;  %v7767_v6 = vld [vmem:[#allocation15 + $0x1d4] ss:$8 sps:$4 sm:$0xff]  }
 0x4e1   : > { %4101 = vmatprep.subr.bf16.mxu1 %v7752_v7  ;;  %v7765_v7 = vld [vmem:[#allocation15 + $0x1d0] ss:$8 sps:$4 sm:$0xff]  }
 0x4e3   : > { %3508 = vmatpush1.bf16.msra.mxu0 %v7645_v60  ;;  %v7723_v60 = vld [vmem:[#allocation13 + $0x4f0] ss:$8 sps:$4 sm:$0xff]  }
 0x4e4   : > { %3509 = vmatprep.subr.bf16.mxu0 %v7650_v61  ;;  %4102 = vmatpush1.bf16.msra.mxu1 %v7750_v8  ;;  %v3573_v61 = vrot.slane %v8776_v50, 2  ;;  %v7770_v50 = vld [vmem:[#allocation15 + $0x1e4] ss:$8 sps:$4 sm:$0xff]   ;;  %v7771_v8 = vld [vmem:[#allocation15 + $0x1f0] ss:$8 sps:$4 sm:$0xff]  }
 0x4e5   : > { %4103 = vmatprep.subr.bf16.mxu1 %v7755_v63  ;;  %v7783_v63 = vld [vmem:[#allocation15 + $0x30] ss:$8 sps:$4 sm:$0xff]  }
 0x4e7   : > { %3510 = vmatpush1.bf16.msra.mxu0 %v7648_v1  ;;  %v7758_v1 = vld [vmem:[#allocation15 + $0x1a4] ss:$8 sps:$4 sm:$0xff]  }
 0x4e8   : > { %3511 = vmatprep.subr.bf16.mxu0 %v7653_v2  ;;  %4104 = vmatpush1.bf16.msra.mxu1 %v7753_v62  ;;  %v7756_v2 = vld [vmem:[#allocation15 + $0x1a0] ss:$8 sps:$4 sm:$0xff]   ;;  %v7785_v62 = vld [vmem:[#allocation15 + $0x34] ss:$8 sps:$4 sm:$0xff]  }
 0x4e9   : > { %4105 = vmatprep.subr.bf16.mxu1 %v7758_v1  ;;  %v7788_v1 = vld [vmem:[#allocation15 + $0x44] ss:$8 sps:$4 sm:$0xff]  }
 0x4eb   : > { %3512 = vmatpush1.bf16.msra.mxu0 %v7651_v5  ;;  %v7764_v5 = vld [vmem:[#allocation15 + $0x1c4] ss:$8 sps:$4 sm:$0xff]  }
 0x4ec   : > { %3513 = vmatprep.subr.bf16.mxu0 %v7656_v24  ;;  %4106 = vmatpush1.bf16.msra.mxu1 %v7756_v2  ;;  %v7762_v24 = vld [vmem:[#allocation15 + $0x1c0] ss:$8 sps:$4 sm:$0xff]  }
 0x4ed   : > { %4107 = vmatprep.subr.bf16.mxu1 %v7761_v3  ;;  %v7786_v2 = vld [vmem:[#allocation15 + $0x40] ss:$8 sps:$4 sm:$0xff]   ;;  %v7791_v3 = vld [vmem:[#allocation15 + $0x54] ss:$8 sps:$4 sm:$0xff]  }
 0x4ef   : > { %3514 = vmatpush1.bf16.msra.mxu0 %v7654_v44  ;;  %v7768_v44 = vld [vmem:[#allocation15 + $0x1e0] ss:$8 sps:$4 sm:$0xff]  }
 0x4f0   : > { %3515 = vmatprep.subr.bf16.mxu0 %v7659_v51  ;;  %4108 = vmatpush1.bf16.msra.mxu1 %v7759_v4  ;;  %v7773_v51 = vld [vmem:[#allocation15 + $0x1f4] ss:$8 sps:$4 sm:$0xff]   ;;  %v7789_v4 = vld [vmem:[#allocation15 + $0x50] ss:$8 sps:$4 sm:$0xff]  }
 0x4f1   : > { %4109 = vmatprep.subr.bf16.mxu1 %v7764_v5  ;;  %v7794_v5 = vld [vmem:[#allocation15 + $0x64] ss:$8 sps:$4 sm:$0xff]  }
 0x4f3   : > { %3516 = vmatpush1.bf16.msra.mxu0 %v7657_v9  ;;  %v7776_v9 = vld [vmem:[#allocation15 + $0x4] ss:$8 sps:$4 sm:$0xff]  }
 0x4f4   : > { %3517 = vmatprep.subr.bf16.mxu0 %v7662_v10  ;;  %4110 = vmatpush1.bf16.msra.mxu1 %v7762_v24  ;;  %v3780_v10 = vld [vmem:[%s9004_s30] ss:$2 sm:$0x3] }
 0x4f5   : > { %4111 = vmatprep.subr.bf16.mxu1 %v7767_v6  ;;  %v7792_v24 = vld [vmem:[#allocation15 + $0x60] ss:$8 sps:$4 sm:$0xff]   ;;  %v7797_v6 = vld [vmem:[#allocation15 + $0x74] ss:$8 sps:$4 sm:$0xff]  }
 0x4f7   : > { %3518 = vmatpush1.bf16.msra.mxu0 %v7660_v13  ;;  %v6580_v13 = vld [vmem:[%s9004_s30 + $0x1] ss:$2 sm:$0x3] }
 0x4f8   : > { %3519 = vmatprep.subr.bf16.mxu0 %v7665_v16  ;;  %4112 = vmatpush1.bf16.msra.mxu1 %v7765_v7  ;;  %v3787_v16 = vrot.slane %v3780_v10, %v8714_v11  ;;  %v7795_v7 = vld [vmem:[#allocation15 + $0x70] ss:$8 sps:$4 sm:$0xff]  }
 0x4f9   : > { %4113 = vmatprep.subr.bf16.mxu1 %v7770_v50  ;;  %v7800_v50 = vld [vmem:[#allocation15 + $0x84] ss:$8 sps:$4 sm:$0xff]  }
 0x4fb   : > { %3520 = vmatpush1.bf16.msra.mxu0 %v7663_v19  ;;  %v3791_v19 = vrot.slane %v3780_v10, %v8720_v15  ;;  %v7804_v10 = vld [vmem:[#allocation15 + $0xa0] ss:$8 sps:$4 sm:$0xff]  }
 0x4fc   : > { %3521 = vmatprep.subr.bf16.mxu0 %v7668_v58  ;;  %4114 = vmatpush1.bf16.msra.mxu1 %v7768_v44  ;;  %v3800_v58 = vrot.slane %v6580_v13, %v8714_v11  ;;  %v7798_v44 = vld [vmem:[#allocation15 + $0x80] ss:$8 sps:$4 sm:$0xff]  }
 0x4fd   : > { %4115 = vmatprep.subr.bf16.mxu1 %v7773_v51  ;;  %v7803_v51 = vld [vmem:[#allocation15 + $0x94] ss:$8 sps:$4 sm:$0xff]  }
 0x4ff   : > { %3522 = vmatpush1.bf16.msra.mxu0 %v7666_v21 }
 0x500   : > { %3523 = vmatprep.subr.bf16.mxu0 %v7671_v23  ;;  %4116 = vmatpush1.bf16.msra.mxu1 %v7771_v8  ;;  %v3804_v23 = vrot.slane %v6580_v13, %v8720_v15  ;;  %v7801_v8 = vld [vmem:[#allocation15 + $0x90] ss:$8 sps:$4 sm:$0xff]   ;;  %v7809_v13 = vld [vmem:[#allocation15 + $0xb4] ss:$8 sps:$4 sm:$0xff]  }
 0x501   : > { %4286 = vmatprep.subr.bf16.mxu1 %v7776_v9  ;;  %v7806_v9 = vld [vmem:[#allocation15 + $0xa4] ss:$8 sps:$4 sm:$0xff]  }
 0x503   : > { %3524 = vmatpush1.bf16.msra.mxu0 %v7669_v25 }
 0x504   : > { %3525 = vmatprep.subr.bf16.mxu0 %v7674_v26 }
 0x507   : > { %3526 = vmatpush1.bf16.msra.mxu0 %v7672_v27 }
 0x508   : > { %3527 = vmatprep.subr.bf16.mxu0 %v7677_v12 }
 0x50b   : > { %3528 = vmatpush1.bf16.msra.mxu0 %v7675_v28 }
 0x50c   : > { %3737 = vmatprep.subr.bf16.mxu0 %v7680_v31 }
 0x50e   : > { %3530 = vmatmul.mubr.bf16.vlgmr.msra.gmra.mrb[4].mxu0 %v3331_v54  ;;  %v7696_v54 = vld [vmem:[#allocation13 + $0x460] ss:$8 sps:$4 sm:$0xff]  }
 0x50f   : > { %3738 = vmatpush1.bf16.msra.mxu0 %v7678_v33  ;;  %3769 = vmatprep.mubr.bf16.mxu0 %v3574_v35 }
 0x510   : > { %3739 = vmatprep.subr.bf16.mxu0 %v7683_v34  ;;  %v6582_v34 = vld.sshfl [vmem:[#allocation5] sm:$0x33 pattern:$0x76325410] }
 0x513   : > { %3740 = vmatpush1.bf16.msra.mxu0 %v7681_v36 }
 0x514   : > { %3741 = vmatprep.subr.bf16.mxu0 %v7686_v37 }
 0x517   : > { %3742 = vmatpush1.bf16.msra.mxu0 %v7684_v38 }
 0x518   : > { %3743 = vmatprep.subr.bf16.mxu0 %v7689_v39 }
 0x51b   : > { %3744 = vmatpush1.bf16.msra.mxu0 %v7687_v40  ;;  %v3835_v40 = vcombine.high %v6582_v34, %v6582_v34 }
 0x51c   : > { %3745 = vmatprep.subr.bf16.mxu0 %v7692_v42 }
 0x51f   : > { %3746 = vmatpush1.bf16.msra.mxu0 %v7690_v41 }
 0x520   : > { %3747 = vmatprep.subr.bf16.mxu0 %v7695_v55 }
 0x523   : > { %3748 = vmatpush1.bf16.msra.mxu0 %v7693_v17 }
 0x524   : > { %3749 = vmatprep.subr.bf16.mxu0 %v7698_v18 }
 0x527   : > { %3750 = vmatpush1.bf16.msra.mxu0 %v7696_v54 }
 0x528   : > { %3751 = vmatprep.subr.bf16.mxu0 %v7701_v43 }
 0x52b   : > { %3752 = vmatpush1.bf16.msra.mxu0 %v7699_v45 }
 0x52c   : > { %3753 = vmatprep.subr.bf16.mxu0 %v7704_v46 }
 0x52f   : > { %3754 = vmatpush1.bf16.msra.mxu0 %v7702_v47 }
 0x530   : > { %3755 = vmatprep.subr.bf16.mxu0 %v7707_v48 }
 0x533   : > { %3756 = vmatpush1.bf16.msra.mxu0 %v7705_v49 }
 0x534   : > { %3757 = vmatprep.subr.bf16.mxu0 %v7710_v52 }
 0x537   : > { %3758 = vmatpush1.bf16.msra.mxu0 %v7708_v56 }
 0x538   : > { %3759 = vmatprep.subr.bf16.mxu0 %v7713_v57 }
 0x53b   : > { %3760 = vmatpush1.bf16.msra.mxu0 %v7711_v20 }
 0x53c   : > { %3761 = vmatprep.subr.bf16.mxu0 %v7716_v53 }
 0x53f   : > { %3762 = vmatpush1.bf16.msra.mxu0 %v7714_v22 }
 0x540   : > { %3763 = vmatprep.subr.bf16.mxu0 %v7719_v29  ;;  %v7774_v29 = vld [vmem:[#allocation15] ss:$8 sps:$4 sm:$0xff]  }
 0x543   : > { %3764 = vmatpush1.bf16.msra.mxu0 %v7717_v30 }
 0x544   : > { %3765 = vmatprep.subr.bf16.mxu0 %v7722_v32 }
 0x547   : > { %3766 = vmatpush1.bf16.msra.mxu0 %v7720_v0  ;;  %v7779_v0 = vld [vmem:[#allocation15 + $0x14] ss:$8 sps:$4 sm:$0xff]  }
 0x548   : > { %3767 = vmatprep.subr.bf16.mxu0 %v7725_v59  ;;  %v7777_v59 = vld [vmem:[#allocation15 + $0x10] ss:$8 sps:$4 sm:$0xff]  }
 0x54b   : > { %3768 = vmatpush1.bf16.msra.mxu0 %v7723_v60  ;;  %v7782_v60 = vld [vmem:[#allocation15 + $0x24] ss:$8 sps:$4 sm:$0xff]  }
 0x54e   : > { %3770 = vmatmul.mubr.bf16.vlgmr.msra.gmra.mrb[4].mxu0 %v3573_v61  ;;  %v7780_v61 = vld [vmem:[#allocation15 + $0x20] ss:$8 sps:$4 sm:$0xff]  }
 0x621   : > { %v3771_v21 = vpop.f32.mrb[4].mxu0 }
 0x622   : > { %v3794_v25 = vmul.f32 %v3787_v16, %v3771_v21  ;;  %v3773_v26 = vpop.f32.mrb[5].mxu0  ;;  %v7807_v16 = vld [vmem:[#allocation15 + $0xb0] ss:$8 sps:$4 sm:$0xff]   ;;  %v7815_v21 = vld [vmem:[#allocation15 + $0xd4] ss:$8 sps:$4 sm:$0xff]  }
 0x623   : > { %v3795_v27 = vmul.f32 %v3791_v19, %v3773_v26  ;;  %v3775_v12 = vpop.f32.mrb[6].mxu0  ;;  %v7812_v19 = vld [vmem:[#allocation15 + $0xc4] ss:$8 sps:$4 sm:$0xff]   ;;  %v7816_v26 = vld [vmem:[#allocation15 + $0xe0] ss:$8 sps:$4 sm:$0xff]  }
 0x624   : > { %v3807_v28 = vadd.f32 %v3800_v58, %v3794_v25  ;;  %v3776_v31 = vpop.f32.mrb[7].mxu0  ;;  %v7810_v58 = vld [vmem:[#allocation15 + $0xc0] ss:$8 sps:$4 sm:$0xff]   ;;  %v7818_v25 = vld [vmem:[#allocation15 + $0xe4] ss:$8 sps:$4 sm:$0xff]  }
 0x625   : > { %v3808_v33 = vadd.f32 %v3804_v23, %v3795_v27  ;;  %v7813_v23 = vld [vmem:[#allocation15 + $0xd0] ss:$8 sps:$4 sm:$0xff]   ;;  %v7821_v27 = vld [vmem:[#allocation15 + $0xf4] ss:$8 sps:$4 sm:$0xff]   ;;  %v7822_v31 = vld [vmem:[#allocation15 + $0x200] ss:$8 sps:$4 sm:$0xff]  }
 0x626   : > { %8054 = vtanh.f32 %v3807_v28  ;;  %v7819_v12 = vld [vmem:[#allocation15 + $0xf0] ss:$8 sps:$4 sm:$0xff]   ;;  %v7824_v28 = vld [vmem:[#allocation15 + $0x204] ss:$8 sps:$4 sm:$0xff]  }
 0x627   : > { %8056 = vtanh.f32 %v3808_v33  ;;  %v7827_v33 = vld [vmem:[#allocation15 + $0x214] ss:$8 sps:$4 sm:$0xff]  }
 0x630   : > { %v8055_v35 = vpop.eup %8054 }
 0x631   : > { %v8057_v36 = vpop.eup %8056  ;;  %v3811_v37 = vpack.c.bf16 %v8055_v35, %v8055_v35 }
 0x632   : > { %v3812_v38 = vpack.c.bf16 %v8057_v36, %v8057_v36  ;;  %v6581_v39 = vpack.c.bf16 %v8057_v36, %v8055_v35  ;;  %v7825_v35 = vld [vmem:[#allocation15 + $0x210] ss:$8 sps:$4 sm:$0xff]   ;;  %v7830_v36 = vld [vmem:[#allocation15 + $0x224] ss:$8 sps:$4 sm:$0xff]  }
 0x633   : > { %v3836_v42 = vrot.slane %v3811_v37, 6  ;;  %v7828_v37 = vld [vmem:[#allocation15 + $0x220] ss:$8 sps:$4 sm:$0xff]  }
 0x634   : > { %v3823_v41 = vrot.slane %v6581_v39, %v8688_v14  ;;  %v3837_v55 = vrot.slane %v3812_v38, 6  ;;  %v7833_v38 = vld [vmem:[#allocation15 + $0x234] ss:$8 sps:$4 sm:$0xff]   ;;  %v7831_v39 = vld [vmem:[#allocation15 + $0x230] ss:$8 sps:$4 sm:$0xff]  }
 0x635   : > { %v8821_v17 = vsel %vm518_vm0, %v6582_v34, %v3836_v42  ;;  %v7834_v42 = vld [vmem:[#allocation15 + $0x240] ss:$8 sps:$4 sm:$0xff]  }
 0x636   : > { %v3824_v18 = vcombine.high %v3823_v41, %v3823_v41  ;;  %v8824_v54 = vsel %vm518_vm0, %v3835_v40, %v3837_v55  ;;  %v3911_v43 = vshrl.u32 %v8821_v17, 16  ;;  %v3913_v45 = vshll.u32 %v8821_v17, 16  ;;  %v7836_v40 = vld [vmem:[#allocation15 + $0x244] ss:$8 sps:$4 sm:$0xff]   ;;  %v7839_v41 = vld [vmem:[#allocation15 + $0x254] ss:$8 sps:$4 sm:$0xff]  }
 0x637   : > { %v3917_v46 = vshrl.u32 %v8824_v54, 16  ;;  %v3919_v47 = vshll.u32 %v8824_v54, 16  ;;  %v4363_v34 = vrot.slane %v8824_v54, 1  ;;  %v7837_v55 = vld [vmem:[#allocation15 + $0x250] ss:$8 sps:$4 sm:$0xff]  }
 0x638   : > { %3826 = vst [vmem:[#allocation5] sm:$0xf] %v3824_v18  ;;  %v3915_v48 = vrot.slane %v3913_v45, 1  ;;  %v8830_v49 = vrot.slane %v3911_v43, 1  ;;  %v8832_v52 = vrot.slane %v3913_v45, 2 }
 0x639   : > { %v3921_v56 = vrot.slane %v3919_v47, 1  ;;  %v8834_v57 = vrot.slane %v3917_v46, 1  ;;  %v8836_v20 = vrot.slane %v3919_v47, 2  ;;  %v7842_v18 = vld [vmem:[#allocation15 + $0x264] ss:$8 sps:$4 sm:$0xff]  }
 0x63a   : > { %v4604_v53 = vor.u32 %v8832_v52, %v8830_v49  ;;  %v3916_v32 = vor.u32 %v3915_v48, %v3911_v43  ;;  %v7840_v43 = vld [vmem:[#allocation15 + $0x260] ss:$8 sps:$4 sm:$0xff]   ;;  %v7845_v45 = vld [vmem:[#allocation15 + $0x274] ss:$8 sps:$4 sm:$0xff]   ;;  %v7848_v47 = vld [vmem:[#allocation15 + $0x284] ss:$8 sps:$4 sm:$0xff]  }
 0x63b   : > { %v3922_v22 = vor.u32 %v3921_v56, %v3917_v46  ;;  %v4607_v30 = vor.u32 %v8836_v20, %v8834_v57  ;;  %v7843_v46 = vld [vmem:[#allocation15 + $0x270] ss:$8 sps:$4 sm:$0xff]   ;;  %v7846_v48 = vld [vmem:[#allocation15 + $0x280] ss:$8 sps:$4 sm:$0xff]   ;;  %v7851_v56 = vld [vmem:[#allocation15 + $0x294] ss:$8 sps:$4 sm:$0xff]  }
 0x63c   : > { %v7885_v57 = vld [vmem:[#allocation15 + $0x350] ss:$8 sps:$4 sm:$0xff]   ;;  %v7890_v20 = vld [vmem:[#allocation15 + $0x364] ss:$8 sps:$4 sm:$0xff]  }
 0x63d   : > { %4117 = vmatprep.mubr.bf16.mxu1 %v3922_v22  ;;  %v7849_v22 = vld [vmem:[#allocation15 + $0x290] ss:$8 sps:$4 sm:$0xff]   ;;  %v7938_v52 = vld [vmem:[#allocation15 + $0x464] ss:$8 sps:$4 sm:$0xff]  }
 0x63e   : > { %4118 = vmatmul.mubr.bf16.vlgmr.msra.gmra.mrb[4].mxu1 %v3916_v32  ;;  %v7852_v32 = vld [vmem:[#allocation15 + $0x2a0] ss:$8 sps:$4 sm:$0xff]   ;;  %v7933_v49 = vld [vmem:[#allocation15 + $0x450] ss:$8 sps:$4 sm:$0xff]  }
 0x63f   : > { %4287 = vmatpush1.bf16.msra.mxu1 %v7774_v29  ;;  %4318 = vmatprep.mubr.bf16.mxu1 %v8824_v54  ;;  %v7854_v29 = vld [vmem:[#allocation15 + $0x2a4] ss:$8 sps:$4 sm:$0xff]  }
 0x640   : > { %4288 = vmatprep.subr.bf16.mxu1 %v7779_v0  ;;  %v7857_v0 = vld [vmem:[#allocation15 + $0x2b4] ss:$8 sps:$4 sm:$0xff]  }
 0x643   : > { %4289 = vmatpush1.bf16.msra.mxu1 %v7777_v59  ;;  %v7855_v59 = vld [vmem:[#allocation15 + $0x2b0] ss:$8 sps:$4 sm:$0xff]  }
 0x644   : > { %4290 = vmatprep.subr.bf16.mxu1 %v7782_v60  ;;  %v7860_v60 = vld [vmem:[#allocation15 + $0x2c4] ss:$8 sps:$4 sm:$0xff]  }
 0x647   : > { %4291 = vmatpush1.bf16.msra.mxu1 %v7780_v61  ;;  %v7858_v61 = vld [vmem:[#allocation15 + $0x2c0] ss:$8 sps:$4 sm:$0xff]  }
 0x648   : > { %4292 = vmatprep.subr.bf16.mxu1 %v7785_v62  ;;  %v7863_v62 = vld [vmem:[#allocation15 + $0x2d4] ss:$8 sps:$4 sm:$0xff]  }
 0x64b   : > { %4293 = vmatpush1.bf16.msra.mxu1 %v7783_v63  ;;  %v7861_v63 = vld [vmem:[#allocation15 + $0x2d0] ss:$8 sps:$4 sm:$0xff]  }
 0x64c   : > { %4294 = vmatprep.subr.bf16.mxu1 %v7788_v1  ;;  %v7866_v1 = vld [vmem:[#allocation15 + $0x2e4] ss:$8 sps:$4 sm:$0xff]  }
 0x64f   : > { %4295 = vmatpush1.bf16.msra.mxu1 %v7786_v2  ;;  %v7864_v2 = vld [vmem:[#allocation15 + $0x2e0] ss:$8 sps:$4 sm:$0xff]  }
 0x650   : > { %4296 = vmatprep.subr.bf16.mxu1 %v7791_v3  ;;  %v7869_v3 = vld [vmem:[#allocation15 + $0x2f4] ss:$8 sps:$4 sm:$0xff]  }
 0x653   : > { %4297 = vmatpush1.bf16.msra.mxu1 %v7789_v4  ;;  %v7867_v4 = vld [vmem:[#allocation15 + $0x2f0] ss:$8 sps:$4 sm:$0xff]  }
 0x654   : > { %4298 = vmatprep.subr.bf16.mxu1 %v7794_v5  ;;  %v7872_v5 = vld [vmem:[#allocation15 + $0x304] ss:$8 sps:$4 sm:$0xff]  }
 0x657   : > { %4299 = vmatpush1.bf16.msra.mxu1 %v7792_v24  ;;  %v7870_v24 = vld [vmem:[#allocation15 + $0x300] ss:$8 sps:$4 sm:$0xff]  }
 0x658   : > { %4300 = vmatprep.subr.bf16.mxu1 %v7797_v6  ;;  %v4362_v6 = vrot.slane %v8821_v17, 1 }
 0x65b   : > { %4301 = vmatpush1.bf16.msra.mxu1 %v7795_v7  ;;  %v7875_v7 = vld [vmem:[#allocation15 + $0x314] ss:$8 sps:$4 sm:$0xff]  }
 0x65c   : > { %4302 = vmatprep.subr.bf16.mxu1 %v7800_v50  ;;  %v7966_v50 = vld [vmem:[#allocation16 + $0xc0] sm:$0xff]  }
 0x65d   : > { %6832 = vmatprep.subr.bf16.mxu0 %v7966_v50  ;;  %v7962_v50 = vld [vmem:[#allocation15 + $0x4e4] ss:$8 sps:$4 sm:$0xff]  }
 0x65f   : > { %4303 = vmatpush1.bf16.msra.mxu1 %v7798_v44  ;;  %v7967_v44 = vld [vmem:[#allocation16 + $0x80] sm:$0xff]  }
 0x660   : > { %4304 = vmatprep.subr.bf16.mxu1 %v7803_v51  ;;  %v7873_v51 = vld [vmem:[#allocation15 + $0x310] ss:$8 sps:$4 sm:$0xff]   ;;  %6833 = vmatpush3.bf16.msra.mxu0 %v7967_v44  ;;  %v7960_v44 = vld [vmem:[#allocation15 + $0x4e0] ss:$8 sps:$4 sm:$0xff]  }
 0x663   : > { %4305 = vmatpush1.bf16.msra.mxu1 %v7801_v8  ;;  %v7878_v8 = vld [vmem:[#allocation15 + $0x324] ss:$8 sps:$4 sm:$0xff]  }
 0x664   : > { %4306 = vmatprep.subr.bf16.mxu1 %v7806_v9  ;;  %v7876_v9 = vld [vmem:[#allocation15 + $0x320] ss:$8 sps:$4 sm:$0xff]  }
 0x667   : > { %4307 = vmatpush1.bf16.msra.mxu1 %v7804_v10  ;;  %v7881_v10 = vld [vmem:[#allocation15 + $0x334] ss:$8 sps:$4 sm:$0xff]  }
 0x668   : > { %4308 = vmatprep.subr.bf16.mxu1 %v7809_v13  ;;  %v7879_v13 = vld [vmem:[#allocation15 + $0x330] ss:$8 sps:$4 sm:$0xff]  }
 0x66b   : > { %4309 = vmatpush1.bf16.msra.mxu1 %v7807_v16  ;;  %v7884_v16 = vld [vmem:[#allocation15 + $0x344] ss:$8 sps:$4 sm:$0xff]  }
 0x66c   : > { %4310 = vmatprep.subr.bf16.mxu1 %v7812_v19  ;;  %v7882_v19 = vld [vmem:[#allocation15 + $0x340] ss:$8 sps:$4 sm:$0xff]  }
 0x66f   : > { %4311 = vmatpush1.bf16.msra.mxu1 %v7810_v58  ;;  %v7887_v58 = vld [vmem:[#allocation15 + $0x354] ss:$8 sps:$4 sm:$0xff]  }
 0x670   : > { %4312 = vmatprep.subr.bf16.mxu1 %v7815_v21  ;;  %v7893_v21 = vld [vmem:[#allocation15 + $0x374] ss:$8 sps:$4 sm:$0xff]  }
 0x673   : > { %4313 = vmatpush1.bf16.msra.mxu1 %v7813_v23  ;;  %v7891_v23 = vld [vmem:[#allocation15 + $0x370] ss:$8 sps:$4 sm:$0xff]  }
 0x674   : > { %4314 = vmatprep.subr.bf16.mxu1 %v7818_v25  ;;  %v7896_v25 = vld [vmem:[#allocation15 + $0x384] ss:$8 sps:$4 sm:$0xff]  }
 0x677   : > { %4315 = vmatpush1.bf16.msra.mxu1 %v7816_v26  ;;  %v7894_v26 = vld [vmem:[#allocation15 + $0x380] ss:$8 sps:$4 sm:$0xff]  }
 0x678   : > { %4316 = vmatprep.subr.bf16.mxu1 %v7821_v27  ;;  %v7899_v27 = vld [vmem:[#allocation15 + $0x394] ss:$8 sps:$4 sm:$0xff]  }
 0x67b   : > { %4317 = vmatpush1.bf16.msra.mxu1 %v7819_v12  ;;  %v7897_v12 = vld [vmem:[#allocation15 + $0x390] ss:$8 sps:$4 sm:$0xff]  }
 0x67c   : > { %4526 = vmatprep.subr.bf16.mxu1 %v7824_v28  ;;  %v7902_v28 = vld [vmem:[#allocation15 + $0x3a4] ss:$8 sps:$4 sm:$0xff]  }
 0x67e   : > { %4319 = vmatmul.mubr.bf16.vlgmr.msra.gmra.mrb[4].mxu1 %v8821_v17 }
 0x67f   : > { %4527 = vmatpush1.bf16.msra.mxu1 %v7822_v31  ;;  %4558 = vmatprep.mubr.bf16.mxu1 %v4363_v34  ;;  %v7900_v31 = vld [vmem:[#allocation15 + $0x3a0] ss:$8 sps:$4 sm:$0xff]   ;;  %v7903_v34 = vld [vmem:[#allocation15 + $0x3b0] ss:$8 sps:$4 sm:$0xff]  }
 0x680   : > { %4528 = vmatprep.subr.bf16.mxu1 %v7827_v33  ;;  %v7905_v33 = vld [vmem:[#allocation15 + $0x3b4] ss:$8 sps:$4 sm:$0xff]  }
 0x683   : > { %4529 = vmatpush1.bf16.msra.mxu1 %v7825_v35  ;;  %v7908_v35 = vld [vmem:[#allocation15 + $0x3c4] ss:$8 sps:$4 sm:$0xff]  }
 0x684   : > { %4530 = vmatprep.subr.bf16.mxu1 %v7830_v36  ;;  %v7906_v36 = vld [vmem:[#allocation15 + $0x3c0] ss:$8 sps:$4 sm:$0xff]  }
 0x687   : > { %4531 = vmatpush1.bf16.msra.mxu1 %v7828_v37  ;;  %v7911_v37 = vld [vmem:[#allocation15 + $0x3d4] ss:$8 sps:$4 sm:$0xff]  }
 0x688   : > { %4532 = vmatprep.subr.bf16.mxu1 %v7833_v38  ;;  %v7909_v38 = vld [vmem:[#allocation15 + $0x3d0] ss:$8 sps:$4 sm:$0xff]  }
 0x68b   : > { %4533 = vmatpush1.bf16.msra.mxu1 %v7831_v39  ;;  %v7914_v39 = vld [vmem:[#allocation15 + $0x3e4] ss:$8 sps:$4 sm:$0xff]  }
 0x68c   : > { %4534 = vmatprep.subr.bf16.mxu1 %v7836_v40  ;;  %v7912_v40 = vld [vmem:[#allocation15 + $0x3e0] ss:$8 sps:$4 sm:$0xff]  }
 0x68f   : > { %4535 = vmatpush1.bf16.msra.mxu1 %v7834_v42  ;;  %v7917_v42 = vld [vmem:[#allocation15 + $0x3f4] ss:$8 sps:$4 sm:$0xff]  }
 0x690   : > { %4536 = vmatprep.subr.bf16.mxu1 %v7839_v41  ;;  %v7915_v41 = vld [vmem:[#allocation15 + $0x3f0] ss:$8 sps:$4 sm:$0xff]  }
 0x693   : > { %4537 = vmatpush1.bf16.msra.mxu1 %v7837_v55  ;;  %v7920_v55 = vld [vmem:[#allocation15 + $0x404] ss:$8 sps:$4 sm:$0xff]  }
 0x694   : > { %4538 = vmatprep.subr.bf16.mxu1 %v7842_v18  ;;  %v7918_v18 = vld [vmem:[#allocation15 + $0x400] ss:$8 sps:$4 sm:$0xff]  }
 0x697   : > { %4539 = vmatpush1.bf16.msra.mxu1 %v7840_v43  ;;  %v7923_v43 = vld [vmem:[#allocation15 + $0x414] ss:$8 sps:$4 sm:$0xff]  }
 0x698   : > { %4540 = vmatprep.subr.bf16.mxu1 %v7845_v45  ;;  %v4847_v45 = vrot.slane %v8824_v54, 2  ;;  %v7935_v54 = vld [vmem:[#allocation15 + $0x454] ss:$8 sps:$4 sm:$0xff]  }
 0x69b   : > { %4541 = vmatpush1.bf16.msra.mxu1 %v7843_v46  ;;  %v7921_v46 = vld [vmem:[#allocation15 + $0x410] ss:$8 sps:$4 sm:$0xff]  }
 0x69c   : > { %4542 = vmatprep.subr.bf16.mxu1 %v7848_v47  ;;  %v7926_v47 = vld [vmem:[#allocation15 + $0x424] ss:$8 sps:$4 sm:$0xff]  }
 0x69f   : > { %4543 = vmatpush1.bf16.msra.mxu1 %v7846_v48  ;;  %v7924_v48 = vld [vmem:[#allocation15 + $0x420] ss:$8 sps:$4 sm:$0xff]  }
 0x6a0   : > { %4544 = vmatprep.subr.bf16.mxu1 %v7851_v56  ;;  %v7929_v56 = vld [vmem:[#allocation15 + $0x434] ss:$8 sps:$4 sm:$0xff]  }
 0x6a3   : > { %4545 = vmatpush1.bf16.msra.mxu1 %v7849_v22  ;;  %v7927_v22 = vld [vmem:[#allocation15 + $0x430] ss:$8 sps:$4 sm:$0xff]  }
 0x6a4   : > { %4546 = vmatprep.subr.bf16.mxu1 %v7854_v29  ;;  %v7932_v29 = vld [vmem:[#allocation15 + $0x444] ss:$8 sps:$4 sm:$0xff]  }
 0x6a7   : > { %4547 = vmatpush1.bf16.msra.mxu1 %v7852_v32  ;;  %v7930_v32 = vld [vmem:[#allocation15 + $0x440] ss:$8 sps:$4 sm:$0xff]  }
 0x6a8   : > { %4548 = vmatprep.subr.bf16.mxu1 %v7857_v0  ;;  %v7941_v0 = vld [vmem:[#allocation15 + $0x474] ss:$8 sps:$4 sm:$0xff]  }
 0x6ab   : > { %4549 = vmatpush1.bf16.msra.mxu1 %v7855_v59  ;;  %v7939_v59 = vld [vmem:[#allocation15 + $0x470] ss:$8 sps:$4 sm:$0xff]  }
 0x6ac   : > { %4550 = vmatprep.subr.bf16.mxu1 %v7860_v60  ;;  %v7944_v60 = vld [vmem:[#allocation15 + $0x484] ss:$8 sps:$4 sm:$0xff]  }
 0x6af   : > { %4551 = vmatpush1.bf16.msra.mxu1 %v7858_v61  ;;  %v7942_v61 = vld [vmem:[#allocation15 + $0x480] ss:$8 sps:$4 sm:$0xff]  }
 0x6b0   : > { %4552 = vmatprep.subr.bf16.mxu1 %v7863_v62  ;;  %v7947_v62 = vld [vmem:[#allocation15 + $0x494] ss:$8 sps:$4 sm:$0xff]  }
 0x6b3   : > { %4553 = vmatpush1.bf16.msra.mxu1 %v7861_v63  ;;  %v7945_v63 = vld [vmem:[#allocation15 + $0x490] ss:$8 sps:$4 sm:$0xff]  }
 0x6b4   : > { %4554 = vmatprep.subr.bf16.mxu1 %v7866_v1  ;;  %v7950_v1 = vld [vmem:[#allocation15 + $0x4a4] ss:$8 sps:$4 sm:$0xff]  }
 0x6b7   : > { %4555 = vmatpush1.bf16.msra.mxu1 %v7864_v2  ;;  %v7948_v2 = vld [vmem:[#allocation15 + $0x4a0] ss:$8 sps:$4 sm:$0xff]  }
 0x6b8   : > { %4556 = vmatprep.subr.bf16.mxu1 %v7869_v3  ;;  %v7953_v3 = vld [vmem:[#allocation15 + $0x4b4] ss:$8 sps:$4 sm:$0xff]  }
 0x6bb   : > { %4557 = vmatpush1.bf16.msra.mxu1 %v7867_v4  ;;  %v7951_v4 = vld [vmem:[#allocation15 + $0x4b0] ss:$8 sps:$4 sm:$0xff]  }
 0x6bc   : > { %4770 = vmatprep.subr.bf16.mxu1 %v7872_v5  ;;  %v7956_v5 = vld [vmem:[#allocation15 + $0x4c4] ss:$8 sps:$4 sm:$0xff]  }
 0x6be   : > { %4559 = vmatmul.mubr.bf16.vlgmr.msra.gmra.mrb[4].mxu1 %v4362_v6  ;;  %v7959_v6 = vld [vmem:[#allocation15 + $0x4d4] ss:$8 sps:$4 sm:$0xff]  }
 0x6bf   : > { %4771 = vmatpush1.bf16.msra.mxu1 %v7870_v24  ;;  %4802 = vmatprep.mubr.bf16.mxu1 %v4607_v30  ;;  %v7888_v30 = vld [vmem:[#allocation15 + $0x360] ss:$8 sps:$4 sm:$0xff]  }
 0x6c0   : > { %4772 = vmatprep.subr.bf16.mxu1 %v7875_v7  ;;  %v7954_v24 = vld [vmem:[#allocation15 + $0x4c0] ss:$8 sps:$4 sm:$0xff]   ;;  %v7957_v7 = vld [vmem:[#allocation15 + $0x4d0] ss:$8 sps:$4 sm:$0xff]  }
 0x6c3   : > { %4773 = vmatpush1.bf16.msra.mxu1 %v7873_v51  ;;  %v7965_v51 = vld [vmem:[#allocation15 + $0x4f4] ss:$8 sps:$4 sm:$0xff]  }
 0x6c4   : > { %4774 = vmatprep.subr.bf16.mxu1 %v7878_v8  ;;  %v7963_v8 = vld [vmem:[#allocation15 + $0x4f0] ss:$8 sps:$4 sm:$0xff]  }
 0x6c7   : > { %4775 = vmatpush1.bf16.msra.mxu1 %v7876_v9  ;;  %v4846_v9 = vrot.slane %v8821_v17, 2  ;;  %v7978_v17 = vld [vmem:[#allocation16 + $0xf0] sm:$0xff]  }
 0x6c8   : > { %4776 = vmatprep.subr.bf16.mxu1 %v7881_v10  ;;  %v7968_v10 = vld [vmem:[#allocation16 + $0xc8] sm:$0xff]  }
 0x6c9   : > { %6834 = vmatprep.subr.bf16.mxu0 %v7968_v10  ;;  %v7991_v10 = vld [vmem:[#allocation16 + $0x20] sm:$0xff]  }
 0x6cb   : > { %4777 = vmatpush1.bf16.msra.mxu1 %v7879_v13  ;;  %v7969_v13 = vld [vmem:[#allocation16 + $0x88] sm:$0xff]  }
 0x6cc   : > { %4778 = vmatprep.subr.bf16.mxu1 %v7884_v16  ;;  %6835 = vmatpush3.bf16.msra.mxu0 %v7969_v13  ;;  %v7970_v16 = vld [vmem:[#allocation16 + $0xd0] sm:$0xff]   ;;  %v7992_v13 = vld [vmem:[#allocation16 + $0x68] sm:$0xff]  }
 0x6cd   : > { %6836 = vmatprep.subr.bf16.mxu0 %v7970_v16  ;;  %v7993_v16 = vld [vmem:[#allocation16 + $0x28] sm:$0xff]  }
 0x6cf   : > { %4779 = vmatpush1.bf16.msra.mxu1 %v7882_v19  ;;  %v7971_v19 = vld [vmem:[#allocation16 + $0x90] sm:$0xff]  }
 0x6d0   : > { %4780 = vmatprep.subr.bf16.mxu1 %v7887_v58  ;;  %6837 = vmatpush3.bf16.msra.mxu0 %v7971_v19  ;;  %v7972_v58 = vld [vmem:[#allocation16 + $0xd8] sm:$0xff]   ;;  %v7994_v19 = vld [vmem:[#allocation16 + $0x70] sm:$0xff]  }
 0x6d1   : > { %6838 = vmatprep.subr.bf16.mxu0 %v7972_v58  ;;  %v7995_v58 = vld [vmem:[#allocation16 + $0x30] sm:$0xff]  }
 0x6d3   : > { %4781 = vmatpush1.bf16.msra.mxu1 %v7885_v57  ;;  %v7973_v57 = vld [vmem:[#allocation16 + $0x98] sm:$0xff]  }
 0x6d4   : > { %4782 = vmatprep.subr.bf16.mxu1 %v7890_v20  ;;  %6839 = vmatpush3.bf16.msra.mxu0 %v7973_v57  ;;  %v7974_v20 = vld [vmem:[#allocation16 + $0xe0] sm:$0xff]   ;;  %v7996_v57 = vld [vmem:[#allocation16 + $0x78] sm:$0xff]  }
 0x6d5   : > { %6840 = vmatprep.subr.bf16.mxu0 %v7974_v20  ;;  %v7997_v20 = vld [vmem:[#allocation16 + $0x38] sm:$0xff]  }
 0x6d7   : > { %4783 = vmatpush1.bf16.msra.mxu1 %v7888_v30  ;;  %v7975_v30 = vld [vmem:[#allocation16 + $0xa0] sm:$0xff]  }
 0x6d8   : > { %4784 = vmatprep.subr.bf16.mxu1 %v7893_v21  ;;  %6841 = vmatpush3.bf16.msra.mxu0 %v7975_v30  ;;  %v7976_v21 = vld [vmem:[#allocation16 + $0xe8] sm:$0xff]   ;;  %v7998_v30 = vld [vmem:[#allocation16 + $0x140] sm:$0xff]  }
 0x6d9   : > { %6842 = vmatprep.subr.bf16.mxu0 %v7976_v21  ;;  %v7999_v21 = vld [vmem:[#allocation16 + $0x100] sm:$0xff]  }
 0x6db   : > { %4785 = vmatpush1.bf16.msra.mxu1 %v7891_v23  ;;  %v7977_v23 = vld [vmem:[#allocation16 + $0xa8] sm:$0xff]  }
 0x6dc   : > { %4786 = vmatprep.subr.bf16.mxu1 %v7896_v25  ;;  %6843 = vmatpush3.bf16.msra.mxu0 %v7977_v23  ;;  %v7979_v25 = vld [vmem:[#allocation16 + $0xb0] sm:$0xff]   ;;  %v8000_v23 = vld [vmem:[#allocation16 + $0x148] sm:$0xff]  }
 0x6dd   : > { %6844 = vmatprep.subr.bf16.mxu0 %v7978_v17 }
 0x6df   : > { %4787 = vmatpush1.bf16.msra.mxu1 %v7894_v26  ;;  %v7980_v26 = vld [vmem:[#allocation16 + $0xf8] sm:$0xff]  }
 0x6e0   : > { %4788 = vmatprep.subr.bf16.mxu1 %v7899_v27  ;;  %6845 = vmatpush3.bf16.msra.mxu0 %v7979_v25  ;;  %v7981_v27 = vld [vmem:[#allocation16 + $0xb8] sm:$0xff]   ;;  %v8001_v25 = vld [vmem:[#allocation16 + $0x108] sm:$0xff]  }
 0x6e1   : > { %6846 = vmatprep.subr.bf16.mxu0 %v7980_v26  ;;  %v8002_v26 = vld [vmem:[#allocation16 + $0x150] sm:$0xff]  }
 0x6e3   : > { %4789 = vmatpush1.bf16.msra.mxu1 %v7897_v12  ;;  %v7982_v12 = vld [vmem:[#allocation16 + $0x40] sm:$0xff]  }
 0x6e4   : > { %4790 = vmatprep.subr.bf16.mxu1 %v7902_v28  ;;  %6847 = vmatpush3.bf16.msra.mxu0 %v7981_v27  ;;  %v5053_v28 = vld [vmem:[%s9005_s25] ss:$2 sm:$0x3]  ;;  %v8003_v27 = vld [vmem:[#allocation16 + $0x110] sm:$0xff]  }
 0x6e5   : > { %6854 = vmatprep.subr.bf16.mxu0 %v7982_v12  ;;  %v8004_v12 = vld [vmem:[#allocation16 + $0x158] sm:$0xff]  }
 0x6e7   : > { %4791 = vmatpush1.bf16.msra.mxu1 %v7900_v31  ;;  %v6743_v31 = vld [vmem:[%s9005_s25 + $0x1] ss:$2 sm:$0x3] }
 0x6e8   : > { %4792 = vmatprep.subr.bf16.mxu1 %v7905_v33  ;;  %v5060_v33 = vrot.slane %v5053_v28, %v8714_v11 }
 0x6eb   : > { %4793 = vmatpush1.bf16.msra.mxu1 %v7903_v34  ;;  %v5064_v34 = vrot.slane %v5053_v28, %v8720_v15  ;;  %v8005_v28 = vld [vmem:[#allocation16 + $0x118] sm:$0xff]  }
 0x6ec   : > { %4794 = vmatprep.subr.bf16.mxu1 %v7908_v35  ;;  %v5073_v35 = vrot.slane %v6743_v31, %v8714_v11 }
 0x6ef   : > { %4795 = vmatpush1.bf16.msra.mxu1 %v7906_v36 }
 0x6f0   : > { %4796 = vmatprep.subr.bf16.mxu1 %v7911_v37  ;;  %v5077_v37 = vrot.slane %v6743_v31, %v8720_v15  ;;  %v8006_v31 = vld [vmem:[#allocation16 + $0x160] sm:$0xff]  }
 0x6f3   : > { %4797 = vmatpush1.bf16.msra.mxu1 %v7909_v38 }
 0x6f4   : > { %4798 = vmatprep.subr.bf16.mxu1 %v7914_v39 }
 0x6f7   : > { %4799 = vmatpush1.bf16.msra.mxu1 %v7912_v40 }
 0x6f8   : > { %4800 = vmatprep.subr.bf16.mxu1 %v7917_v42 }
 0x6fb   : > { %4801 = vmatpush1.bf16.msra.mxu1 %v7915_v41 }
 0x6fc   : > { %5010 = vmatprep.subr.bf16.mxu1 %v7920_v55 }
 0x6fe   : > { %4803 = vmatmul.mubr.bf16.vlgmr.msra.gmra.mrb[4].mxu1 %v4604_v53  ;;  %v7936_v53 = vld [vmem:[#allocation15 + $0x460] ss:$8 sps:$4 sm:$0xff]  }
 0x6ff   : > { %5011 = vmatpush1.bf16.msra.mxu1 %v7918_v18  ;;  %5042 = vmatprep.mubr.bf16.mxu1 %v4847_v45 }
 0x700   : > { %5012 = vmatprep.subr.bf16.mxu1 %v7923_v43  ;;  %v6745_v43 = vld.sshfl [vmem:[#allocation6] sm:$0x33 pattern:$0x76325410] }
 0x703   : > { %5013 = vmatpush1.bf16.msra.mxu1 %v7921_v46 }
 0x704   : > { %5014 = vmatprep.subr.bf16.mxu1 %v7926_v47 }
 0x707   : > { %5015 = vmatpush1.bf16.msra.mxu1 %v7924_v48 }
 0x708   : > { %5016 = vmatprep.subr.bf16.mxu1 %v7929_v56 }
 0x70b   : > { %5017 = vmatpush1.bf16.msra.mxu1 %v7927_v22  ;;  %v5108_v22 = vcombine.high %v6745_v43, %v6745_v43 }
 0x70c   : > { %5018 = vmatprep.subr.bf16.mxu1 %v7932_v29 }
 0x70f   : > { %5019 = vmatpush1.bf16.msra.mxu1 %v7930_v32 }
 0x710   : > { %5020 = vmatprep.subr.bf16.mxu1 %v7935_v54 }
 0x713   : > { %5021 = vmatpush1.bf16.msra.mxu1 %v7933_v49 }
 0x714   : > { %5022 = vmatprep.subr.bf16.mxu1 %v7938_v52 }
 0x717   : > { %5023 = vmatpush1.bf16.msra.mxu1 %v7936_v53 }
 0x718   : > { %5024 = vmatprep.subr.bf16.mxu1 %v7941_v0 }
 0x71b   : > { %5025 = vmatpush1.bf16.msra.mxu1 %v7939_v59 }
 0x71c   : > { %5026 = vmatprep.subr.bf16.mxu1 %v7944_v60 }
 0x71f   : > { %5027 = vmatpush1.bf16.msra.mxu1 %v7942_v61 }
 0x720   : > { %5028 = vmatprep.subr.bf16.mxu1 %v7947_v62 }
 0x723   : > { %5029 = vmatpush1.bf16.msra.mxu1 %v7945_v63 }
 0x724   : > { %5030 = vmatprep.subr.bf16.mxu1 %v7950_v1 }
 0x727   : > { %5031 = vmatpush1.bf16.msra.mxu1 %v7948_v2 }
 0x728   : > { %5032 = vmatprep.subr.bf16.mxu1 %v7953_v3 }
 0x72b   : > { %5033 = vmatpush1.bf16.msra.mxu1 %v7951_v4  ;;  %v7983_v4 = vld [vmem:[#allocation16] sm:$0xff]  }
 0x72c   : > { %5034 = vmatprep.subr.bf16.mxu1 %v7956_v5 }
 0x72f   : > { %5035 = vmatpush1.bf16.msra.mxu1 %v7954_v24 }
 0x730   : > { %5036 = vmatprep.subr.bf16.mxu1 %v7959_v6  ;;  %v7984_v6 = vld [vmem:[#allocation16 + $0x48] sm:$0xff]  }
 0x733   : > { %5037 = vmatpush1.bf16.msra.mxu1 %v7957_v7  ;;  %v7985_v7 = vld [vmem:[#allocation16 + $0x8] sm:$0xff]  }
 0x734   : > { %5038 = vmatprep.subr.bf16.mxu1 %v7962_v50  ;;  %v7986_v50 = vld [vmem:[#allocation16 + $0x50] sm:$0xff]  }
 0x737   : > { %5039 = vmatpush1.bf16.msra.mxu1 %v7960_v44  ;;  %v7987_v44 = vld [vmem:[#allocation16 + $0x10] sm:$0xff]  }
 0x738   : > { %5040 = vmatprep.subr.bf16.mxu1 %v7965_v51  ;;  %v7988_v51 = vld [vmem:[#allocation16 + $0x58] sm:$0xff]  }
 0x73b   : > { %5041 = vmatpush1.bf16.msra.mxu1 %v7963_v8  ;;  %v7989_v8 = vld [vmem:[#allocation16 + $0x18] sm:$0xff]  }
 0x73e   : > { %5043 = vmatmul.mubr.bf16.vlgmr.msra.gmra.mrb[4].mxu1 %v4846_v9  ;;  %v7990_v9 = vld [vmem:[#allocation16 + $0x60] sm:$0xff]  }
 0x811   : > { %v5044_v36 = vpop.f32.mrb[4].mxu1 }
 0x812   : > { %v5067_v38 = vmul.f32 %v5060_v33, %v5044_v36  ;;  %v5046_v39 = vpop.f32.mrb[5].mxu1  ;;  %v8007_v33 = vld [vmem:[#allocation16 + $0x120] sm:$0xff]   ;;  %v8010_v36 = vld [vmem:[#allocation16 + $0x170] sm:$0xff]  }
 0x813   : > { %v5068_v40 = vmul.f32 %v5064_v34, %v5046_v39  ;;  %v5048_v42 = vpop.f32.mrb[6].mxu1  ;;  %v8008_v34 = vld [vmem:[#allocation16 + $0x168] sm:$0xff]   ;;  %v8013_v39 = vld [vmem:[#allocation16 + $0x138] sm:$0xff]  }
 0x814   : > { %v5080_v41 = vadd.f32 %v5073_v35, %v5067_v38  ;;  %v5049_v55 = vpop.f32.mrb[7].mxu1  ;;  %v8009_v35 = vld [vmem:[#allocation16 + $0x128] sm:$0xff]   ;;  %v8012_v38 = vld [vmem:[#allocation16 + $0x178] sm:$0xff]   ;;  %v8015_v42 = vld [vmem:[#allocation16 + $0x180] sm:$0xff]  }
 0x815   : > { %v5081_v18 = vadd.f32 %v5077_v37, %v5068_v40  ;;  %v8011_v37 = vld [vmem:[#allocation16 + $0x130] sm:$0xff]   ;;  %v8014_v40 = vld [vmem:[#allocation16 + $0x1c0] sm:$0xff]   ;;  %v8016_v55 = vld [vmem:[#allocation16 + $0x1c8] sm:$0xff]  }
 0x816   : > { %8058 = vtanh.f32 %v5080_v41 }
 0x817   : > { %8060 = vtanh.f32 %v5081_v18  ;;  %v8017_v18 = vld [vmem:[#allocation16 + $0x188] sm:$0xff]  }
 0x820   : > { %v8059_v45 = vpop.eup %8058 }
 0x821   : > { %v8061_v46 = vpop.eup %8060  ;;  %v5084_v47 = vpack.c.bf16 %v8059_v45, %v8059_v45 }
 0x822   : > { %v5085_v48 = vpack.c.bf16 %v8061_v46, %v8061_v46  ;;  %v6744_v56 = vpack.c.bf16 %v8061_v46, %v8059_v45  ;;  %v8019_v45 = vld [vmem:[#allocation16 + $0x190] sm:$0xff]   ;;  %v8020_v46 = vld [vmem:[#allocation16 + $0x1d8] sm:$0xff]  }
 0x823   : > { %v5109_v11 = vrot.slane %v5084_v47, 6  ;;  %v8021_v47 = vld [vmem:[#allocation16 + $0x198] sm:$0xff]  }
 0x824   : > { %v5096_v29 = vrot.slane %v6744_v56, %v8688_v14  ;;  %v5110_v15 = vrot.slane %v5085_v48, 6  ;;  %v8022_v48 = vld [vmem:[#allocation16 + $0x1e0] sm:$0xff]  }
 0x825   : > { %v8866_v32 = vsel %vm518_vm0, %v6745_v43, %v5109_v11  ;;  %v8018_v43 = vld [vmem:[#allocation16 + $0x1d0] sm:$0xff]   ;;  %v8023_v56 = vld [vmem:[#allocation16 + $0x1a0] sm:$0xff]   ;;  %v8025_v11 = vld [vmem:[#allocation16 + $0x1a8] sm:$0xff]  }
 0x826   : > { %v5097_v54 = vcombine.high %v5096_v29, %v5096_v29  ;;  %v8869_v49 = vsel %vm518_vm0, %v5108_v22, %v5110_v15  ;;  %v5184_v52 = vshrl.u32 %v8866_v32, 16  ;;  %v5186_v53 = vshll.u32 %v8866_v32, 16  ;;  %v8024_v22 = vld [vmem:[#allocation16 + $0x1e8] sm:$0xff]   ;;  %v8026_v29 = vld [vmem:[#allocation16 + $0x1f0] sm:$0xff]  }
 0x827   : > { %v5190_v0 = vshrl.u32 %v8869_v49, 16  ;;  %v5192_v59 = vshll.u32 %v8869_v49, 16  ;;  %v5506_v17 = vrot.slane %v8869_v49, 1  ;;  %v5505_v41 = vrot.slane %v8866_v32, 1  ;;  %v8027_v15 = vld [vmem:[#allocation16 + $0x1b0] sm:$0xff]  }
 0x828   : > { %5099 = vst [vmem:[#allocation6] sm:$0xf] %v5097_v54  ;;  %v5188_v60 = vrot.slane %v5186_v53, 1  ;;  %v8875_v61 = vrot.slane %v5184_v52, 1  ;;  %v8877_v14 = vrot.slane %v5186_v53, 2  ;;  %v8028_v54 = vld [vmem:[#allocation16 + $0x1f8] sm:$0xff]  }
 0x829   : > { %v5194_v62 = vrot.slane %v5192_v59, 1  ;;  %v8879_v63 = vrot.slane %v5190_v0, 1  ;;  %v8881_v1 = vrot.slane %v5192_v59, 2  ;;  %v8030_v53 = vld [vmem:[#allocation16 + $0x240] sm:$0xff]   ;;  %v8032_v59 = vld [vmem:[#allocation16 + $0x248] sm:$0xff]  }
 0x82a   : > { %v5681_v2 = vor.u32 %v8877_v14, %v8875_v61  ;;  %v5189_v24 = vor.u32 %v5188_v60, %v5184_v52  ;;  %v8029_v52 = vld [vmem:[#allocation16 + $0x1b8] sm:$0xff]   ;;  %v5858_v60 = vrot.slane %v8869_v49, 2  ;;  %v8041_v61 = vld [vmem:[#allocation16 + $0x228] sm:$0xff]   ;;  %v8042_v14 = vld [vmem:[#allocation16 + $0x270] sm:$0xff]  }
 0x82b   : > { %v5195_v3 = vor.u32 %v5194_v62, %v5190_v0  ;;  %v5684_v5 = vor.u32 %v8881_v1, %v8879_v63  ;;  %v8031_v0 = vld [vmem:[#allocation16 + $0x200] sm:$0xff]   ;;  %v8033_v62 = vld [vmem:[#allocation16 + $0x208] sm:$0xff]   ;;  %v8034_v63 = vld [vmem:[#allocation16 + $0x250] sm:$0xff]  }
 0x82c   : > { %v8035_v1 = vld [vmem:[#allocation16 + $0x210] sm:$0xff]  }
 0x82d   : > { %5326 = vmatprep.mubr.bf16.mxu0 %v5195_v3  ;;  %v8036_v3 = vld [vmem:[#allocation16 + $0x258] sm:$0xff]  }
 0x82e   : > { %5327 = vmatmul.mubr.bf16.vlgmr.msra.gmra.mrb[8].mxu0 %v5189_v24  ;;  %v8039_v24 = vld [vmem:[#allocation16 + $0x220] sm:$0xff]  }
 0x82f   : > { %6855 = vmatpush3.bf16.msra.mxu0 %v7983_v4  ;;  %5462 = vmatprep.mubr.bf16.mxu0 %v8869_v49  ;;  %v8037_v4 = vld [vmem:[#allocation16 + $0x218] sm:$0xff]   ;;  %v8040_v49 = vld [vmem:[#allocation16 + $0x268] sm:$0xff]  }
 0x830   : > { %6856 = vmatprep.subr.bf16.mxu0 %v7984_v6  ;;  %v8044_v6 = vld [vmem:[#allocation16 + $0x278] sm:$0xff]  }
 0x833   : > { %6857 = vmatpush3.bf16.msra.mxu0 %v7985_v7  ;;  %v8045_v7 = vld [vmem:[#allocation16 + $0x238] sm:$0xff]  }
 0x834   : > { %6858 = vmatprep.subr.bf16.mxu0 %v7986_v50  ;;  %v5857_v50 = vrot.slane %v8866_v32, 2 }
 0x837   : > { %6859 = vmatpush3.bf16.msra.mxu0 %v7987_v44 }
 0x838   : > { %6860 = vmatprep.subr.bf16.mxu0 %v7988_v51 }
 0x83b   : > { %6861 = vmatpush3.bf16.msra.mxu0 %v7989_v8 }
 0x83c   : > { %6862 = vmatprep.subr.bf16.mxu0 %v7990_v9 }
 0x83f   : > { %6863 = vmatpush3.bf16.msra.mxu0 %v7991_v10 }
 0x840   : > { %6864 = vmatprep.subr.bf16.mxu0 %v7992_v13 }
 0x843   : > { %6865 = vmatpush3.bf16.msra.mxu0 %v7993_v16 }
 0x844   : > { %6866 = vmatprep.subr.bf16.mxu0 %v7994_v19 }
 0x847   : > { %6867 = vmatpush3.bf16.msra.mxu0 %v7995_v58 }
 0x848   : > { %6868 = vmatprep.subr.bf16.mxu0 %v7996_v57 }
 0x84b   : > { %6869 = vmatpush3.bf16.msra.mxu0 %v7997_v20 }
 0x84c   : > { %6876 = vmatprep.subr.bf16.mxu0 %v7998_v30 }
 0x84e   : > { %5463 = vmatmul.mubr.bf16.vlgmr.msra.gmra.mrb[12].mxu0 %v8866_v32 }
 0x84f   : > { %6877 = vmatpush3.bf16.msra.mxu0 %v7999_v21  ;;  %5637 = vmatprep.mubr.bf16.mxu0 %v5506_v17 }
 0x850   : > { %6878 = vmatprep.subr.bf16.mxu0 %v8000_v23 }
 0x853   : > { %6879 = vmatpush3.bf16.msra.mxu0 %v8001_v25 }
 0x854   : > { %6880 = vmatprep.subr.bf16.mxu0 %v8002_v26 }
 0x857   : > { %6881 = vmatpush3.bf16.msra.mxu0 %v8003_v27 }
 0x858   : > { %6882 = vmatprep.subr.bf16.mxu0 %v8004_v12 }
 0x85b   : > { %6883 = vmatpush3.bf16.msra.mxu0 %v8005_v28 }
 0x85c   : > { %6884 = vmatprep.subr.bf16.mxu0 %v8006_v31 }
 0x85f   : > { %6885 = vmatpush3.bf16.msra.mxu0 %v8007_v33 }
 0x860   : > { %6886 = vmatprep.subr.bf16.mxu0 %v8008_v34 }
 0x863   : > { %6887 = vmatpush3.bf16.msra.mxu0 %v8009_v35 }
 0x864   : > { %6888 = vmatprep.subr.bf16.mxu0 %v8010_v36 }
 0x867   : > { %6889 = vmatpush3.bf16.msra.mxu0 %v8011_v37 }
 0x868   : > { %6890 = vmatprep.subr.bf16.mxu0 %v8012_v38  ;;  %v6826_v38 = vld [vmem:[%s9007_s10] ss:$0 sm:$0xff] }
 0x86b   : > { %6891 = vmatpush3.bf16.msra.mxu0 %v8013_v39 }
 0x86c   : > { %6898 = vmatprep.subr.bf16.mxu0 %v8014_v40 }
 0x86e   : > { %5638 = vmatmul.mubr.bf16.vlgmr.msra.gmra.mrb[16].mxu0 %v5505_v41 }
 0x86f   : > { %6899 = vmatpush3.bf16.msra.mxu0 %v8015_v42  ;;  %5815 = vmatprep.mubr.bf16.mxu0 %v5684_v5  ;;  %v8038_v5 = vld [vmem:[#allocation16 + $0x260] sm:$0xff]  }
 0x870   : > { %6900 = vmatprep.subr.bf16.mxu0 %v8016_v55  ;;  %v6827_v42 = vld [vmem:[%s9007_s10 + $0x1] ss:$0 sm:$0xff] }
 0x873   : > { %6901 = vmatpush3.bf16.msra.mxu0 %v8017_v18 }
 0x874   : > { %6902 = vmatprep.subr.bf16.mxu0 %v8018_v43 }
 0x877   : > { %6903 = vmatpush3.bf16.msra.mxu0 %v8019_v45 }
 0x878   : > { %6904 = vmatprep.subr.bf16.mxu0 %v8020_v46 }
 0x87b   : > { %6905 = vmatpush3.bf16.msra.mxu0 %v8021_v47 }
 0x87c   : > { %6906 = vmatprep.subr.bf16.mxu0 %v8022_v48 }
 0x87f   : > { %6907 = vmatpush3.bf16.msra.mxu0 %v8023_v56 }
 0x880   : > { %6908 = vmatprep.subr.bf16.mxu0 %v8024_v22 }
 0x883   : > { %6909 = vmatpush3.bf16.msra.mxu0 %v8025_v11 }
 0x884   : > { %6910 = vmatprep.subr.bf16.mxu0 %v8026_v29 }
 0x887   : > { %6911 = vmatpush3.bf16.msra.mxu0 %v8027_v15 }
 0x888   : > { %6912 = vmatprep.subr.bf16.mxu0 %v8028_v54 }
 0x88b   : > { %6913 = vmatpush3.bf16.msra.mxu0 %v8029_v52 }
 0x88c   : > { %6920 = vmatprep.subr.bf16.mxu0 %v8030_v53 }
 0x88e   : > { %5816 = vmatmul.mubr.bf16.vlgmr.msra.gmra.mrb[20].mxu0 %v5681_v2  ;;  %v8043_v2 = vld [vmem:[#allocation16 + $0x230] sm:$0xff]  }
 0x88f   : > { %6921 = vmatpush3.bf16.msra.mxu0 %v8031_v0  ;;  %5989 = vmatprep.mubr.bf16.mxu0 %v5858_v60 }
 0x890   : > { %6922 = vmatprep.subr.bf16.mxu0 %v8032_v59 }
 0x893   : > { %6923 = vmatpush3.bf16.msra.mxu0 %v8033_v62 }
 0x894   : > { %6924 = vmatprep.subr.bf16.mxu0 %v8034_v63 }
 0x897   : > { %6925 = vmatpush3.bf16.msra.mxu0 %v8035_v1 }
 0x898   : > { %6926 = vmatprep.subr.bf16.mxu0 %v8036_v3 }
 0x89b   : > { %6927 = vmatpush3.bf16.msra.mxu0 %v8037_v4 }
 0x89c   : > { %6928 = vmatprep.subr.bf16.mxu0 %v8038_v5 }
 0x89f   : > { %6929 = vmatpush3.bf16.msra.mxu0 %v8039_v24 }
 0x8a0   : > { %6930 = vmatprep.subr.bf16.mxu0 %v8040_v49 }
 0x8a3   : > { %6931 = vmatpush3.bf16.msra.mxu0 %v8041_v61 }
 0x8a4   : > { %6932 = vmatprep.subr.bf16.mxu0 %v8042_v14 }
 0x8a7   : > { %6933 = vmatpush3.bf16.msra.mxu0 %v8043_v2 }
 0x8a8   : > { %6934 = vmatprep.subr.bf16.mxu0 %v8044_v6 }
 0x8ab   : > { %6935 = vmatpush3.bf16.msra.mxu0 %v8045_v7 }
 0x8ae   : > { %5990 = vmatmul.mubr.bf16.vlgmr.msra.gmra.mrb[24].mxu0 %v5857_v50 }
 0x901   : > { %v6848_v44 = vpop.f32.mrb[8].mxu0 }
 0x902   : > { %v6849_v51 = vpop.f32.mrb[9].mxu0 }
 0x903   : > { %v6850_v8 = vadd.f32 %v6849_v51, %v6848_v44  ;;  %v6851_v9 = vpop.f32.mrb[10].mxu0 }
 0x904   : > { %v6852_v10 = vpop.f32.mrb[11].mxu0 }
 0x921   : > { %v6870_v13 = vpop.f32.mrb[12].mxu0 }
 0x922   : > { %v6871_v16 = vpop.f32.mrb[13].mxu0 }
 0x923   : > { %v6872_v19 = vadd.f32 %v6871_v16, %v6870_v13  ;;  %v6873_v58 = vpop.f32.mrb[14].mxu0 }
 0x924   : > { %v6874_v57 = vpop.f32.mrb[15].mxu0 }
 0x925   : > { %v5465_v20 = vadd.f32 %v6872_v19, %v6850_v8 }
 0x941   : > { %v6892_v30 = vpop.f32.mrb[16].mxu0 }
 0x942   : > { %v6893_v21 = vpop.f32.mrb[17].mxu0 }
 0x943   : > { %v6894_v23 = vadd.f32 %v6893_v21, %v6892_v30  ;;  %v6895_v17 = vpop.f32.mrb[18].mxu0 }
 0x944   : > { %v6896_v25 = vpop.f32.mrb[19].mxu0 }
 0x945   : > { %v5645_v26 = vadd.f32 %v6894_v23, %v5465_v20 }
 0x961   : > { %v6914_v32 = vpop.f32.mrb[20].mxu0 }
 0x962   : > { %v6915_v27 = vpop.f32.mrb[21].mxu0 }
 0x963   : > { %v6916_v12 = vadd.f32 %v6915_v27, %v6914_v32  ;;  %v6917_v28 = vpop.f32.mrb[22].mxu0 }
 0x964   : > { %v6918_v31 = vpop.f32.mrb[23].mxu0 }
 0x965   : > { %v5823_v33 = vadd.f32 %v6916_v12, %v5645_v26 }
 0x981   : > { %v6936_v34 = vpop.f32.mrb[24].mxu0 }
 0x982   : > { %v6937_v35 = vpop.f32.mrb[25].mxu0 }
 0x983   : > { %v6938_v36 = vadd.f32 %v6937_v35, %v6936_v34  ;;  %v6939_v37 = vpop.f32.mrb[26].mxu0 }
 0x984   : > { %v6940_v39 = vpop.f32.mrb[27].mxu0 }
 0x985   : > { %v5997_v40 = vadd.f32 %v6938_v36, %v5823_v33 }
 0x987   : > { %v6004_v41 = vmul.f32 %v6826_v38, %v5997_v40 }
 0x989   : > { %v6009_v55 = vadd.f32 %v6827_v42, %v6004_v41 }
 0x98b   : > { %6010 = vst [vmem:[%s491_s11] sm:$0xff] %v6009_v55 }
 0x98c   : > { %8245 = shalt.err (!%p8242_p8)
}
 0x98d   : > { %s8246_s20 = scalar_lea.hbm %s8910_s2, 128  ;;  %s8250_s11 = scalar_lea.hbm %s9008_s0, 256 }
 0x98e   : > { %p8247_p3 = scmp.ne.s32.totalorder %s8910_s2, %s8246_s20  ;;  %p8251_p0 = scmp.lt.u32.totalorder %s8910_s2, %s9008_s0 }
 0x98f   : > { %p8252_p11 = scmp.lt.u32.totalorder %s8250_s11, %s8246_s20  ;;  %p8254_p6 = scmp.lt.u32.totalorder %s8246_s20, %s8910_s2 }
 0x990   : > { %p8248_p12 = pnand %p8247_p3, %p9009_p5 }
 0x991   : > { %p8253_p7 = por %p8252_p11, %p8251_p0 }
 0x992   : > { %p8249_p13 = pneg %p8248_p12 }
 0x993   : > { %p8255_p10 = por %p8254_p6, %p8253_p7 }
 0x995   : > { %p8256_p1 = pnand %p8255_p10, %p8249_p13 }
 0x997   : > { %8259 = shalt.err (!%p8256_p1)
}
 0x998   : > { %7028 = dma.vmem_to_hbm [thread:$0]  (%p9009_p5), %s8912_s24, 128, %s8910_s2, %s6012_s9  }
 0x999 PF: > { %s6038_s23 = sand.u32 1, %s8306_s17   ;;  %p9010_p2 = scmp.ne.s32.totalorder %s8999_s12, 0 }
 0x99a   : > { %p9011_p4 = scmp.ge.s32.totalorder %s8326_s22, 2  ;;  %s6039_s13 = scalar_lea.sflag [#allocation9], %s6038_s23 }
 0x99c   : > { %p7051_p9 = pnand %p9011_p4, %p9010_p2 }
 0x99e   : > { %8301 = dma.done.wait (!%p7051_p9), %s6039_s13, 128  }
 0x99f   : > { %8303 = vsyncadd (!%p7051_p9), %s6039_s13, 4294967168  ;;  %s30_s22 = sadd.s32 1, %s8326_s22   ;;  %s9012_s17 = smov %s8310_s18 }
 0x9a0   : > { %p27_p8 = scmp.ge.s32.totalorder %s30_s22, 4   ;;  %s9013_s18 = smov %s8314_s19 }
 0x9a1   : > { %s9014_s19 = smov %s8608_s29  ;;  %s9015_s20 = smov %s8322_s21 }
 0x9a2   : > { %s9016_s21 = smov %s9018_s1  ;;  %29 = sbr.rel (!%p27_p8) target bundleno = 17 (0x11), region = 157 }
 0x9a9   :  { %6044 = vsyncpa [#allocation8], 1 }
 0x9aa   :  { %6046 = vsyncpa [#allocation8 + $0x1], 1 }
 0x9ab   :  { %6047 = vsyncpa [#allocation11], 1 }
 0x9ac   :  { %6048 = vsyncpa [#allocation14], 1 }
 0x9ad   :  { %6049 = vsyncpa [#allocation17], 1 }
 0x9ae   :  { %6050 = vsyncpa [#allocation9], 1 }
 0x9af   :  { %6052 = vsyncpa [#allocation9 + $0x1], 1 }

</bundles_post_ra>
